<compile_context>
chip_gen: v5e
topology: v5e:2x2
jax: 0.10.0
libtpu: 0.0.40
codegen_flags: <defaults>
</compile_context>

<pallas_src>
import functools

import jax
import jax.numpy as jnp
from jax.experimental import pallas as pl
from jax.experimental.pallas import tpu as pltpu

K = 7          # conv kernel size
PAD = K // 2   # "same" padding
N_ACC = 4      # independent accumulator chains in the conv tap loop


def _spatial_attention_kernel(H, W, x_ref, w_ref, o_ref,
                              flat_ref, pad_ref, col_ref, attn_ref):
    # x_ref   : (C, H*W)       VMEM  lane-dense input slab (one batch element)
    # w_ref   : (2*K*K,)       SMEM  conv weights [i, kh, kw]; i==0 pre-scaled by 1/C
    # o_ref   : (C, H*W)       VMEM  lane-dense output slab
    # flat_ref: (2, H*W)       VMEM  scratch: channel-sum / channel-max rows
    # pad_ref : (2, H+6, W+6)  VMEM  scratch: zero-padded conv input planes
    # col_ref : (H+6, W)       VMEM  scratch: lane-shifted column block (reused for attn rows)
    # attn_ref: (1, H*W)       VMEM  scratch: flattened attention map
    C, HW = x_ref.shape
    Hp, Wp = H + 2 * PAD, W + 2 * PAD

    # ---- channel reductions (lane-dense).  1/C is folded into w_ref[:K*K],
    # so only the channel *sum* is needed; max is exact in any dtype. ----
    x_in = x_ref[...]
    flat_ref[0:1, :] = jnp.sum(x_in.astype(jnp.float32), axis=0, keepdims=True)
    flat_ref[1:2, :] = jnp.max(x_in, axis=0, keepdims=True).astype(jnp.float32)
    # x_in is dead here; the gate at the end re-reads x_ref (low vreg pressure).

    # ---- zero only the PAD-wide border of the padded planes; the interior is
    # fully overwritten every step, so no full-scratch clear is needed. ----
    for c in range(2):
        pad_ref[c, 0:PAD, :] = jnp.zeros((PAD, Wp), jnp.float32)
        pad_ref[c, PAD + H:Hp, :] = jnp.zeros((PAD, Wp), jnp.float32)
        pad_ref[c, PAD:PAD + H, 0:PAD] = jnp.zeros((H, PAD), jnp.float32)
        pad_ref[c, PAD:PAD + H, PAD + W:Wp] = jnp.zeros((H, PAD), jnp.float32)

    # ---- scatter the flat (1, H*W) reduced maps into the (H, W) interior of
    # the padded planes, one W-wide row at a time (tiny: 2*H small copies). ----
    for c in range(2):
        for r in range(H):
            pad_ref[c, pl.ds(PAD + r, 1), pl.ds(PAD, W)] = (
                flat_ref[pl.ds(c, 1), pl.ds(r * W, W)])

    # ---- 7x7, 2->1 channel conv, unrolled.  Hoist the lane (kx) shift out of
    # the ky loop: one lane-shifted (Hp, W) block per (c, kx) -> 14 lane shifts
    # instead of 98; the inner reads are cheap sublane-offset loads. ----
    accs = [jnp.zeros((H, W), jnp.float32) for _ in range(N_ACC)]
    for c in range(2):
        for kx in range(K):
            col_ref[...] = pad_ref[c, :, pl.ds(kx, W)]          # (Hp, W)
            for ky in range(K):
                w = w_ref[c * K * K + ky * K + kx]
                accs[ky % N_ACC] = accs[ky % N_ACC] + w * col_ref[pl.ds(ky, H), :]
    acc = (accs[0] + accs[1]) + (accs[2] + accs[3])
    attn_hw = jax.nn.sigmoid(acc)                               # (H, W) f32

    # ---- flatten the attention map back to a lane-dense (1, H*W) row. ----
    col_ref[pl.ds(0, H), :] = attn_hw
    for r in range(H):
        attn_ref[pl.ds(0, 1), pl.ds(r * W, W)] = col_ref[pl.ds(r, 1), :]

    # ---- gate: re-read x_ref (native dtype) and store lane-dense. ----
    attn_row = attn_ref[...].astype(o_ref.dtype)                # (1, H*W)
    o_ref[...] = (x_ref[...] * attn_row).astype(o_ref.dtype)


def spatial_attention(x, weight):
    """x: (N, C, H, W), weight: (1, 2, K, K) -> (N, C, H, W)."""
    N, C, H, W = x.shape
    HW = H * W
    Hp, Wp = H + 2 * PAD, W + 2 * PAD

    # Fold the 1/C of the channel mean into the avg-plane (input channel 0)
    # weights; flatten to an SMEM scalar table indexed as [i, kh, kw].
    w32 = weight.astype(jnp.float32)
    w_flat = jnp.concatenate([w32[0, 0].reshape(-1) / C, w32[0, 1].reshape(-1)])

    # Lane-dense layout for the heavy read/gate/store path.
    x_flat = x.reshape(N, C, HW)

    itemsize = jnp.dtype(x.dtype).itemsize
    cost = pl.CostEstimate(
        flops=3 * N * C * HW + 4 * K * K * N * HW,
        transcendentals=N * HW,                       # sigmoid
        bytes_accessed=2 * N * C * HW * itemsize + 2 * K * K * 4,
    )

    out_flat = pl.pallas_call(
        functools.partial(_spatial_attention_kernel, H, W),
        out_shape=jax.ShapeDtypeStruct((N, C, HW), x.dtype),
        grid=(N,),
        in_specs=[
            pl.BlockSpec((None, C, HW), lambda n: (n, 0, 0)),
            pl.BlockSpec(memory_space=pltpu.MemorySpace.SMEM),
        ],
        out_specs=pl.BlockSpec((None, C, HW), lambda n: (n, 0, 0)),
        scratch_shapes=[
            pltpu.VMEM((2, HW), jnp.float32),         # flat sum/max rows
            pltpu.VMEM((2, Hp, Wp), jnp.float32),     # zero-padded conv planes
            pltpu.VMEM((Hp, W), jnp.float32),         # lane-shifted column block
            pltpu.VMEM((1, HW), jnp.float32),         # flattened attention map
        ],
        compiler_params=pltpu.CompilerParams(
            dimension_semantics=("parallel",),
            vmem_limit_bytes=32 * 1024 * 1024,
        ),
        cost_estimate=cost,
    )(x_flat, w_flat)

    return out_flat.reshape(N, C, H, W)


def _reference(x, weight):
    """Pure-JAX reference matching the PyTorch forward."""
    avg = jnp.mean(x, axis=1, keepdims=True)
    mx = jnp.max(x, axis=1, keepdims=True)
    concat = jnp.concatenate([avg, mx], axis=1)
    conv = jax.lax.conv_general_dilated(
        concat, weight, window_strides=(1, 1),
        padding=((PAD, PAD), (PAD, PAD)),
        dimension_numbers=("NCHW", "OIHW", "NCHW"))
    return x * jax.nn.sigmoid(conv)


if __name__ == "__main__":
    key = jax.random.PRNGKey(0)
    kx, kw = jax.random.split(key)

    N, C, H, W = 2, 4, 16, 16
    x = jax.random.normal(kx, (N, C, H, W), dtype=jnp.float32)

    # Deterministic init mimicking nn.Conv2d default (uniform +/- 1/sqrt(fan_in)).
    fan_in = 2 * K * K
    bound = 1.0 / (fan_in ** 0.5)
    weight = jax.random.uniform(kw, (1, 2, K, K), minval=-bound, maxval=bound,
                                dtype=jnp.float32)

    out = jax.block_until_ready(spatial_attention(x, weight))

    ref = _reference(x, weight)
    assert out.shape == (N, C, H, W)
    assert jnp.allclose(out, ref, atol=1e-4, rtol=1e-4), "mismatch vs reference"

    print("KERNEL_OK")
</pallas_src>

<mosaic_0001>
module attributes {stable_mosaic.version = 11 : i64} {
  func.func @_spatial_attention_kernel(%arg0: i32, %arg1: memref<1x4x256xf32, #tpu.memory_space<vmem>>, %arg2: memref<98xf32, #tpu.memory_space<smem>>, %arg3: memref<1x4x256xf32, #tpu.memory_space<vmem>>, %arg4: memref<2x256xf32, #tpu.memory_space<vmem>>, %arg5: memref<2x22x22xf32, #tpu.memory_space<vmem>>, %arg6: memref<22x16xf32, #tpu.memory_space<vmem>>, %arg7: memref<1x256xf32, #tpu.memory_space<vmem>>) attributes {dimension_semantics = [#tpu.dimension_semantics<parallel>], iteration_bounds = array<i64: 2>, scalar_prefetch = 0 : i64, scratch_operands = 4 : i64, tpu.core_type = #tpu.core_type<tc>, window_params = [{transform_indices = @transform_0, window_bounds = array<i64: 1, 4, 256>}, {transform_indices = @transform_1, window_bounds = array<i64: 98>}, {transform_indices = @transform_2, window_bounds = array<i64: 1, 4, 256>}]} {
    %c0 = arith.constant 0 : index
    %c0_0 = arith.constant 0 : index
    %c0_1 = arith.constant 0 : index
    %0 = vector.load %arg1[%c0, %c0_0, %c0_1] : memref<1x4x256xf32, #tpu.memory_space<vmem>>, vector<1x4x256xf32>
    %1 = vector.shape_cast %0 : vector<1x4x256xf32> to vector<4x256xf32>
    %cst = arith.constant dense<0.000000e+00> : vector<256xf32>
    %2 = vector.multi_reduction <add>, %1, %cst [0] : vector<4x256xf32> to vector<256xf32>
    %3 = vector.shape_cast %2 : vector<256xf32> to vector<1x256xf32>
    %c0_2 = arith.constant 0 : index
    %c0_3 = arith.constant 0 : index
    %4 = vector.load %arg4[%c0_2, %c0_3] : memref<2x256xf32, #tpu.memory_space<vmem>>, vector<1x256xf32>
    tpu.vector_store %arg4[%c0_2, %c0_3], %3 {strides = array<i32>} : memref<2x256xf32, #tpu.memory_space<vmem>>, vector<1x256xf32>,
    %cst_4 = arith.constant dense<0xFF800000> : vector<256xf32>
    %5 = vector.multi_reduction <maximumf>, %1, %cst_4 [0] : vector<4x256xf32> to vector<256xf32>
    %6 = vector.shape_cast %5 : vector<256xf32> to vector<1x256xf32>
    %c1 = arith.constant 1 : index
    %c0_5 = arith.constant 0 : index
    %7 = vector.load %arg4[%c1, %c0_5] : memref<2x256xf32, #tpu.memory_space<vmem>>, vector<1x256xf32>
    tpu.vector_store %arg4[%c1, %c0_5], %6 {strides = array<i32>} : memref<2x256xf32, #tpu.memory_space<vmem>>, vector<1x256xf32>,
    %cst_6 = arith.constant 0.000000e+00 : f32
    %8 = vector.broadcast %cst_6 : f32 to vector<3x22xf32>
    %c0_7 = arith.constant 0 : index
    %c0_8 = arith.constant 0 : index
    %c0_9 = arith.constant 0 : index
    %9 = vector.load %arg5[%c0_7, %c0_8, %c0_9] : memref<2x22x22xf32, #tpu.memory_space<vmem>>, vector<1x3x22xf32>
    %10 = vector.shape_cast %9 : vector<1x3x22xf32> to vector<3x22xf32>
    %11 = vector.shape_cast %8 : vector<3x22xf32> to vector<1x3x22xf32>
    tpu.vector_store %arg5[%c0_7, %c0_8, %c0_9], %11 {strides = array<i32>} : memref<2x22x22xf32, #tpu.memory_space<vmem>>, vector<1x3x22xf32>,
    %cst_10 = arith.constant 0.000000e+00 : f32
    %12 = vector.broadcast %cst_10 : f32 to vector<3x22xf32>
    %c0_11 = arith.constant 0 : index
    %c19 = arith.constant 19 : index
    %c0_12 = arith.constant 0 : index
    %13 = vector.load %arg5[%c0_11, %c19, %c0_12] : memref<2x22x22xf32, #tpu.memory_space<vmem>>, vector<1x3x22xf32>
    %14 = vector.shape_cast %13 : vector<1x3x22xf32> to vector<3x22xf32>
    %15 = vector.shape_cast %12 : vector<3x22xf32> to vector<1x3x22xf32>
    tpu.vector_store %arg5[%c0_11, %c19, %c0_12], %15 {strides = array<i32>} : memref<2x22x22xf32, #tpu.memory_space<vmem>>, vector<1x3x22xf32>,
    %cst_13 = arith.constant 0.000000e+00 : f32
    %16 = vector.broadcast %cst_13 : f32 to vector<16x3xf32>
    %c0_14 = arith.constant 0 : index
    %c3 = arith.constant 3 : index
    %c0_15 = arith.constant 0 : index
    %17 = vector.load %arg5[%c0_14, %c3, %c0_15] : memref<2x22x22xf32, #tpu.memory_space<vmem>>, vector<1x16x3xf32>
    %18 = vector.shape_cast %17 : vector<1x16x3xf32> to vector<16x3xf32>
    %19 = vector.shape_cast %16 : vector<16x3xf32> to vector<1x16x3xf32>
    tpu.vector_store %arg5[%c0_14, %c3, %c0_15], %19 {strides = array<i32>} : memref<2x22x22xf32, #tpu.memory_space<vmem>>, vector<1x16x3xf32>,
    %cst_16 = arith.constant 0.000000e+00 : f32
    %20 = vector.broadcast %cst_16 : f32 to vector<16x3xf32>
    %c0_17 = arith.constant 0 : index
    %c3_18 = arith.constant 3 : index
    %c19_19 = arith.constant 19 : index
    %21 = vector.load %arg5[%c0_17, %c3_18, %c19_19] : memref<2x22x22xf32, #tpu.memory_space<vmem>>, vector<1x16x3xf32>
    %22 = vector.shape_cast %21 : vector<1x16x3xf32> to vector<16x3xf32>
    %23 = vector.shape_cast %20 : vector<16x3xf32> to vector<1x16x3xf32>
    tpu.vector_store %arg5[%c0_17, %c3_18, %c19_19], %23 {strides = array<i32>} : memref<2x22x22xf32, #tpu.memory_space<vmem>>, vector<1x16x3xf32>,
    %cst_20 = arith.constant 0.000000e+00 : f32
    %24 = vector.broadcast %cst_20 : f32 to vector<3x22xf32>
    %c1_21 = arith.constant 1 : index
    %c0_22 = arith.constant 0 : index
    %c0_23 = arith.constant 0 : index
    %25 = vector.load %arg5[%c1_21, %c0_22, %c0_23] : memref<2x22x22xf32, #tpu.memory_space<vmem>>, vector<1x3x22xf32>
    %26 = vector.shape_cast %25 : vector<1x3x22xf32> to vector<3x22xf32>
    %27 = vector.shape_cast %24 : vector<3x22xf32> to vector<1x3x22xf32>
    tpu.vector_store %arg5[%c1_21, %c0_22, %c0_23], %27 {strides = array<i32>} : memref<2x22x22xf32, #tpu.memory_space<vmem>>, vector<1x3x22xf32>,
    %cst_24 = arith.constant 0.000000e+00 : f32
    %28 = vector.broadcast %cst_24 : f32 to vector<3x22xf32>
    %c1_25 = arith.constant 1 : index
    %c19_26 = arith.constant 19 : index
    %c0_27 = arith.constant 0 : index
    %29 = vector.load %arg5[%c1_25, %c19_26, %c0_27] : memref<2x22x22xf32, #tpu.memory_space<vmem>>, vector<1x3x22xf32>
    %30 = vector.shape_cast %29 : vector<1x3x22xf32> to vector<3x22xf32>
    %31 = vector.shape_cast %28 : vector<3x22xf32> to vector<1x3x22xf32>
    tpu.vector_store %arg5[%c1_25, %c19_26, %c0_27], %31 {strides = array<i32>} : memref<2x22x22xf32, #tpu.memory_space<vmem>>, vector<1x3x22xf32>,
    %cst_28 = arith.constant 0.000000e+00 : f32
    %32 = vector.broadcast %cst_28 : f32 to vector<16x3xf32>
    %c1_29 = arith.constant 1 : index
    %c3_30 = arith.constant 3 : index
    %c0_31 = arith.constant 0 : index
    %33 = vector.load %arg5[%c1_29, %c3_30, %c0_31] : memref<2x22x22xf32, #tpu.memory_space<vmem>>, vector<1x16x3xf32>
    %34 = vector.shape_cast %33 : vector<1x16x3xf32> to vector<16x3xf32>
    %35 = vector.shape_cast %32 : vector<16x3xf32> to vector<1x16x3xf32>
    tpu.vector_store %arg5[%c1_29, %c3_30, %c0_31], %35 {strides = array<i32>} : memref<2x22x22xf32, #tpu.memory_space<vmem>>, vector<1x16x3xf32>,
    %cst_32 = arith.constant 0.000000e+00 : f32
    %36 = vector.broadcast %cst_32 : f32 to vector<16x3xf32>
    %c1_33 = arith.constant 1 : index
    %c3_34 = arith.constant 3 : index
    %c19_35 = arith.constant 19 : index
    %37 = vector.load %arg5[%c1_33, %c3_34, %c19_35] : memref<2x22x22xf32, #tpu.memory_space<vmem>>, vector<1x16x3xf32>
    %38 = vector.shape_cast %37 : vector<1x16x3xf32> to vector<16x3xf32>
    %39 = vector.shape_cast %36 : vector<16x3xf32> to vector<1x16x3xf32>
    tpu.vector_store %arg5[%c1_33, %c3_34, %c19_35], %39 {strides = array<i32>} : memref<2x22x22xf32, #tpu.memory_space<vmem>>, vector<1x16x3xf32>,
    %c0_36 = arith.constant 0 : index
    %c0_37 = arith.constant 0 : index
    %40 = vector.load %arg4[%c0_36, %c0_37] : memref<2x256xf32, #tpu.memory_space<vmem>>, vector<1x16xf32>
    %c0_38 = arith.constant 0 : index
    %c3_39 = arith.constant 3 : index
    %c3_40 = arith.constant 3 : index
    %41 = vector.load %arg5[%c0_38, %c3_39, %c3_40] : memref<2x22x22xf32, #tpu.memory_space<vmem>>, vector<1x1x16xf32>
    %42 = vector.shape_cast %41 : vector<1x1x16xf32> to vector<1x16xf32>
    %43 = vector.shape_cast %40 : vector<1x16xf32> to vector<1x1x16xf32>
    tpu.vector_store %arg5[%c0_38, %c3_39, %c3_40], %43 {strides = array<i32>} : memref<2x22x22xf32, #tpu.memory_space<vmem>>, vector<1x1x16xf32>,
    %c0_41 = arith.constant 0 : index
    %c16 = arith.constant 16 : index
    %44 = vector.load %arg4[%c0_41, %c16] : memref<2x256xf32, #tpu.memory_space<vmem>>, vector<1x16xf32>
    %c0_42 = arith.constant 0 : index
    %c4 = arith.constant 4 : index
    %c3_43 = arith.constant 3 : index
    %45 = vector.load %arg5[%c0_42, %c4, %c3_43] : memref<2x22x22xf32, #tpu.memory_space<vmem>>, vector<1x1x16xf32>
    %46 = vector.shape_cast %45 : vector<1x1x16xf32> to vector<1x16xf32>
    %47 = vector.shape_cast %44 : vector<1x16xf32> to vector<1x1x16xf32>
    tpu.vector_store %arg5[%c0_42, %c4, %c3_43], %47 {strides = array<i32>} : memref<2x22x22xf32, #tpu.memory_space<vmem>>, vector<1x1x16xf32>,
    %c0_44 = arith.constant 0 : index
    %c32 = arith.constant 32 : index
    %48 = vector.load %arg4[%c0_44, %c32] : memref<2x256xf32, #tpu.memory_space<vmem>>, vector<1x16xf32>
    %c0_45 = arith.constant 0 : index
    %c5 = arith.constant 5 : index
    %c3_46 = arith.constant 3 : index
    %49 = vector.load %arg5[%c0_45, %c5, %c3_46] : memref<2x22x22xf32, #tpu.memory_space<vmem>>, vector<1x1x16xf32>
    %50 = vector.shape_cast %49 : vector<1x1x16xf32> to vector<1x16xf32>
    %51 = vector.shape_cast %48 : vector<1x16xf32> to vector<1x1x16xf32>
    tpu.vector_store %arg5[%c0_45, %c5, %c3_46], %51 {strides = array<i32>} : memref<2x22x22xf32, #tpu.memory_space<vmem>>, vector<1x1x16xf32>,
    %c0_47 = arith.constant 0 : index
    %c48 = arith.constant 48 : index
    %52 = vector.load %arg4[%c0_47, %c48] : memref<2x256xf32, #tpu.memory_space<vmem>>, vector<1x16xf32>
    %c0_48 = arith.constant 0 : index
    %c6 = arith.constant 6 : index
    %c3_49 = arith.constant 3 : index
    %53 = vector.load %arg5[%c0_48, %c6, %c3_49] : memref<2x22x22xf32, #tpu.memory_space<vmem>>, vector<1x1x16xf32>
    %54 = vector.shape_cast %53 : vector<1x1x16xf32> to vector<1x16xf32>
    %55 = vector.shape_cast %52 : vector<1x16xf32> to vector<1x1x16xf32>
    tpu.vector_store %arg5[%c0_48, %c6, %c3_49], %55 {strides = array<i32>} : memref<2x22x22xf32, #tpu.memory_space<vmem>>, vector<1x1x16xf32>,
    %c0_50 = arith.constant 0 : index
    %c64 = arith.constant 64 : index
    %56 = vector.load %arg4[%c0_50, %c64] : memref<2x256xf32, #tpu.memory_space<vmem>>, vector<1x16xf32>
    %c0_51 = arith.constant 0 : index
    %c7 = arith.constant 7 : index
    %c3_52 = arith.constant 3 : index
    %57 = vector.load %arg5[%c0_51, %c7, %c3_52] : memref<2x22x22xf32, #tpu.memory_space<vmem>>, vector<1x1x16xf32>
    %58 = vector.shape_cast %57 : vector<1x1x16xf32> to vector<1x16xf32>
    %59 = vector.shape_cast %56 : vector<1x16xf32> to vector<1x1x16xf32>
    tpu.vector_store %arg5[%c0_51, %c7, %c3_52], %59 {strides = array<i32>} : memref<2x22x22xf32, #tpu.memory_space<vmem>>, vector<1x1x16xf32>,
    %c0_53 = arith.constant 0 : index
    %c80 = arith.constant 80 : index
    %60 = vector.load %arg4[%c0_53, %c80] : memref<2x256xf32, #tpu.memory_space<vmem>>, vector<1x16xf32>
    %c0_54 = arith.constant 0 : index
    %c8 = arith.constant 8 : index
    %c3_55 = arith.constant 3 : index
    %61 = vector.load %arg5[%c0_54, %c8, %c3_55] : memref<2x22x22xf32, #tpu.memory_space<vmem>>, vector<1x1x16xf32>
    %62 = vector.shape_cast %61 : vector<1x1x16xf32> to vector<1x16xf32>
    %63 = vector.shape_cast %60 : vector<1x16xf32> to vector<1x1x16xf32>
    tpu.vector_store %arg5[%c0_54, %c8, %c3_55], %63 {strides = array<i32>} : memref<2x22x22xf32, #tpu.memory_space<vmem>>, vector<1x1x16xf32>,
    %c0_56 = arith.constant 0 : index
    %c96 = arith.constant 96 : index
    %64 = vector.load %arg4[%c0_56, %c96] : memref<2x256xf32, #tpu.memory_space<vmem>>, vector<1x16xf32>
    %c0_57 = arith.constant 0 : index
    %c9 = arith.constant 9 : index
    %c3_58 = arith.constant 3 : index
    %65 = vector.load %arg5[%c0_57, %c9, %c3_58] : memref<2x22x22xf32, #tpu.memory_space<vmem>>, vector<1x1x16xf32>
    %66 = vector.shape_cast %65 : vector<1x1x16xf32> to vector<1x16xf32>
    %67 = vector.shape_cast %64 : vector<1x16xf32> to vector<1x1x16xf32>
    tpu.vector_store %arg5[%c0_57, %c9, %c3_58], %67 {strides = array<i32>} : memref<2x22x22xf32, #tpu.memory_space<vmem>>, vector<1x1x16xf32>,
    %c0_59 = arith.constant 0 : index
    %c112 = arith.constant 112 : index
    %68 = vector.load %arg4[%c0_59, %c112] : memref<2x256xf32, #tpu.memory_space<vmem>>, vector<1x16xf32>
    %c0_60 = arith.constant 0 : index
    %c10 = arith.constant 10 : index
    %c3_61 = arith.constant 3 : index
    %69 = vector.load %arg5[%c0_60, %c10, %c3_61] : memref<2x22x22xf32, #tpu.memory_space<vmem>>, vector<1x1x16xf32>
    %70 = vector.shape_cast %69 : vector<1x1x16xf32> to vector<1x16xf32>
    %71 = vector.shape_cast %68 : vector<1x16xf32> to vector<1x1x16xf32>
    tpu.vector_store %arg5[%c0_60, %c10, %c3_61], %71 {strides = array<i32>} : memref<2x22x22xf32, #tpu.memory_space<vmem>>, vector<1x1x16xf32>,
    %c0_62 = arith.constant 0 : index
    %c128 = arith.constant 128 : index
    %72 = vector.load %arg4[%c0_62, %c128] : memref<2x256xf32, #tpu.memory_space<vmem>>, vector<1x16xf32>
    %c0_63 = arith.constant 0 : index
    %c11 = arith.constant 11 : index
    %c3_64 = arith.constant 3 : index
    %73 = vector.load %arg5[%c0_63, %c11, %c3_64] : memref<2x22x22xf32, #tpu.memory_space<vmem>>, vector<1x1x16xf32>
    %74 = vector.shape_cast %73 : vector<1x1x16xf32> to vector<1x16xf32>
    %75 = vector.shape_cast %72 : vector<1x16xf32> to vector<1x1x16xf32>
    tpu.vector_store %arg5[%c0_63, %c11, %c3_64], %75 {strides = array<i32>} : memref<2x22x22xf32, #tpu.memory_space<vmem>>, vector<1x1x16xf32>,
    %c0_65 = arith.constant 0 : index
    %c144 = arith.constant 144 : index
    %76 = vector.load %arg4[%c0_65, %c144] : memref<2x256xf32, #tpu.memory_space<vmem>>, vector<1x16xf32>
    %c0_66 = arith.constant 0 : index
    %c12 = arith.constant 12 : index
    %c3_67 = arith.constant 3 : index
    %77 = vector.load %arg5[%c0_66, %c12, %c3_67] : memref<2x22x22xf32, #tpu.memory_space<vmem>>, vector<1x1x16xf32>
    %78 = vector.shape_cast %77 : vector<1x1x16xf32> to vector<1x16xf32>
    %79 = vector.shape_cast %76 : vector<1x16xf32> to vector<1x1x16xf32>
    tpu.vector_store %arg5[%c0_66, %c12, %c3_67], %79 {strides = array<i32>} : memref<2x22x22xf32, #tpu.memory_space<vmem>>, vector<1x1x16xf32>,
    %c0_68 = arith.constant 0 : index
    %c160 = arith.constant 160 : index
    %80 = vector.load %arg4[%c0_68, %c160] : memref<2x256xf32, #tpu.memory_space<vmem>>, vector<1x16xf32>
    %c0_69 = arith.constant 0 : index
    %c13 = arith.constant 13 : index
    %c3_70 = arith.constant 3 : index
    %81 = vector.load %arg5[%c0_69, %c13, %c3_70] : memref<2x22x22xf32, #tpu.memory_space<vmem>>, vector<1x1x16xf32>
    %82 = vector.shape_cast %81 : vector<1x1x16xf32> to vector<1x16xf32>
    %83 = vector.shape_cast %80 : vector<1x16xf32> to vector<1x1x16xf32>
    tpu.vector_store %arg5[%c0_69, %c13, %c3_70], %83 {strides = array<i32>} : memref<2x22x22xf32, #tpu.memory_space<vmem>>, vector<1x1x16xf32>,
    %c0_71 = arith.constant 0 : index
    %c176 = arith.constant 176 : index
    %84 = vector.load %arg4[%c0_71, %c176] : memref<2x256xf32, #tpu.memory_space<vmem>>, vector<1x16xf32>
    %c0_72 = arith.constant 0 : index
    %c14 = arith.constant 14 : index
    %c3_73 = arith.constant 3 : index
    %85 = vector.load %arg5[%c0_72, %c14, %c3_73] : memref<2x22x22xf32, #tpu.memory_space<vmem>>, vector<1x1x16xf32>
    %86 = vector.shape_cast %85 : vector<1x1x16xf32> to vector<1x16xf32>
    %87 = vector.shape_cast %84 : vector<1x16xf32> to vector<1x1x16xf32>
    tpu.vector_store %arg5[%c0_72, %c14, %c3_73], %87 {strides = array<i32>} : memref<2x22x22xf32, #tpu.memory_space<vmem>>, vector<1x1x16xf32>,
    %c0_74 = arith.constant 0 : index
    %c192 = arith.constant 192 : index
    %88 = vector.load %arg4[%c0_74, %c192] : memref<2x256xf32, #tpu.memory_space<vmem>>, vector<1x16xf32>
    %c0_75 = arith.constant 0 : index
    %c15 = arith.constant 15 : index
    %c3_76 = arith.constant 3 : index
    %89 = vector.load %arg5[%c0_75, %c15, %c3_76] : memref<2x22x22xf32, #tpu.memory_space<vmem>>, vector<1x1x16xf32>
    %90 = vector.shape_cast %89 : vector<1x1x16xf32> to vector<1x16xf32>
    %91 = vector.shape_cast %88 : vector<1x16xf32> to vector<1x1x16xf32>
    tpu.vector_store %arg5[%c0_75, %c15, %c3_76], %91 {strides = array<i32>} : memref<2x22x22xf32, #tpu.memory_space<vmem>>, vector<1x1x16xf32>,
    %c0_77 = arith.constant 0 : index
    %c208 = arith.constant 208 : index
    %92 = vector.load %arg4[%c0_77, %c208] : memref<2x256xf32, #tpu.memory_space<vmem>>, vector<1x16xf32>
    %c0_78 = arith.constant 0 : index
    %c16_79 = arith.constant 16 : index
    %c3_80 = arith.constant 3 : index
    %93 = vector.load %arg5[%c0_78, %c16_79, %c3_80] : memref<2x22x22xf32, #tpu.memory_space<vmem>>, vector<1x1x16xf32>
    %94 = vector.shape_cast %93 : vector<1x1x16xf32> to vector<1x16xf32>
    %95 = vector.shape_cast %92 : vector<1x16xf32> to vector<1x1x16xf32>
    tpu.vector_store %arg5[%c0_78, %c16_79, %c3_80], %95 {strides = array<i32>} : memref<2x22x22xf32, #tpu.memory_space<vmem>>, vector<1x1x16xf32>,
    %c0_81 = arith.constant 0 : index
    %c224 = arith.constant 224 : index
    %96 = vector.load %arg4[%c0_81, %c224] : memref<2x256xf32, #tpu.memory_space<vmem>>, vector<1x16xf32>
    %c0_82 = arith.constant 0 : index
    %c17 = arith.constant 17 : index
    %c3_83 = arith.constant 3 : index
    %97 = vector.load %arg5[%c0_82, %c17, %c3_83] : memref<2x22x22xf32, #tpu.memory_space<vmem>>, vector<1x1x16xf32>
    %98 = vector.shape_cast %97 : vector<1x1x16xf32> to vector<1x16xf32>
    %99 = vector.shape_cast %96 : vector<1x16xf32> to vector<1x1x16xf32>
    tpu.vector_store %arg5[%c0_82, %c17, %c3_83], %99 {strides = array<i32>} : memref<2x22x22xf32, #tpu.memory_space<vmem>>, vector<1x1x16xf32>,
    %c0_84 = arith.constant 0 : index
    %c240 = arith.constant 240 : index
    %100 = vector.load %arg4[%c0_84, %c240] : memref<2x256xf32, #tpu.memory_space<vmem>>, vector<1x16xf32>
    %c0_85 = arith.constant 0 : index
    %c18 = arith.constant 18 : index
    %c3_86 = arith.constant 3 : index
    %101 = vector.load %arg5[%c0_85, %c18, %c3_86] : memref<2x22x22xf32, #tpu.memory_space<vmem>>, vector<1x1x16xf32>
    %102 = vector.shape_cast %101 : vector<1x1x16xf32> to vector<1x16xf32>
    %103 = vector.shape_cast %100 : vector<1x16xf32> to vector<1x1x16xf32>
    tpu.vector_store %arg5[%c0_85, %c18, %c3_86], %103 {strides = array<i32>} : memref<2x22x22xf32, #tpu.memory_space<vmem>>, vector<1x1x16xf32>,
    %c1_87 = arith.constant 1 : index
    %c0_88 = arith.constant 0 : index
    %104 = vector.load %arg4[%c1_87, %c0_88] : memref<2x256xf32, #tpu.memory_space<vmem>>, vector<1x16xf32>
    %c1_89 = arith.constant 1 : index
    %c3_90 = arith.constant 3 : index
    %c3_91 = arith.constant 3 : index
    %105 = vector.load %arg5[%c1_89, %c3_90, %c3_91] : memref<2x22x22xf32, #tpu.memory_space<vmem>>, vector<1x1x16xf32>
    %106 = vector.shape_cast %105 : vector<1x1x16xf32> to vector<1x16xf32>
    %107 = vector.shape_cast %104 : vector<1x16xf32> to vector<1x1x16xf32>
    tpu.vector_store %arg5[%c1_89, %c3_90, %c3_91], %107 {strides = array<i32>} : memref<2x22x22xf32, #tpu.memory_space<vmem>>, vector<1x1x16xf32>,
    %c1_92 = arith.constant 1 : index
    %c16_93 = arith.constant 16 : index
    %108 = vector.load %arg4[%c1_92, %c16_93] : memref<2x256xf32, #tpu.memory_space<vmem>>, vector<1x16xf32>
    %c1_94 = arith.constant 1 : index
    %c4_95 = arith.constant 4 : index
    %c3_96 = arith.constant 3 : index
    %109 = vector.load %arg5[%c1_94, %c4_95, %c3_96] : memref<2x22x22xf32, #tpu.memory_space<vmem>>, vector<1x1x16xf32>
    %110 = vector.shape_cast %109 : vector<1x1x16xf32> to vector<1x16xf32>
    %111 = vector.shape_cast %108 : vector<1x16xf32> to vector<1x1x16xf32>
    tpu.vector_store %arg5[%c1_94, %c4_95, %c3_96], %111 {strides = array<i32>} : memref<2x22x22xf32, #tpu.memory_space<vmem>>, vector<1x1x16xf32>,
    %c1_97 = arith.constant 1 : index
    %c32_98 = arith.constant 32 : index
    %112 = vector.load %arg4[%c1_97, %c32_98] : memref<2x256xf32, #tpu.memory_space<vmem>>, vector<1x16xf32>
    %c1_99 = arith.constant 1 : index
    %c5_100 = arith.constant 5 : index
    %c3_101 = arith.constant 3 : index
    %113 = vector.load %arg5[%c1_99, %c5_100, %c3_101] : memref<2x22x22xf32, #tpu.memory_space<vmem>>, vector<1x1x16xf32>
    %114 = vector.shape_cast %113 : vector<1x1x16xf32> to vector<1x16xf32>
    %115 = vector.shape_cast %112 : vector<1x16xf32> to vector<1x1x16xf32>
    tpu.vector_store %arg5[%c1_99, %c5_100, %c3_101], %115 {strides = array<i32>} : memref<2x22x22xf32, #tpu.memory_space<vmem>>, vector<1x1x16xf32>,
    %c1_102 = arith.constant 1 : index
    %c48_103 = arith.constant 48 : index
    %116 = vector.load %arg4[%c1_102, %c48_103] : memref<2x256xf32, #tpu.memory_space<vmem>>, vector<1x16xf32>
    %c1_104 = arith.constant 1 : index
    %c6_105 = arith.constant 6 : index
    %c3_106 = arith.constant 3 : index
    %117 = vector.load %arg5[%c1_104, %c6_105, %c3_106] : memref<2x22x22xf32, #tpu.memory_space<vmem>>, vector<1x1x16xf32>
    %118 = vector.shape_cast %117 : vector<1x1x16xf32> to vector<1x16xf32>
    %119 = vector.shape_cast %116 : vector<1x16xf32> to vector<1x1x16xf32>
    tpu.vector_store %arg5[%c1_104, %c6_105, %c3_106], %119 {strides = array<i32>} : memref<2x22x22xf32, #tpu.memory_space<vmem>>, vector<1x1x16xf32>,
    %c1_107 = arith.constant 1 : index
    %c64_108 = arith.constant 64 : index
    %120 = vector.load %arg4[%c1_107, %c64_108] : memref<2x256xf32, #tpu.memory_space<vmem>>, vector<1x16xf32>
    %c1_109 = arith.constant 1 : index
    %c7_110 = arith.constant 7 : index
    %c3_111 = arith.constant 3 : index
    %121 = vector.load %arg5[%c1_109, %c7_110, %c3_111] : memref<2x22x22xf32, #tpu.memory_space<vmem>>, vector<1x1x16xf32>
    %122 = vector.shape_cast %121 : vector<1x1x16xf32> to vector<1x16xf32>
    %123 = vector.shape_cast %120 : vector<1x16xf32> to vector<1x1x16xf32>
    tpu.vector_store %arg5[%c1_109, %c7_110, %c3_111], %123 {strides = array<i32>} : memref<2x22x22xf32, #tpu.memory_space<vmem>>, vector<1x1x16xf32>,
    %c1_112 = arith.constant 1 : index
    %c80_113 = arith.constant 80 : index
    %124 = vector.load %arg4[%c1_112, %c80_113] : memref<2x256xf32, #tpu.memory_space<vmem>>, vector<1x16xf32>
    %c1_114 = arith.constant 1 : index
    %c8_115 = arith.constant 8 : index
    %c3_116 = arith.constant 3 : index
    %125 = vector.load %arg5[%c1_114, %c8_115, %c3_116] : memref<2x22x22xf32, #tpu.memory_space<vmem>>, vector<1x1x16xf32>
    %126 = vector.shape_cast %125 : vector<1x1x16xf32> to vector<1x16xf32>
    %127 = vector.shape_cast %124 : vector<1x16xf32> to vector<1x1x16xf32>
    tpu.vector_store %arg5[%c1_114, %c8_115, %c3_116], %127 {strides = array<i32>} : memref<2x22x22xf32, #tpu.memory_space<vmem>>, vector<1x1x16xf32>,
    %c1_117 = arith.constant 1 : index
    %c96_118 = arith.constant 96 : index
    %128 = vector.load %arg4[%c1_117, %c96_118] : memref<2x256xf32, #tpu.memory_space<vmem>>, vector<1x16xf32>
    %c1_119 = arith.constant 1 : index
    %c9_120 = arith.constant 9 : index
    %c3_121 = arith.constant 3 : index
    %129 = vector.load %arg5[%c1_119, %c9_120, %c3_121] : memref<2x22x22xf32, #tpu.memory_space<vmem>>, vector<1x1x16xf32>
    %130 = vector.shape_cast %129 : vector<1x1x16xf32> to vector<1x16xf32>
    %131 = vector.shape_cast %128 : vector<1x16xf32> to vector<1x1x16xf32>
    tpu.vector_store %arg5[%c1_119, %c9_120, %c3_121], %131 {strides = array<i32>} : memref<2x22x22xf32, #tpu.memory_space<vmem>>, vector<1x1x16xf32>,
    %c1_122 = arith.constant 1 : index
    %c112_123 = arith.constant 112 : index
    %132 = vector.load %arg4[%c1_122, %c112_123] : memref<2x256xf32, #tpu.memory_space<vmem>>, vector<1x16xf32>
    %c1_124 = arith.constant 1 : index
    %c10_125 = arith.constant 10 : index
    %c3_126 = arith.constant 3 : index
    %133 = vector.load %arg5[%c1_124, %c10_125, %c3_126] : memref<2x22x22xf32, #tpu.memory_space<vmem>>, vector<1x1x16xf32>
    %134 = vector.shape_cast %133 : vector<1x1x16xf32> to vector<1x16xf32>
    %135 = vector.shape_cast %132 : vector<1x16xf32> to vector<1x1x16xf32>
    tpu.vector_store %arg5[%c1_124, %c10_125, %c3_126], %135 {strides = array<i32>} : memref<2x22x22xf32, #tpu.memory_space<vmem>>, vector<1x1x16xf32>,
    %c1_127 = arith.constant 1 : index
    %c128_128 = arith.constant 128 : index
    %136 = vector.load %arg4[%c1_127, %c128_128] : memref<2x256xf32, #tpu.memory_space<vmem>>, vector<1x16xf32>
    %c1_129 = arith.constant 1 : index
    %c11_130 = arith.constant 11 : index
    %c3_131 = arith.constant 3 : index
    %137 = vector.load %arg5[%c1_129, %c11_130, %c3_131] : memref<2x22x22xf32, #tpu.memory_space<vmem>>, vector<1x1x16xf32>
    %138 = vector.shape_cast %137 : vector<1x1x16xf32> to vector<1x16xf32>
    %139 = vector.shape_cast %136 : vector<1x16xf32> to vector<1x1x16xf32>
    tpu.vector_store %arg5[%c1_129, %c11_130, %c3_131], %139 {strides = array<i32>} : memref<2x22x22xf32, #tpu.memory_space<vmem>>, vector<1x1x16xf32>,
    %c1_132 = arith.constant 1 : index
    %c144_133 = arith.constant 144 : index
    %140 = vector.load %arg4[%c1_132, %c144_133] : memref<2x256xf32, #tpu.memory_space<vmem>>, vector<1x16xf32>
    %c1_134 = arith.constant 1 : index
    %c12_135 = arith.constant 12 : index
    %c3_136 = arith.constant 3 : index
    %141 = vector.load %arg5[%c1_134, %c12_135, %c3_136] : memref<2x22x22xf32, #tpu.memory_space<vmem>>, vector<1x1x16xf32>
    %142 = vector.shape_cast %141 : vector<1x1x16xf32> to vector<1x16xf32>
    %143 = vector.shape_cast %140 : vector<1x16xf32> to vector<1x1x16xf32>
    tpu.vector_store %arg5[%c1_134, %c12_135, %c3_136], %143 {strides = array<i32>} : memref<2x22x22xf32, #tpu.memory_space<vmem>>, vector<1x1x16xf32>,
    %c1_137 = arith.constant 1 : index
    %c160_138 = arith.constant 160 : index
    %144 = vector.load %arg4[%c1_137, %c160_138] : memref<2x256xf32, #tpu.memory_space<vmem>>, vector<1x16xf32>
    %c1_139 = arith.constant 1 : index
    %c13_140 = arith.constant 13 : index
    %c3_141 = arith.constant 3 : index
    %145 = vector.load %arg5[%c1_139, %c13_140, %c3_141] : memref<2x22x22xf32, #tpu.memory_space<vmem>>, vector<1x1x16xf32>
    %146 = vector.shape_cast %145 : vector<1x1x16xf32> to vector<1x16xf32>
    %147 = vector.shape_cast %144 : vector<1x16xf32> to vector<1x1x16xf32>
    tpu.vector_store %arg5[%c1_139, %c13_140, %c3_141], %147 {strides = array<i32>} : memref<2x22x22xf32, #tpu.memory_space<vmem>>, vector<1x1x16xf32>,
    %c1_142 = arith.constant 1 : index
    %c176_143 = arith.constant 176 : index
    %148 = vector.load %arg4[%c1_142, %c176_143] : memref<2x256xf32, #tpu.memory_space<vmem>>, vector<1x16xf32>
    %c1_144 = arith.constant 1 : index
    %c14_145 = arith.constant 14 : index
    %c3_146 = arith.constant 3 : index
    %149 = vector.load %arg5[%c1_144, %c14_145, %c3_146] : memref<2x22x22xf32, #tpu.memory_space<vmem>>, vector<1x1x16xf32>
    %150 = vector.shape_cast %149 : vector<1x1x16xf32> to vector<1x16xf32>
    %151 = vector.shape_cast %148 : vector<1x16xf32> to vector<1x1x16xf32>
    tpu.vector_store %arg5[%c1_144, %c14_145, %c3_146], %151 {strides = array<i32>} : memref<2x22x22xf32, #tpu.memory_space<vmem>>, vector<1x1x16xf32>,
    %c1_147 = arith.constant 1 : index
    %c192_148 = arith.constant 192 : index
    %152 = vector.load %arg4[%c1_147, %c192_148] : memref<2x256xf32, #tpu.memory_space<vmem>>, vector<1x16xf32>
    %c1_149 = arith.constant 1 : index
    %c15_150 = arith.constant 15 : index
    %c3_151 = arith.constant 3 : index
    %153 = vector.load %arg5[%c1_149, %c15_150, %c3_151] : memref<2x22x22xf32, #tpu.memory_space<vmem>>, vector<1x1x16xf32>
    %154 = vector.shape_cast %153 : vector<1x1x16xf32> to vector<1x16xf32>
    %155 = vector.shape_cast %152 : vector<1x16xf32> to vector<1x1x16xf32>
    tpu.vector_store %arg5[%c1_149, %c15_150, %c3_151], %155 {strides = array<i32>} : memref<2x22x22xf32, #tpu.memory_space<vmem>>, vector<1x1x16xf32>,
    %c1_152 = arith.constant 1 : index
    %c208_153 = arith.constant 208 : index
    %156 = vector.load %arg4[%c1_152, %c208_153] : memref<2x256xf32, #tpu.memory_space<vmem>>, vector<1x16xf32>
    %c1_154 = arith.constant 1 : index
    %c16_155 = arith.constant 16 : index
    %c3_156 = arith.constant 3 : index
    %157 = vector.load %arg5[%c1_154, %c16_155, %c3_156] : memref<2x22x22xf32, #tpu.memory_space<vmem>>, vector<1x1x16xf32>
    %158 = vector.shape_cast %157 : vector<1x1x16xf32> to vector<1x16xf32>
    %159 = vector.shape_cast %156 : vector<1x16xf32> to vector<1x1x16xf32>
    tpu.vector_store %arg5[%c1_154, %c16_155, %c3_156], %159 {strides = array<i32>} : memref<2x22x22xf32, #tpu.memory_space<vmem>>, vector<1x1x16xf32>,
    %c1_157 = arith.constant 1 : index
    %c224_158 = arith.constant 224 : index
    %160 = vector.load %arg4[%c1_157, %c224_158] : memref<2x256xf32, #tpu.memory_space<vmem>>, vector<1x16xf32>
    %c1_159 = arith.constant 1 : index
    %c17_160 = arith.constant 17 : index
    %c3_161 = arith.constant 3 : index
    %161 = vector.load %arg5[%c1_159, %c17_160, %c3_161] : memref<2x22x22xf32, #tpu.memory_space<vmem>>, vector<1x1x16xf32>
    %162 = vector.shape_cast %161 : vector<1x1x16xf32> to vector<1x16xf32>
    %163 = vector.shape_cast %160 : vector<1x16xf32> to vector<1x1x16xf32>
    tpu.vector_store %arg5[%c1_159, %c17_160, %c3_161], %163 {strides = array<i32>} : memref<2x22x22xf32, #tpu.memory_space<vmem>>, vector<1x1x16xf32>,
    %c1_162 = arith.constant 1 : index
    %c240_163 = arith.constant 240 : index
    %164 = vector.load %arg4[%c1_162, %c240_163] : memref<2x256xf32, #tpu.memory_space<vmem>>, vector<1x16xf32>
    %c1_164 = arith.constant 1 : index
    %c18_165 = arith.constant 18 : index
    %c3_166 = arith.constant 3 : index
    %165 = vector.load %arg5[%c1_164, %c18_165, %c3_166] : memref<2x22x22xf32, #tpu.memory_space<vmem>>, vector<1x1x16xf32>
    %166 = vector.shape_cast %165 : vector<1x1x16xf32> to vector<1x16xf32>
    %167 = vector.shape_cast %164 : vector<1x16xf32> to vector<1x1x16xf32>
    tpu.vector_store %arg5[%c1_164, %c18_165, %c3_166], %167 {strides = array<i32>} : memref<2x22x22xf32, #tpu.memory_space<vmem>>, vector<1x1x16xf32>,
    %cst_167 = arith.constant 0.000000e+00 : f32
    %168 = vector.broadcast %cst_167 : f32 to vector<16x16xf32>
    %cst_168 = arith.constant 0.000000e+00 : f32
    %169 = vector.broadcast %cst_168 : f32 to vector<16x16xf32>
    %cst_169 = arith.constant 0.000000e+00 : f32
    %170 = vector.broadcast %cst_169 : f32 to vector<16x16xf32>
    %cst_170 = arith.constant 0.000000e+00 : f32
    %171 = vector.broadcast %cst_170 : f32 to vector<16x16xf32>
    %c0_171 = arith.constant 0 : index
    %c0_172 = arith.constant 0 : index
    %c0_173 = arith.constant 0 : index
    %172 = vector.load %arg5[%c0_171, %c0_172, %c0_173] : memref<2x22x22xf32, #tpu.memory_space<vmem>>, vector<1x22x16xf32>
    %173 = vector.shape_cast %172 : vector<1x22x16xf32> to vector<22x16xf32>
    %c0_174 = arith.constant 0 : index
    %c0_175 = arith.constant 0 : index
    %174 = vector.load %arg6[%c0_174, %c0_175] : memref<22x16xf32, #tpu.memory_space<vmem>>, vector<22x16xf32>
    tpu.vector_store %arg6[%c0_174, %c0_175], %173 {strides = array<i32>} : memref<22x16xf32, #tpu.memory_space<vmem>>, vector<22x16xf32>,
    %c0_176 = arith.constant 0 : index
    %175 = memref.load %arg2[%c0_176] : memref<98xf32, #tpu.memory_space<smem>>
    %c0_177 = arith.constant 0 : index
    %c0_178 = arith.constant 0 : index
    %176 = vector.load %arg6[%c0_177, %c0_178] : memref<22x16xf32, #tpu.memory_space<vmem>>, vector<16x16xf32>
    %177 = vector.broadcast %175 : f32 to vector<16x16xf32>
    %178 = arith.mulf %177, %176 : vector<16x16xf32>
    %179 = arith.addf %168, %178 : vector<16x16xf32>
    %c7_179 = arith.constant 7 : index
    %180 = memref.load %arg2[%c7_179] : memref<98xf32, #tpu.memory_space<smem>>
    %c1_180 = arith.constant 1 : index
    %c0_181 = arith.constant 0 : index
    %181 = vector.load %arg6[%c1_180, %c0_181] : memref<22x16xf32, #tpu.memory_space<vmem>>, vector<16x16xf32>
    %182 = vector.broadcast %180 : f32 to vector<16x16xf32>
    %183 = arith.mulf %182, %181 : vector<16x16xf32>
    %184 = arith.addf %169, %183 : vector<16x16xf32>
    %c14_182 = arith.constant 14 : index
    %185 = memref.load %arg2[%c14_182] : memref<98xf32, #tpu.memory_space<smem>>
    %c2 = arith.constant 2 : index
    %c0_183 = arith.constant 0 : index
    %186 = vector.load %arg6[%c2, %c0_183] : memref<22x16xf32, #tpu.memory_space<vmem>>, vector<16x16xf32>
    %187 = vector.broadcast %185 : f32 to vector<16x16xf32>
    %188 = arith.mulf %187, %186 : vector<16x16xf32>
    %189 = arith.addf %170, %188 : vector<16x16xf32>
    %c21 = arith.constant 21 : index
    %190 = memref.load %arg2[%c21] : memref<98xf32, #tpu.memory_space<smem>>
    %c3_184 = arith.constant 3 : index
    %c0_185 = arith.constant 0 : index
    %191 = vector.load %arg6[%c3_184, %c0_185] : memref<22x16xf32, #tpu.memory_space<vmem>>, vector<16x16xf32>
    %192 = vector.broadcast %190 : f32 to vector<16x16xf32>
    %193 = arith.mulf %192, %191 : vector<16x16xf32>
    %194 = arith.addf %171, %193 : vector<16x16xf32>
    %c28 = arith.constant 28 : index
    %195 = memref.load %arg2[%c28] : memref<98xf32, #tpu.memory_space<smem>>
    %c4_186 = arith.constant 4 : index
    %c0_187 = arith.constant 0 : index
    %196 = vector.load %arg6[%c4_186, %c0_187] : memref<22x16xf32, #tpu.memory_space<vmem>>, vector<16x16xf32>
    %197 = vector.broadcast %195 : f32 to vector<16x16xf32>
    %198 = arith.mulf %197, %196 : vector<16x16xf32>
    %199 = arith.addf %179, %198 : vector<16x16xf32>
    %c35 = arith.constant 35 : index
    %200 = memref.load %arg2[%c35] : memref<98xf32, #tpu.memory_space<smem>>
    %c5_188 = arith.constant 5 : index
    %c0_189 = arith.constant 0 : index
    %201 = vector.load %arg6[%c5_188, %c0_189] : memref<22x16xf32, #tpu.memory_space<vmem>>, vector<16x16xf32>
    %202 = vector.broadcast %200 : f32 to vector<16x16xf32>
    %203 = arith.mulf %202, %201 : vector<16x16xf32>
    %204 = arith.addf %184, %203 : vector<16x16xf32>
    %c42 = arith.constant 42 : index
    %205 = memref.load %arg2[%c42] : memref<98xf32, #tpu.memory_space<smem>>
    %c6_190 = arith.constant 6 : index
    %c0_191 = arith.constant 0 : index
    %206 = vector.load %arg6[%c6_190, %c0_191] : memref<22x16xf32, #tpu.memory_space<vmem>>, vector<16x16xf32>
    %207 = vector.broadcast %205 : f32 to vector<16x16xf32>
    %208 = arith.mulf %207, %206 : vector<16x16xf32>
    %209 = arith.addf %189, %208 : vector<16x16xf32>
    %c0_192 = arith.constant 0 : index
    %c0_193 = arith.constant 0 : index
    %c1_194 = arith.constant 1 : index
    %210 = vector.load %arg5[%c0_192, %c0_193, %c1_194] : memref<2x22x22xf32, #tpu.memory_space<vmem>>, vector<1x22x16xf32>
    %211 = vector.shape_cast %210 : vector<1x22x16xf32> to vector<22x16xf32>
    %c0_195 = arith.constant 0 : index
    %c0_196 = arith.constant 0 : index
    %212 = vector.load %arg6[%c0_195, %c0_196] : memref<22x16xf32, #tpu.memory_space<vmem>>, vector<22x16xf32>
    tpu.vector_store %arg6[%c0_195, %c0_196], %211 {strides = array<i32>} : memref<22x16xf32, #tpu.memory_space<vmem>>, vector<22x16xf32>,
    %c1_197 = arith.constant 1 : index
    %213 = memref.load %arg2[%c1_197] : memref<98xf32, #tpu.memory_space<smem>>
    %c0_198 = arith.constant 0 : index
    %c0_199 = arith.constant 0 : index
    %214 = vector.load %arg6[%c0_198, %c0_199] : memref<22x16xf32, #tpu.memory_space<vmem>>, vector<16x16xf32>
    %215 = vector.broadcast %213 : f32 to vector<16x16xf32>
    %216 = arith.mulf %215, %214 : vector<16x16xf32>
    %217 = arith.addf %199, %216 : vector<16x16xf32>
    %c8_200 = arith.constant 8 : index
    %218 = memref.load %arg2[%c8_200] : memref<98xf32, #tpu.memory_space<smem>>
    %c1_201 = arith.constant 1 : index
    %c0_202 = arith.constant 0 : index
    %219 = vector.load %arg6[%c1_201, %c0_202] : memref<22x16xf32, #tpu.memory_space<vmem>>, vector<16x16xf32>
    %220 = vector.broadcast %218 : f32 to vector<16x16xf32>
    %221 = arith.mulf %220, %219 : vector<16x16xf32>
    %222 = arith.addf %204, %221 : vector<16x16xf32>
    %c15_203 = arith.constant 15 : index
    %223 = memref.load %arg2[%c15_203] : memref<98xf32, #tpu.memory_space<smem>>
    %c2_204 = arith.constant 2 : index
    %c0_205 = arith.constant 0 : index
    %224 = vector.load %arg6[%c2_204, %c0_205] : memref<22x16xf32, #tpu.memory_space<vmem>>, vector<16x16xf32>
    %225 = vector.broadcast %223 : f32 to vector<16x16xf32>
    %226 = arith.mulf %225, %224 : vector<16x16xf32>
    %227 = arith.addf %209, %226 : vector<16x16xf32>
    %c22 = arith.constant 22 : index
    %228 = memref.load %arg2[%c22] : memref<98xf32, #tpu.memory_space<smem>>
    %c3_206 = arith.constant 3 : index
    %c0_207 = arith.constant 0 : index
    %229 = vector.load %arg6[%c3_206, %c0_207] : memref<22x16xf32, #tpu.memory_space<vmem>>, vector<16x16xf32>
    %230 = vector.broadcast %228 : f32 to vector<16x16xf32>
    %231 = arith.mulf %230, %229 : vector<16x16xf32>
    %232 = arith.addf %194, %231 : vector<16x16xf32>
    %c29 = arith.constant 29 : index
    %233 = memref.load %arg2[%c29] : memref<98xf32, #tpu.memory_space<smem>>
    %c4_208 = arith.constant 4 : index
    %c0_209 = arith.constant 0 : index
    %234 = vector.load %arg6[%c4_208, %c0_209] : memref<22x16xf32, #tpu.memory_space<vmem>>, vector<16x16xf32>
    %235 = vector.broadcast %233 : f32 to vector<16x16xf32>
    %236 = arith.mulf %235, %234 : vector<16x16xf32>
    %237 = arith.addf %217, %236 : vector<16x16xf32>
    %c36 = arith.constant 36 : index
    %238 = memref.load %arg2[%c36] : memref<98xf32, #tpu.memory_space<smem>>
    %c5_210 = arith.constant 5 : index
    %c0_211 = arith.constant 0 : index
    %239 = vector.load %arg6[%c5_210, %c0_211] : memref<22x16xf32, #tpu.memory_space<vmem>>, vector<16x16xf32>
    %240 = vector.broadcast %238 : f32 to vector<16x16xf32>
    %241 = arith.mulf %240, %239 : vector<16x16xf32>
    %242 = arith.addf %222, %241 : vector<16x16xf32>
    %c43 = arith.constant 43 : index
    %243 = memref.load %arg2[%c43] : memref<98xf32, #tpu.memory_space<smem>>
    %c6_212 = arith.constant 6 : index
    %c0_213 = arith.constant 0 : index
    %244 = vector.load %arg6[%c6_212, %c0_213] : memref<22x16xf32, #tpu.memory_space<vmem>>, vector<16x16xf32>
    %245 = vector.broadcast %243 : f32 to vector<16x16xf32>
    %246 = arith.mulf %245, %244 : vector<16x16xf32>
    %247 = arith.addf %227, %246 : vector<16x16xf32>
    %c0_214 = arith.constant 0 : index
    %c0_215 = arith.constant 0 : index
    %c2_216 = arith.constant 2 : index
    %248 = vector.load %arg5[%c0_214, %c0_215, %c2_216] : memref<2x22x22xf32, #tpu.memory_space<vmem>>, vector<1x22x16xf32>
    %249 = vector.shape_cast %248 : vector<1x22x16xf32> to vector<22x16xf32>
    %c0_217 = arith.constant 0 : index
    %c0_218 = arith.constant 0 : index
    %250 = vector.load %arg6[%c0_217, %c0_218] : memref<22x16xf32, #tpu.memory_space<vmem>>, vector<22x16xf32>
    tpu.vector_store %arg6[%c0_217, %c0_218], %249 {strides = array<i32>} : memref<22x16xf32, #tpu.memory_space<vmem>>, vector<22x16xf32>,
    %c2_219 = arith.constant 2 : index
    %251 = memref.load %arg2[%c2_219] : memref<98xf32, #tpu.memory_space<smem>>
    %c0_220 = arith.constant 0 : index
    %c0_221 = arith.constant 0 : index
    %252 = vector.load %arg6[%c0_220, %c0_221] : memref<22x16xf32, #tpu.memory_space<vmem>>, vector<16x16xf32>
    %253 = vector.broadcast %251 : f32 to vector<16x16xf32>
    %254 = arith.mulf %253, %252 : vector<16x16xf32>
    %255 = arith.addf %237, %254 : vector<16x16xf32>
    %c9_222 = arith.constant 9 : index
    %256 = memref.load %arg2[%c9_222] : memref<98xf32, #tpu.memory_space<smem>>
    %c1_223 = arith.constant 1 : index
    %c0_224 = arith.constant 0 : index
    %257 = vector.load %arg6[%c1_223, %c0_224] : memref<22x16xf32, #tpu.memory_space<vmem>>, vector<16x16xf32>
    %258 = vector.broadcast %256 : f32 to vector<16x16xf32>
    %259 = arith.mulf %258, %257 : vector<16x16xf32>
    %260 = arith.addf %242, %259 : vector<16x16xf32>
    %c16_225 = arith.constant 16 : index
    %261 = memref.load %arg2[%c16_225] : memref<98xf32, #tpu.memory_space<smem>>
    %c2_226 = arith.constant 2 : index
    %c0_227 = arith.constant 0 : index
    %262 = vector.load %arg6[%c2_226, %c0_227] : memref<22x16xf32, #tpu.memory_space<vmem>>, vector<16x16xf32>
    %263 = vector.broadcast %261 : f32 to vector<16x16xf32>
    %264 = arith.mulf %263, %262 : vector<16x16xf32>
    %265 = arith.addf %247, %264 : vector<16x16xf32>
    %c23 = arith.constant 23 : index
    %266 = memref.load %arg2[%c23] : memref<98xf32, #tpu.memory_space<smem>>
    %c3_228 = arith.constant 3 : index
    %c0_229 = arith.constant 0 : index
    %267 = vector.load %arg6[%c3_228, %c0_229] : memref<22x16xf32, #tpu.memory_space<vmem>>, vector<16x16xf32>
    %268 = vector.broadcast %266 : f32 to vector<16x16xf32>
    %269 = arith.mulf %268, %267 : vector<16x16xf32>
    %270 = arith.addf %232, %269 : vector<16x16xf32>
    %c30 = arith.constant 30 : index
    %271 = memref.load %arg2[%c30] : memref<98xf32, #tpu.memory_space<smem>>
    %c4_230 = arith.constant 4 : index
    %c0_231 = arith.constant 0 : index
    %272 = vector.load %arg6[%c4_230, %c0_231] : memref<22x16xf32, #tpu.memory_space<vmem>>, vector<16x16xf32>
    %273 = vector.broadcast %271 : f32 to vector<16x16xf32>
    %274 = arith.mulf %273, %272 : vector<16x16xf32>
    %275 = arith.addf %255, %274 : vector<16x16xf32>
    %c37 = arith.constant 37 : index
    %276 = memref.load %arg2[%c37] : memref<98xf32, #tpu.memory_space<smem>>
    %c5_232 = arith.constant 5 : index
    %c0_233 = arith.constant 0 : index
    %277 = vector.load %arg6[%c5_232, %c0_233] : memref<22x16xf32, #tpu.memory_space<vmem>>, vector<16x16xf32>
    %278 = vector.broadcast %276 : f32 to vector<16x16xf32>
    %279 = arith.mulf %278, %277 : vector<16x16xf32>
    %280 = arith.addf %260, %279 : vector<16x16xf32>
    %c44 = arith.constant 44 : index
    %281 = memref.load %arg2[%c44] : memref<98xf32, #tpu.memory_space<smem>>
    %c6_234 = arith.constant 6 : index
    %c0_235 = arith.constant 0 : index
    %282 = vector.load %arg6[%c6_234, %c0_235] : memref<22x16xf32, #tpu.memory_space<vmem>>, vector<16x16xf32>
    %283 = vector.broadcast %281 : f32 to vector<16x16xf32>
    %284 = arith.mulf %283, %282 : vector<16x16xf32>
    %285 = arith.addf %265, %284 : vector<16x16xf32>
    %c0_236 = arith.constant 0 : index
    %c0_237 = arith.constant 0 : index
    %c3_238 = arith.constant 3 : index
    %286 = vector.load %arg5[%c0_236, %c0_237, %c3_238] : memref<2x22x22xf32, #tpu.memory_space<vmem>>, vector<1x22x16xf32>
    %287 = vector.shape_cast %286 : vector<1x22x16xf32> to vector<22x16xf32>
    %c0_239 = arith.constant 0 : index
    %c0_240 = arith.constant 0 : index
    %288 = vector.load %arg6[%c0_239, %c0_240] : memref<22x16xf32, #tpu.memory_space<vmem>>, vector<22x16xf32>
    tpu.vector_store %arg6[%c0_239, %c0_240], %287 {strides = array<i32>} : memref<22x16xf32, #tpu.memory_space<vmem>>, vector<22x16xf32>,
    %c3_241 = arith.constant 3 : index
    %289 = memref.load %arg2[%c3_241] : memref<98xf32, #tpu.memory_space<smem>>
    %c0_242 = arith.constant 0 : index
    %c0_243 = arith.constant 0 : index
    %290 = vector.load %arg6[%c0_242, %c0_243] : memref<22x16xf32, #tpu.memory_space<vmem>>, vector<16x16xf32>
    %291 = vector.broadcast %289 : f32 to vector<16x16xf32>
    %292 = arith.mulf %291, %290 : vector<16x16xf32>
    %293 = arith.addf %275, %292 : vector<16x16xf32>
    %c10_244 = arith.constant 10 : index
    %294 = memref.load %arg2[%c10_244] : memref<98xf32, #tpu.memory_space<smem>>
    %c1_245 = arith.constant 1 : index
    %c0_246 = arith.constant 0 : index
    %295 = vector.load %arg6[%c1_245, %c0_246] : memref<22x16xf32, #tpu.memory_space<vmem>>, vector<16x16xf32>
    %296 = vector.broadcast %294 : f32 to vector<16x16xf32>
    %297 = arith.mulf %296, %295 : vector<16x16xf32>
    %298 = arith.addf %280, %297 : vector<16x16xf32>
    %c17_247 = arith.constant 17 : index
    %299 = memref.load %arg2[%c17_247] : memref<98xf32, #tpu.memory_space<smem>>
    %c2_248 = arith.constant 2 : index
    %c0_249 = arith.constant 0 : index
    %300 = vector.load %arg6[%c2_248, %c0_249] : memref<22x16xf32, #tpu.memory_space<vmem>>, vector<16x16xf32>
    %301 = vector.broadcast %299 : f32 to vector<16x16xf32>
    %302 = arith.mulf %301, %300 : vector<16x16xf32>
    %303 = arith.addf %285, %302 : vector<16x16xf32>
    %c24 = arith.constant 24 : index
    %304 = memref.load %arg2[%c24] : memref<98xf32, #tpu.memory_space<smem>>
    %c3_250 = arith.constant 3 : index
    %c0_251 = arith.constant 0 : index
    %305 = vector.load %arg6[%c3_250, %c0_251] : memref<22x16xf32, #tpu.memory_space<vmem>>, vector<16x16xf32>
    %306 = vector.broadcast %304 : f32 to vector<16x16xf32>
    %307 = arith.mulf %306, %305 : vector<16x16xf32>
    %308 = arith.addf %270, %307 : vector<16x16xf32>
    %c31 = arith.constant 31 : index
    %309 = memref.load %arg2[%c31] : memref<98xf32, #tpu.memory_space<smem>>
    %c4_252 = arith.constant 4 : index
    %c0_253 = arith.constant 0 : index
    %310 = vector.load %arg6[%c4_252, %c0_253] : memref<22x16xf32, #tpu.memory_space<vmem>>, vector<16x16xf32>
    %311 = vector.broadcast %309 : f32 to vector<16x16xf32>
    %312 = arith.mulf %311, %310 : vector<16x16xf32>
    %313 = arith.addf %293, %312 : vector<16x16xf32>
    %c38 = arith.constant 38 : index
    %314 = memref.load %arg2[%c38] : memref<98xf32, #tpu.memory_space<smem>>
    %c5_254 = arith.constant 5 : index
    %c0_255 = arith.constant 0 : index
    %315 = vector.load %arg6[%c5_254, %c0_255] : memref<22x16xf32, #tpu.memory_space<vmem>>, vector<16x16xf32>
    %316 = vector.broadcast %314 : f32 to vector<16x16xf32>
    %317 = arith.mulf %316, %315 : vector<16x16xf32>
    %318 = arith.addf %298, %317 : vector<16x16xf32>
    %c45 = arith.constant 45 : index
    %319 = memref.load %arg2[%c45] : memref<98xf32, #tpu.memory_space<smem>>
    %c6_256 = arith.constant 6 : index
    %c0_257 = arith.constant 0 : index
    %320 = vector.load %arg6[%c6_256, %c0_257] : memref<22x16xf32, #tpu.memory_space<vmem>>, vector<16x16xf32>
    %321 = vector.broadcast %319 : f32 to vector<16x16xf32>
    %322 = arith.mulf %321, %320 : vector<16x16xf32>
    %323 = arith.addf %303, %322 : vector<16x16xf32>
    %c0_258 = arith.constant 0 : index
    %c0_259 = arith.constant 0 : index
    %c4_260 = arith.constant 4 : index
    %324 = vector.load %arg5[%c0_258, %c0_259, %c4_260] : memref<2x22x22xf32, #tpu.memory_space<vmem>>, vector<1x22x16xf32>
    %325 = vector.shape_cast %324 : vector<1x22x16xf32> to vector<22x16xf32>
    %c0_261 = arith.constant 0 : index
    %c0_262 = arith.constant 0 : index
    %326 = vector.load %arg6[%c0_261, %c0_262] : memref<22x16xf32, #tpu.memory_space<vmem>>, vector<22x16xf32>
    tpu.vector_store %arg6[%c0_261, %c0_262], %325 {strides = array<i32>} : memref<22x16xf32, #tpu.memory_space<vmem>>, vector<22x16xf32>,
    %c4_263 = arith.constant 4 : index
    %327 = memref.load %arg2[%c4_263] : memref<98xf32, #tpu.memory_space<smem>>
    %c0_264 = arith.constant 0 : index
    %c0_265 = arith.constant 0 : index
    %328 = vector.load %arg6[%c0_264, %c0_265] : memref<22x16xf32, #tpu.memory_space<vmem>>, vector<16x16xf32>
    %329 = vector.broadcast %327 : f32 to vector<16x16xf32>
    %330 = arith.mulf %329, %328 : vector<16x16xf32>
    %331 = arith.addf %313, %330 : vector<16x16xf32>
    %c11_266 = arith.constant 11 : index
    %332 = memref.load %arg2[%c11_266] : memref<98xf32, #tpu.memory_space<smem>>
    %c1_267 = arith.constant 1 : index
    %c0_268 = arith.constant 0 : index
    %333 = vector.load %arg6[%c1_267, %c0_268] : memref<22x16xf32, #tpu.memory_space<vmem>>, vector<16x16xf32>
    %334 = vector.broadcast %332 : f32 to vector<16x16xf32>
    %335 = arith.mulf %334, %333 : vector<16x16xf32>
    %336 = arith.addf %318, %335 : vector<16x16xf32>
    %c18_269 = arith.constant 18 : index
    %337 = memref.load %arg2[%c18_269] : memref<98xf32, #tpu.memory_space<smem>>
    %c2_270 = arith.constant 2 : index
    %c0_271 = arith.constant 0 : index
    %338 = vector.load %arg6[%c2_270, %c0_271] : memref<22x16xf32, #tpu.memory_space<vmem>>, vector<16x16xf32>
    %339 = vector.broadcast %337 : f32 to vector<16x16xf32>
    %340 = arith.mulf %339, %338 : vector<16x16xf32>
    %341 = arith.addf %323, %340 : vector<16x16xf32>
    %c25 = arith.constant 25 : index
    %342 = memref.load %arg2[%c25] : memref<98xf32, #tpu.memory_space<smem>>
    %c3_272 = arith.constant 3 : index
    %c0_273 = arith.constant 0 : index
    %343 = vector.load %arg6[%c3_272, %c0_273] : memref<22x16xf32, #tpu.memory_space<vmem>>, vector<16x16xf32>
    %344 = vector.broadcast %342 : f32 to vector<16x16xf32>
    %345 = arith.mulf %344, %343 : vector<16x16xf32>
    %346 = arith.addf %308, %345 : vector<16x16xf32>
    %c32_274 = arith.constant 32 : index
    %347 = memref.load %arg2[%c32_274] : memref<98xf32, #tpu.memory_space<smem>>
    %c4_275 = arith.constant 4 : index
    %c0_276 = arith.constant 0 : index
    %348 = vector.load %arg6[%c4_275, %c0_276] : memref<22x16xf32, #tpu.memory_space<vmem>>, vector<16x16xf32>
    %349 = vector.broadcast %347 : f32 to vector<16x16xf32>
    %350 = arith.mulf %349, %348 : vector<16x16xf32>
    %351 = arith.addf %331, %350 : vector<16x16xf32>
    %c39 = arith.constant 39 : index
    %352 = memref.load %arg2[%c39] : memref<98xf32, #tpu.memory_space<smem>>
    %c5_277 = arith.constant 5 : index
    %c0_278 = arith.constant 0 : index
    %353 = vector.load %arg6[%c5_277, %c0_278] : memref<22x16xf32, #tpu.memory_space<vmem>>, vector<16x16xf32>
    %354 = vector.broadcast %352 : f32 to vector<16x16xf32>
    %355 = arith.mulf %354, %353 : vector<16x16xf32>
    %356 = arith.addf %336, %355 : vector<16x16xf32>
    %c46 = arith.constant 46 : index
    %357 = memref.load %arg2[%c46] : memref<98xf32, #tpu.memory_space<smem>>
    %c6_279 = arith.constant 6 : index
    %c0_280 = arith.constant 0 : index
    %358 = vector.load %arg6[%c6_279, %c0_280] : memref<22x16xf32, #tpu.memory_space<vmem>>, vector<16x16xf32>
    %359 = vector.broadcast %357 : f32 to vector<16x16xf32>
    %360 = arith.mulf %359, %358 : vector<16x16xf32>
    %361 = arith.addf %341, %360 : vector<16x16xf32>
    %c0_281 = arith.constant 0 : index
    %c0_282 = arith.constant 0 : index
    %c5_283 = arith.constant 5 : index
    %362 = vector.load %arg5[%c0_281, %c0_282, %c5_283] : memref<2x22x22xf32, #tpu.memory_space<vmem>>, vector<1x22x16xf32>
    %363 = vector.shape_cast %362 : vector<1x22x16xf32> to vector<22x16xf32>
    %c0_284 = arith.constant 0 : index
    %c0_285 = arith.constant 0 : index
    %364 = vector.load %arg6[%c0_284, %c0_285] : memref<22x16xf32, #tpu.memory_space<vmem>>, vector<22x16xf32>
    tpu.vector_store %arg6[%c0_284, %c0_285], %363 {strides = array<i32>} : memref<22x16xf32, #tpu.memory_space<vmem>>, vector<22x16xf32>,
    %c5_286 = arith.constant 5 : index
    %365 = memref.load %arg2[%c5_286] : memref<98xf32, #tpu.memory_space<smem>>
    %c0_287 = arith.constant 0 : index
    %c0_288 = arith.constant 0 : index
    %366 = vector.load %arg6[%c0_287, %c0_288] : memref<22x16xf32, #tpu.memory_space<vmem>>, vector<16x16xf32>
    %367 = vector.broadcast %365 : f32 to vector<16x16xf32>
    %368 = arith.mulf %367, %366 : vector<16x16xf32>
    %369 = arith.addf %351, %368 : vector<16x16xf32>
    %c12_289 = arith.constant 12 : index
    %370 = memref.load %arg2[%c12_289] : memref<98xf32, #tpu.memory_space<smem>>
    %c1_290 = arith.constant 1 : index
    %c0_291 = arith.constant 0 : index
    %371 = vector.load %arg6[%c1_290, %c0_291] : memref<22x16xf32, #tpu.memory_space<vmem>>, vector<16x16xf32>
    %372 = vector.broadcast %370 : f32 to vector<16x16xf32>
    %373 = arith.mulf %372, %371 : vector<16x16xf32>
    %374 = arith.addf %356, %373 : vector<16x16xf32>
    %c19_292 = arith.constant 19 : index
    %375 = memref.load %arg2[%c19_292] : memref<98xf32, #tpu.memory_space<smem>>
    %c2_293 = arith.constant 2 : index
    %c0_294 = arith.constant 0 : index
    %376 = vector.load %arg6[%c2_293, %c0_294] : memref<22x16xf32, #tpu.memory_space<vmem>>, vector<16x16xf32>
    %377 = vector.broadcast %375 : f32 to vector<16x16xf32>
    %378 = arith.mulf %377, %376 : vector<16x16xf32>
    %379 = arith.addf %361, %378 : vector<16x16xf32>
    %c26 = arith.constant 26 : index
    %380 = memref.load %arg2[%c26] : memref<98xf32, #tpu.memory_space<smem>>
    %c3_295 = arith.constant 3 : index
    %c0_296 = arith.constant 0 : index
    %381 = vector.load %arg6[%c3_295, %c0_296] : memref<22x16xf32, #tpu.memory_space<vmem>>, vector<16x16xf32>
    %382 = vector.broadcast %380 : f32 to vector<16x16xf32>
    %383 = arith.mulf %382, %381 : vector<16x16xf32>
    %384 = arith.addf %346, %383 : vector<16x16xf32>
    %c33 = arith.constant 33 : index
    %385 = memref.load %arg2[%c33] : memref<98xf32, #tpu.memory_space<smem>>
    %c4_297 = arith.constant 4 : index
    %c0_298 = arith.constant 0 : index
    %386 = vector.load %arg6[%c4_297, %c0_298] : memref<22x16xf32, #tpu.memory_space<vmem>>, vector<16x16xf32>
    %387 = vector.broadcast %385 : f32 to vector<16x16xf32>
    %388 = arith.mulf %387, %386 : vector<16x16xf32>
    %389 = arith.addf %369, %388 : vector<16x16xf32>
    %c40 = arith.constant 40 : index
    %390 = memref.load %arg2[%c40] : memref<98xf32, #tpu.memory_space<smem>>
    %c5_299 = arith.constant 5 : index
    %c0_300 = arith.constant 0 : index
    %391 = vector.load %arg6[%c5_299, %c0_300] : memref<22x16xf32, #tpu.memory_space<vmem>>, vector<16x16xf32>
    %392 = vector.broadcast %390 : f32 to vector<16x16xf32>
    %393 = arith.mulf %392, %391 : vector<16x16xf32>
    %394 = arith.addf %374, %393 : vector<16x16xf32>
    %c47 = arith.constant 47 : index
    %395 = memref.load %arg2[%c47] : memref<98xf32, #tpu.memory_space<smem>>
    %c6_301 = arith.constant 6 : index
    %c0_302 = arith.constant 0 : index
    %396 = vector.load %arg6[%c6_301, %c0_302] : memref<22x16xf32, #tpu.memory_space<vmem>>, vector<16x16xf32>
    %397 = vector.broadcast %395 : f32 to vector<16x16xf32>
    %398 = arith.mulf %397, %396 : vector<16x16xf32>
    %399 = arith.addf %379, %398 : vector<16x16xf32>
    %c0_303 = arith.constant 0 : index
    %c0_304 = arith.constant 0 : index
    %c6_305 = arith.constant 6 : index
    %400 = vector.load %arg5[%c0_303, %c0_304, %c6_305] : memref<2x22x22xf32, #tpu.memory_space<vmem>>, vector<1x22x16xf32>
    %401 = vector.shape_cast %400 : vector<1x22x16xf32> to vector<22x16xf32>
    %c0_306 = arith.constant 0 : index
    %c0_307 = arith.constant 0 : index
    %402 = vector.load %arg6[%c0_306, %c0_307] : memref<22x16xf32, #tpu.memory_space<vmem>>, vector<22x16xf32>
    tpu.vector_store %arg6[%c0_306, %c0_307], %401 {strides = array<i32>} : memref<22x16xf32, #tpu.memory_space<vmem>>, vector<22x16xf32>,
    %c6_308 = arith.constant 6 : index
    %403 = memref.load %arg2[%c6_308] : memref<98xf32, #tpu.memory_space<smem>>
    %c0_309 = arith.constant 0 : index
    %c0_310 = arith.constant 0 : index
    %404 = vector.load %arg6[%c0_309, %c0_310] : memref<22x16xf32, #tpu.memory_space<vmem>>, vector<16x16xf32>
    %405 = vector.broadcast %403 : f32 to vector<16x16xf32>
    %406 = arith.mulf %405, %404 : vector<16x16xf32>
    %407 = arith.addf %389, %406 : vector<16x16xf32>
    %c13_311 = arith.constant 13 : index
    %408 = memref.load %arg2[%c13_311] : memref<98xf32, #tpu.memory_space<smem>>
    %c1_312 = arith.constant 1 : index
    %c0_313 = arith.constant 0 : index
    %409 = vector.load %arg6[%c1_312, %c0_313] : memref<22x16xf32, #tpu.memory_space<vmem>>, vector<16x16xf32>
    %410 = vector.broadcast %408 : f32 to vector<16x16xf32>
    %411 = arith.mulf %410, %409 : vector<16x16xf32>
    %412 = arith.addf %394, %411 : vector<16x16xf32>
    %c20 = arith.constant 20 : index
    %413 = memref.load %arg2[%c20] : memref<98xf32, #tpu.memory_space<smem>>
    %c2_314 = arith.constant 2 : index
    %c0_315 = arith.constant 0 : index
    %414 = vector.load %arg6[%c2_314, %c0_315] : memref<22x16xf32, #tpu.memory_space<vmem>>, vector<16x16xf32>
    %415 = vector.broadcast %413 : f32 to vector<16x16xf32>
    %416 = arith.mulf %415, %414 : vector<16x16xf32>
    %417 = arith.addf %399, %416 : vector<16x16xf32>
    %c27 = arith.constant 27 : index
    %418 = memref.load %arg2[%c27] : memref<98xf32, #tpu.memory_space<smem>>
    %c3_316 = arith.constant 3 : index
    %c0_317 = arith.constant 0 : index
    %419 = vector.load %arg6[%c3_316, %c0_317] : memref<22x16xf32, #tpu.memory_space<vmem>>, vector<16x16xf32>
    %420 = vector.broadcast %418 : f32 to vector<16x16xf32>
    %421 = arith.mulf %420, %419 : vector<16x16xf32>
    %422 = arith.addf %384, %421 : vector<16x16xf32>
    %c34 = arith.constant 34 : index
    %423 = memref.load %arg2[%c34] : memref<98xf32, #tpu.memory_space<smem>>
    %c4_318 = arith.constant 4 : index
    %c0_319 = arith.constant 0 : index
    %424 = vector.load %arg6[%c4_318, %c0_319] : memref<22x16xf32, #tpu.memory_space<vmem>>, vector<16x16xf32>
    %425 = vector.broadcast %423 : f32 to vector<16x16xf32>
    %426 = arith.mulf %425, %424 : vector<16x16xf32>
    %427 = arith.addf %407, %426 : vector<16x16xf32>
    %c41 = arith.constant 41 : index
    %428 = memref.load %arg2[%c41] : memref<98xf32, #tpu.memory_space<smem>>
    %c5_320 = arith.constant 5 : index
    %c0_321 = arith.constant 0 : index
    %429 = vector.load %arg6[%c5_320, %c0_321] : memref<22x16xf32, #tpu.memory_space<vmem>>, vector<16x16xf32>
    %430 = vector.broadcast %428 : f32 to vector<16x16xf32>
    %431 = arith.mulf %430, %429 : vector<16x16xf32>
    %432 = arith.addf %412, %431 : vector<16x16xf32>
    %c48_322 = arith.constant 48 : index
    %433 = memref.load %arg2[%c48_322] : memref<98xf32, #tpu.memory_space<smem>>
    %c6_323 = arith.constant 6 : index
    %c0_324 = arith.constant 0 : index
    %434 = vector.load %arg6[%c6_323, %c0_324] : memref<22x16xf32, #tpu.memory_space<vmem>>, vector<16x16xf32>
    %435 = vector.broadcast %433 : f32 to vector<16x16xf32>
    %436 = arith.mulf %435, %434 : vector<16x16xf32>
    %437 = arith.addf %417, %436 : vector<16x16xf32>
    %c1_325 = arith.constant 1 : index
    %c0_326 = arith.constant 0 : index
    %c0_327 = arith.constant 0 : index
    %438 = vector.load %arg5[%c1_325, %c0_326, %c0_327] : memref<2x22x22xf32, #tpu.memory_space<vmem>>, vector<1x22x16xf32>
    %439 = vector.shape_cast %438 : vector<1x22x16xf32> to vector<22x16xf32>
    %c0_328 = arith.constant 0 : index
    %c0_329 = arith.constant 0 : index
    %440 = vector.load %arg6[%c0_328, %c0_329] : memref<22x16xf32, #tpu.memory_space<vmem>>, vector<22x16xf32>
    tpu.vector_store %arg6[%c0_328, %c0_329], %439 {strides = array<i32>} : memref<22x16xf32, #tpu.memory_space<vmem>>, vector<22x16xf32>,
    %c49 = arith.constant 49 : index
    %441 = memref.load %arg2[%c49] : memref<98xf32, #tpu.memory_space<smem>>
    %c0_330 = arith.constant 0 : index
    %c0_331 = arith.constant 0 : index
    %442 = vector.load %arg6[%c0_330, %c0_331] : memref<22x16xf32, #tpu.memory_space<vmem>>, vector<16x16xf32>
    %443 = vector.broadcast %441 : f32 to vector<16x16xf32>
    %444 = arith.mulf %443, %442 : vector<16x16xf32>
    %445 = arith.addf %427, %444 : vector<16x16xf32>
    %c56 = arith.constant 56 : index
    %446 = memref.load %arg2[%c56] : memref<98xf32, #tpu.memory_space<smem>>
    %c1_332 = arith.constant 1 : index
    %c0_333 = arith.constant 0 : index
    %447 = vector.load %arg6[%c1_332, %c0_333] : memref<22x16xf32, #tpu.memory_space<vmem>>, vector<16x16xf32>
    %448 = vector.broadcast %446 : f32 to vector<16x16xf32>
    %449 = arith.mulf %448, %447 : vector<16x16xf32>
    %450 = arith.addf %432, %449 : vector<16x16xf32>
    %c63 = arith.constant 63 : index
    %451 = memref.load %arg2[%c63] : memref<98xf32, #tpu.memory_space<smem>>
    %c2_334 = arith.constant 2 : index
    %c0_335 = arith.constant 0 : index
    %452 = vector.load %arg6[%c2_334, %c0_335] : memref<22x16xf32, #tpu.memory_space<vmem>>, vector<16x16xf32>
    %453 = vector.broadcast %451 : f32 to vector<16x16xf32>
    %454 = arith.mulf %453, %452 : vector<16x16xf32>
    %455 = arith.addf %437, %454 : vector<16x16xf32>
    %c70 = arith.constant 70 : index
    %456 = memref.load %arg2[%c70] : memref<98xf32, #tpu.memory_space<smem>>
    %c3_336 = arith.constant 3 : index
    %c0_337 = arith.constant 0 : index
    %457 = vector.load %arg6[%c3_336, %c0_337] : memref<22x16xf32, #tpu.memory_space<vmem>>, vector<16x16xf32>
    %458 = vector.broadcast %456 : f32 to vector<16x16xf32>
    %459 = arith.mulf %458, %457 : vector<16x16xf32>
    %460 = arith.addf %422, %459 : vector<16x16xf32>
    %c77 = arith.constant 77 : index
    %461 = memref.load %arg2[%c77] : memref<98xf32, #tpu.memory_space<smem>>
    %c4_338 = arith.constant 4 : index
    %c0_339 = arith.constant 0 : index
    %462 = vector.load %arg6[%c4_338, %c0_339] : memref<22x16xf32, #tpu.memory_space<vmem>>, vector<16x16xf32>
    %463 = vector.broadcast %461 : f32 to vector<16x16xf32>
    %464 = arith.mulf %463, %462 : vector<16x16xf32>
    %465 = arith.addf %445, %464 : vector<16x16xf32>
    %c84 = arith.constant 84 : index
    %466 = memref.load %arg2[%c84] : memref<98xf32, #tpu.memory_space<smem>>
    %c5_340 = arith.constant 5 : index
    %c0_341 = arith.constant 0 : index
    %467 = vector.load %arg6[%c5_340, %c0_341] : memref<22x16xf32, #tpu.memory_space<vmem>>, vector<16x16xf32>
    %468 = vector.broadcast %466 : f32 to vector<16x16xf32>
    %469 = arith.mulf %468, %467 : vector<16x16xf32>
    %470 = arith.addf %450, %469 : vector<16x16xf32>
    %c91 = arith.constant 91 : index
    %471 = memref.load %arg2[%c91] : memref<98xf32, #tpu.memory_space<smem>>
    %c6_342 = arith.constant 6 : index
    %c0_343 = arith.constant 0 : index
    %472 = vector.load %arg6[%c6_342, %c0_343] : memref<22x16xf32, #tpu.memory_space<vmem>>, vector<16x16xf32>
    %473 = vector.broadcast %471 : f32 to vector<16x16xf32>
    %474 = arith.mulf %473, %472 : vector<16x16xf32>
    %475 = arith.addf %455, %474 : vector<16x16xf32>
    %c1_344 = arith.constant 1 : index
    %c0_345 = arith.constant 0 : index
    %c1_346 = arith.constant 1 : index
    %476 = vector.load %arg5[%c1_344, %c0_345, %c1_346] : memref<2x22x22xf32, #tpu.memory_space<vmem>>, vector<1x22x16xf32>
    %477 = vector.shape_cast %476 : vector<1x22x16xf32> to vector<22x16xf32>
    %c0_347 = arith.constant 0 : index
    %c0_348 = arith.constant 0 : index
    %478 = vector.load %arg6[%c0_347, %c0_348] : memref<22x16xf32, #tpu.memory_space<vmem>>, vector<22x16xf32>
    tpu.vector_store %arg6[%c0_347, %c0_348], %477 {strides = array<i32>} : memref<22x16xf32, #tpu.memory_space<vmem>>, vector<22x16xf32>,
    %c50 = arith.constant 50 : index
    %479 = memref.load %arg2[%c50] : memref<98xf32, #tpu.memory_space<smem>>
    %c0_349 = arith.constant 0 : index
    %c0_350 = arith.constant 0 : index
    %480 = vector.load %arg6[%c0_349, %c0_350] : memref<22x16xf32, #tpu.memory_space<vmem>>, vector<16x16xf32>
    %481 = vector.broadcast %479 : f32 to vector<16x16xf32>
    %482 = arith.mulf %481, %480 : vector<16x16xf32>
    %483 = arith.addf %465, %482 : vector<16x16xf32>
    %c57 = arith.constant 57 : index
    %484 = memref.load %arg2[%c57] : memref<98xf32, #tpu.memory_space<smem>>
    %c1_351 = arith.constant 1 : index
    %c0_352 = arith.constant 0 : index
    %485 = vector.load %arg6[%c1_351, %c0_352] : memref<22x16xf32, #tpu.memory_space<vmem>>, vector<16x16xf32>
    %486 = vector.broadcast %484 : f32 to vector<16x16xf32>
    %487 = arith.mulf %486, %485 : vector<16x16xf32>
    %488 = arith.addf %470, %487 : vector<16x16xf32>
    %c64_353 = arith.constant 64 : index
    %489 = memref.load %arg2[%c64_353] : memref<98xf32, #tpu.memory_space<smem>>
    %c2_354 = arith.constant 2 : index
    %c0_355 = arith.constant 0 : index
    %490 = vector.load %arg6[%c2_354, %c0_355] : memref<22x16xf32, #tpu.memory_space<vmem>>, vector<16x16xf32>
    %491 = vector.broadcast %489 : f32 to vector<16x16xf32>
    %492 = arith.mulf %491, %490 : vector<16x16xf32>
    %493 = arith.addf %475, %492 : vector<16x16xf32>
    %c71 = arith.constant 71 : index
    %494 = memref.load %arg2[%c71] : memref<98xf32, #tpu.memory_space<smem>>
    %c3_356 = arith.constant 3 : index
    %c0_357 = arith.constant 0 : index
    %495 = vector.load %arg6[%c3_356, %c0_357] : memref<22x16xf32, #tpu.memory_space<vmem>>, vector<16x16xf32>
    %496 = vector.broadcast %494 : f32 to vector<16x16xf32>
    %497 = arith.mulf %496, %495 : vector<16x16xf32>
    %498 = arith.addf %460, %497 : vector<16x16xf32>
    %c78 = arith.constant 78 : index
    %499 = memref.load %arg2[%c78] : memref<98xf32, #tpu.memory_space<smem>>
    %c4_358 = arith.constant 4 : index
    %c0_359 = arith.constant 0 : index
    %500 = vector.load %arg6[%c4_358, %c0_359] : memref<22x16xf32, #tpu.memory_space<vmem>>, vector<16x16xf32>
    %501 = vector.broadcast %499 : f32 to vector<16x16xf32>
    %502 = arith.mulf %501, %500 : vector<16x16xf32>
    %503 = arith.addf %483, %502 : vector<16x16xf32>
    %c85 = arith.constant 85 : index
    %504 = memref.load %arg2[%c85] : memref<98xf32, #tpu.memory_space<smem>>
    %c5_360 = arith.constant 5 : index
    %c0_361 = arith.constant 0 : index
    %505 = vector.load %arg6[%c5_360, %c0_361] : memref<22x16xf32, #tpu.memory_space<vmem>>, vector<16x16xf32>
    %506 = vector.broadcast %504 : f32 to vector<16x16xf32>
    %507 = arith.mulf %506, %505 : vector<16x16xf32>
    %508 = arith.addf %488, %507 : vector<16x16xf32>
    %c92 = arith.constant 92 : index
    %509 = memref.load %arg2[%c92] : memref<98xf32, #tpu.memory_space<smem>>
    %c6_362 = arith.constant 6 : index
    %c0_363 = arith.constant 0 : index
    %510 = vector.load %arg6[%c6_362, %c0_363] : memref<22x16xf32, #tpu.memory_space<vmem>>, vector<16x16xf32>
    %511 = vector.broadcast %509 : f32 to vector<16x16xf32>
    %512 = arith.mulf %511, %510 : vector<16x16xf32>
    %513 = arith.addf %493, %512 : vector<16x16xf32>
    %c1_364 = arith.constant 1 : index
    %c0_365 = arith.constant 0 : index
    %c2_366 = arith.constant 2 : index
    %514 = vector.load %arg5[%c1_364, %c0_365, %c2_366] : memref<2x22x22xf32, #tpu.memory_space<vmem>>, vector<1x22x16xf32>
    %515 = vector.shape_cast %514 : vector<1x22x16xf32> to vector<22x16xf32>
    %c0_367 = arith.constant 0 : index
    %c0_368 = arith.constant 0 : index
    %516 = vector.load %arg6[%c0_367, %c0_368] : memref<22x16xf32, #tpu.memory_space<vmem>>, vector<22x16xf32>
    tpu.vector_store %arg6[%c0_367, %c0_368], %515 {strides = array<i32>} : memref<22x16xf32, #tpu.memory_space<vmem>>, vector<22x16xf32>,
    %c51 = arith.constant 51 : index
    %517 = memref.load %arg2[%c51] : memref<98xf32, #tpu.memory_space<smem>>
    %c0_369 = arith.constant 0 : index
    %c0_370 = arith.constant 0 : index
    %518 = vector.load %arg6[%c0_369, %c0_370] : memref<22x16xf32, #tpu.memory_space<vmem>>, vector<16x16xf32>
    %519 = vector.broadcast %517 : f32 to vector<16x16xf32>
    %520 = arith.mulf %519, %518 : vector<16x16xf32>
    %521 = arith.addf %503, %520 : vector<16x16xf32>
    %c58 = arith.constant 58 : index
    %522 = memref.load %arg2[%c58] : memref<98xf32, #tpu.memory_space<smem>>
    %c1_371 = arith.constant 1 : index
    %c0_372 = arith.constant 0 : index
    %523 = vector.load %arg6[%c1_371, %c0_372] : memref<22x16xf32, #tpu.memory_space<vmem>>, vector<16x16xf32>
    %524 = vector.broadcast %522 : f32 to vector<16x16xf32>
    %525 = arith.mulf %524, %523 : vector<16x16xf32>
    %526 = arith.addf %508, %525 : vector<16x16xf32>
    %c65 = arith.constant 65 : index
    %527 = memref.load %arg2[%c65] : memref<98xf32, #tpu.memory_space<smem>>
    %c2_373 = arith.constant 2 : index
    %c0_374 = arith.constant 0 : index
    %528 = vector.load %arg6[%c2_373, %c0_374] : memref<22x16xf32, #tpu.memory_space<vmem>>, vector<16x16xf32>
    %529 = vector.broadcast %527 : f32 to vector<16x16xf32>
    %530 = arith.mulf %529, %528 : vector<16x16xf32>
    %531 = arith.addf %513, %530 : vector<16x16xf32>
    %c72 = arith.constant 72 : index
    %532 = memref.load %arg2[%c72] : memref<98xf32, #tpu.memory_space<smem>>
    %c3_375 = arith.constant 3 : index
    %c0_376 = arith.constant 0 : index
    %533 = vector.load %arg6[%c3_375, %c0_376] : memref<22x16xf32, #tpu.memory_space<vmem>>, vector<16x16xf32>
    %534 = vector.broadcast %532 : f32 to vector<16x16xf32>
    %535 = arith.mulf %534, %533 : vector<16x16xf32>
    %536 = arith.addf %498, %535 : vector<16x16xf32>
    %c79 = arith.constant 79 : index
    %537 = memref.load %arg2[%c79] : memref<98xf32, #tpu.memory_space<smem>>
    %c4_377 = arith.constant 4 : index
    %c0_378 = arith.constant 0 : index
    %538 = vector.load %arg6[%c4_377, %c0_378] : memref<22x16xf32, #tpu.memory_space<vmem>>, vector<16x16xf32>
    %539 = vector.broadcast %537 : f32 to vector<16x16xf32>
    %540 = arith.mulf %539, %538 : vector<16x16xf32>
    %541 = arith.addf %521, %540 : vector<16x16xf32>
    %c86 = arith.constant 86 : index
    %542 = memref.load %arg2[%c86] : memref<98xf32, #tpu.memory_space<smem>>
    %c5_379 = arith.constant 5 : index
    %c0_380 = arith.constant 0 : index
    %543 = vector.load %arg6[%c5_379, %c0_380] : memref<22x16xf32, #tpu.memory_space<vmem>>, vector<16x16xf32>
    %544 = vector.broadcast %542 : f32 to vector<16x16xf32>
    %545 = arith.mulf %544, %543 : vector<16x16xf32>
    %546 = arith.addf %526, %545 : vector<16x16xf32>
    %c93 = arith.constant 93 : index
    %547 = memref.load %arg2[%c93] : memref<98xf32, #tpu.memory_space<smem>>
    %c6_381 = arith.constant 6 : index
    %c0_382 = arith.constant 0 : index
    %548 = vector.load %arg6[%c6_381, %c0_382] : memref<22x16xf32, #tpu.memory_space<vmem>>, vector<16x16xf32>
    %549 = vector.broadcast %547 : f32 to vector<16x16xf32>
    %550 = arith.mulf %549, %548 : vector<16x16xf32>
    %551 = arith.addf %531, %550 : vector<16x16xf32>
    %c1_383 = arith.constant 1 : index
    %c0_384 = arith.constant 0 : index
    %c3_385 = arith.constant 3 : index
    %552 = vector.load %arg5[%c1_383, %c0_384, %c3_385] : memref<2x22x22xf32, #tpu.memory_space<vmem>>, vector<1x22x16xf32>
    %553 = vector.shape_cast %552 : vector<1x22x16xf32> to vector<22x16xf32>
    %c0_386 = arith.constant 0 : index
    %c0_387 = arith.constant 0 : index
    %554 = vector.load %arg6[%c0_386, %c0_387] : memref<22x16xf32, #tpu.memory_space<vmem>>, vector<22x16xf32>
    tpu.vector_store %arg6[%c0_386, %c0_387], %553 {strides = array<i32>} : memref<22x16xf32, #tpu.memory_space<vmem>>, vector<22x16xf32>,
    %c52 = arith.constant 52 : index
    %555 = memref.load %arg2[%c52] : memref<98xf32, #tpu.memory_space<smem>>
    %c0_388 = arith.constant 0 : index
    %c0_389 = arith.constant 0 : index
    %556 = vector.load %arg6[%c0_388, %c0_389] : memref<22x16xf32, #tpu.memory_space<vmem>>, vector<16x16xf32>
    %557 = vector.broadcast %555 : f32 to vector<16x16xf32>
    %558 = arith.mulf %557, %556 : vector<16x16xf32>
    %559 = arith.addf %541, %558 : vector<16x16xf32>
    %c59 = arith.constant 59 : index
    %560 = memref.load %arg2[%c59] : memref<98xf32, #tpu.memory_space<smem>>
    %c1_390 = arith.constant 1 : index
    %c0_391 = arith.constant 0 : index
    %561 = vector.load %arg6[%c1_390, %c0_391] : memref<22x16xf32, #tpu.memory_space<vmem>>, vector<16x16xf32>
    %562 = vector.broadcast %560 : f32 to vector<16x16xf32>
    %563 = arith.mulf %562, %561 : vector<16x16xf32>
    %564 = arith.addf %546, %563 : vector<16x16xf32>
    %c66 = arith.constant 66 : index
    %565 = memref.load %arg2[%c66] : memref<98xf32, #tpu.memory_space<smem>>
    %c2_392 = arith.constant 2 : index
    %c0_393 = arith.constant 0 : index
    %566 = vector.load %arg6[%c2_392, %c0_393] : memref<22x16xf32, #tpu.memory_space<vmem>>, vector<16x16xf32>
    %567 = vector.broadcast %565 : f32 to vector<16x16xf32>
    %568 = arith.mulf %567, %566 : vector<16x16xf32>
    %569 = arith.addf %551, %568 : vector<16x16xf32>
    %c73 = arith.constant 73 : index
    %570 = memref.load %arg2[%c73] : memref<98xf32, #tpu.memory_space<smem>>
    %c3_394 = arith.constant 3 : index
    %c0_395 = arith.constant 0 : index
    %571 = vector.load %arg6[%c3_394, %c0_395] : memref<22x16xf32, #tpu.memory_space<vmem>>, vector<16x16xf32>
    %572 = vector.broadcast %570 : f32 to vector<16x16xf32>
    %573 = arith.mulf %572, %571 : vector<16x16xf32>
    %574 = arith.addf %536, %573 : vector<16x16xf32>
    %c80_396 = arith.constant 80 : index
    %575 = memref.load %arg2[%c80_396] : memref<98xf32, #tpu.memory_space<smem>>
    %c4_397 = arith.constant 4 : index
    %c0_398 = arith.constant 0 : index
    %576 = vector.load %arg6[%c4_397, %c0_398] : memref<22x16xf32, #tpu.memory_space<vmem>>, vector<16x16xf32>
    %577 = vector.broadcast %575 : f32 to vector<16x16xf32>
    %578 = arith.mulf %577, %576 : vector<16x16xf32>
    %579 = arith.addf %559, %578 : vector<16x16xf32>
    %c87 = arith.constant 87 : index
    %580 = memref.load %arg2[%c87] : memref<98xf32, #tpu.memory_space<smem>>
    %c5_399 = arith.constant 5 : index
    %c0_400 = arith.constant 0 : index
    %581 = vector.load %arg6[%c5_399, %c0_400] : memref<22x16xf32, #tpu.memory_space<vmem>>, vector<16x16xf32>
    %582 = vector.broadcast %580 : f32 to vector<16x16xf32>
    %583 = arith.mulf %582, %581 : vector<16x16xf32>
    %584 = arith.addf %564, %583 : vector<16x16xf32>
    %c94 = arith.constant 94 : index
    %585 = memref.load %arg2[%c94] : memref<98xf32, #tpu.memory_space<smem>>
    %c6_401 = arith.constant 6 : index
    %c0_402 = arith.constant 0 : index
    %586 = vector.load %arg6[%c6_401, %c0_402] : memref<22x16xf32, #tpu.memory_space<vmem>>, vector<16x16xf32>
    %587 = vector.broadcast %585 : f32 to vector<16x16xf32>
    %588 = arith.mulf %587, %586 : vector<16x16xf32>
    %589 = arith.addf %569, %588 : vector<16x16xf32>
    %c1_403 = arith.constant 1 : index
    %c0_404 = arith.constant 0 : index
    %c4_405 = arith.constant 4 : index
    %590 = vector.load %arg5[%c1_403, %c0_404, %c4_405] : memref<2x22x22xf32, #tpu.memory_space<vmem>>, vector<1x22x16xf32>
    %591 = vector.shape_cast %590 : vector<1x22x16xf32> to vector<22x16xf32>
    %c0_406 = arith.constant 0 : index
    %c0_407 = arith.constant 0 : index
    %592 = vector.load %arg6[%c0_406, %c0_407] : memref<22x16xf32, #tpu.memory_space<vmem>>, vector<22x16xf32>
    tpu.vector_store %arg6[%c0_406, %c0_407], %591 {strides = array<i32>} : memref<22x16xf32, #tpu.memory_space<vmem>>, vector<22x16xf32>,
    %c53 = arith.constant 53 : index
    %593 = memref.load %arg2[%c53] : memref<98xf32, #tpu.memory_space<smem>>
    %c0_408 = arith.constant 0 : index
    %c0_409 = arith.constant 0 : index
    %594 = vector.load %arg6[%c0_408, %c0_409] : memref<22x16xf32, #tpu.memory_space<vmem>>, vector<16x16xf32>
    %595 = vector.broadcast %593 : f32 to vector<16x16xf32>
    %596 = arith.mulf %595, %594 : vector<16x16xf32>
    %597 = arith.addf %579, %596 : vector<16x16xf32>
    %c60 = arith.constant 60 : index
    %598 = memref.load %arg2[%c60] : memref<98xf32, #tpu.memory_space<smem>>
    %c1_410 = arith.constant 1 : index
    %c0_411 = arith.constant 0 : index
    %599 = vector.load %arg6[%c1_410, %c0_411] : memref<22x16xf32, #tpu.memory_space<vmem>>, vector<16x16xf32>
    %600 = vector.broadcast %598 : f32 to vector<16x16xf32>
    %601 = arith.mulf %600, %599 : vector<16x16xf32>
    %602 = arith.addf %584, %601 : vector<16x16xf32>
    %c67 = arith.constant 67 : index
    %603 = memref.load %arg2[%c67] : memref<98xf32, #tpu.memory_space<smem>>
    %c2_412 = arith.constant 2 : index
    %c0_413 = arith.constant 0 : index
    %604 = vector.load %arg6[%c2_412, %c0_413] : memref<22x16xf32, #tpu.memory_space<vmem>>, vector<16x16xf32>
    %605 = vector.broadcast %603 : f32 to vector<16x16xf32>
    %606 = arith.mulf %605, %604 : vector<16x16xf32>
    %607 = arith.addf %589, %606 : vector<16x16xf32>
    %c74 = arith.constant 74 : index
    %608 = memref.load %arg2[%c74] : memref<98xf32, #tpu.memory_space<smem>>
    %c3_414 = arith.constant 3 : index
    %c0_415 = arith.constant 0 : index
    %609 = vector.load %arg6[%c3_414, %c0_415] : memref<22x16xf32, #tpu.memory_space<vmem>>, vector<16x16xf32>
    %610 = vector.broadcast %608 : f32 to vector<16x16xf32>
    %611 = arith.mulf %610, %609 : vector<16x16xf32>
    %612 = arith.addf %574, %611 : vector<16x16xf32>
    %c81 = arith.constant 81 : index
    %613 = memref.load %arg2[%c81] : memref<98xf32, #tpu.memory_space<smem>>
    %c4_416 = arith.constant 4 : index
    %c0_417 = arith.constant 0 : index
    %614 = vector.load %arg6[%c4_416, %c0_417] : memref<22x16xf32, #tpu.memory_space<vmem>>, vector<16x16xf32>
    %615 = vector.broadcast %613 : f32 to vector<16x16xf32>
    %616 = arith.mulf %615, %614 : vector<16x16xf32>
    %617 = arith.addf %597, %616 : vector<16x16xf32>
    %c88 = arith.constant 88 : index
    %618 = memref.load %arg2[%c88] : memref<98xf32, #tpu.memory_space<smem>>
    %c5_418 = arith.constant 5 : index
    %c0_419 = arith.constant 0 : index
    %619 = vector.load %arg6[%c5_418, %c0_419] : memref<22x16xf32, #tpu.memory_space<vmem>>, vector<16x16xf32>
    %620 = vector.broadcast %618 : f32 to vector<16x16xf32>
    %621 = arith.mulf %620, %619 : vector<16x16xf32>
    %622 = arith.addf %602, %621 : vector<16x16xf32>
    %c95 = arith.constant 95 : index
    %623 = memref.load %arg2[%c95] : memref<98xf32, #tpu.memory_space<smem>>
    %c6_420 = arith.constant 6 : index
    %c0_421 = arith.constant 0 : index
    %624 = vector.load %arg6[%c6_420, %c0_421] : memref<22x16xf32, #tpu.memory_space<vmem>>, vector<16x16xf32>
    %625 = vector.broadcast %623 : f32 to vector<16x16xf32>
    %626 = arith.mulf %625, %624 : vector<16x16xf32>
    %627 = arith.addf %607, %626 : vector<16x16xf32>
    %c1_422 = arith.constant 1 : index
    %c0_423 = arith.constant 0 : index
    %c5_424 = arith.constant 5 : index
    %628 = vector.load %arg5[%c1_422, %c0_423, %c5_424] : memref<2x22x22xf32, #tpu.memory_space<vmem>>, vector<1x22x16xf32>
    %629 = vector.shape_cast %628 : vector<1x22x16xf32> to vector<22x16xf32>
    %c0_425 = arith.constant 0 : index
    %c0_426 = arith.constant 0 : index
    %630 = vector.load %arg6[%c0_425, %c0_426] : memref<22x16xf32, #tpu.memory_space<vmem>>, vector<22x16xf32>
    tpu.vector_store %arg6[%c0_425, %c0_426], %629 {strides = array<i32>} : memref<22x16xf32, #tpu.memory_space<vmem>>, vector<22x16xf32>,
    %c54 = arith.constant 54 : index
    %631 = memref.load %arg2[%c54] : memref<98xf32, #tpu.memory_space<smem>>
    %c0_427 = arith.constant 0 : index
    %c0_428 = arith.constant 0 : index
    %632 = vector.load %arg6[%c0_427, %c0_428] : memref<22x16xf32, #tpu.memory_space<vmem>>, vector<16x16xf32>
    %633 = vector.broadcast %631 : f32 to vector<16x16xf32>
    %634 = arith.mulf %633, %632 : vector<16x16xf32>
    %635 = arith.addf %617, %634 : vector<16x16xf32>
    %c61 = arith.constant 61 : index
    %636 = memref.load %arg2[%c61] : memref<98xf32, #tpu.memory_space<smem>>
    %c1_429 = arith.constant 1 : index
    %c0_430 = arith.constant 0 : index
    %637 = vector.load %arg6[%c1_429, %c0_430] : memref<22x16xf32, #tpu.memory_space<vmem>>, vector<16x16xf32>
    %638 = vector.broadcast %636 : f32 to vector<16x16xf32>
    %639 = arith.mulf %638, %637 : vector<16x16xf32>
    %640 = arith.addf %622, %639 : vector<16x16xf32>
    %c68 = arith.constant 68 : index
    %641 = memref.load %arg2[%c68] : memref<98xf32, #tpu.memory_space<smem>>
    %c2_431 = arith.constant 2 : index
    %c0_432 = arith.constant 0 : index
    %642 = vector.load %arg6[%c2_431, %c0_432] : memref<22x16xf32, #tpu.memory_space<vmem>>, vector<16x16xf32>
    %643 = vector.broadcast %641 : f32 to vector<16x16xf32>
    %644 = arith.mulf %643, %642 : vector<16x16xf32>
    %645 = arith.addf %627, %644 : vector<16x16xf32>
    %c75 = arith.constant 75 : index
    %646 = memref.load %arg2[%c75] : memref<98xf32, #tpu.memory_space<smem>>
    %c3_433 = arith.constant 3 : index
    %c0_434 = arith.constant 0 : index
    %647 = vector.load %arg6[%c3_433, %c0_434] : memref<22x16xf32, #tpu.memory_space<vmem>>, vector<16x16xf32>
    %648 = vector.broadcast %646 : f32 to vector<16x16xf32>
    %649 = arith.mulf %648, %647 : vector<16x16xf32>
    %650 = arith.addf %612, %649 : vector<16x16xf32>
    %c82 = arith.constant 82 : index
    %651 = memref.load %arg2[%c82] : memref<98xf32, #tpu.memory_space<smem>>
    %c4_435 = arith.constant 4 : index
    %c0_436 = arith.constant 0 : index
    %652 = vector.load %arg6[%c4_435, %c0_436] : memref<22x16xf32, #tpu.memory_space<vmem>>, vector<16x16xf32>
    %653 = vector.broadcast %651 : f32 to vector<16x16xf32>
    %654 = arith.mulf %653, %652 : vector<16x16xf32>
    %655 = arith.addf %635, %654 : vector<16x16xf32>
    %c89 = arith.constant 89 : index
    %656 = memref.load %arg2[%c89] : memref<98xf32, #tpu.memory_space<smem>>
    %c5_437 = arith.constant 5 : index
    %c0_438 = arith.constant 0 : index
    %657 = vector.load %arg6[%c5_437, %c0_438] : memref<22x16xf32, #tpu.memory_space<vmem>>, vector<16x16xf32>
    %658 = vector.broadcast %656 : f32 to vector<16x16xf32>
    %659 = arith.mulf %658, %657 : vector<16x16xf32>
    %660 = arith.addf %640, %659 : vector<16x16xf32>
    %c96_439 = arith.constant 96 : index
    %661 = memref.load %arg2[%c96_439] : memref<98xf32, #tpu.memory_space<smem>>
    %c6_440 = arith.constant 6 : index
    %c0_441 = arith.constant 0 : index
    %662 = vector.load %arg6[%c6_440, %c0_441] : memref<22x16xf32, #tpu.memory_space<vmem>>, vector<16x16xf32>
    %663 = vector.broadcast %661 : f32 to vector<16x16xf32>
    %664 = arith.mulf %663, %662 : vector<16x16xf32>
    %665 = arith.addf %645, %664 : vector<16x16xf32>
    %c1_442 = arith.constant 1 : index
    %c0_443 = arith.constant 0 : index
    %c6_444 = arith.constant 6 : index
    %666 = vector.load %arg5[%c1_442, %c0_443, %c6_444] : memref<2x22x22xf32, #tpu.memory_space<vmem>>, vector<1x22x16xf32>
    %667 = vector.shape_cast %666 : vector<1x22x16xf32> to vector<22x16xf32>
    %c0_445 = arith.constant 0 : index
    %c0_446 = arith.constant 0 : index
    %668 = vector.load %arg6[%c0_445, %c0_446] : memref<22x16xf32, #tpu.memory_space<vmem>>, vector<22x16xf32>
    tpu.vector_store %arg6[%c0_445, %c0_446], %667 {strides = array<i32>} : memref<22x16xf32, #tpu.memory_space<vmem>>, vector<22x16xf32>,
    %c55 = arith.constant 55 : index
    %669 = memref.load %arg2[%c55] : memref<98xf32, #tpu.memory_space<smem>>
    %c0_447 = arith.constant 0 : index
    %c0_448 = arith.constant 0 : index
    %670 = vector.load %arg6[%c0_447, %c0_448] : memref<22x16xf32, #tpu.memory_space<vmem>>, vector<16x16xf32>
    %671 = vector.broadcast %669 : f32 to vector<16x16xf32>
    %672 = arith.mulf %671, %670 : vector<16x16xf32>
    %673 = arith.addf %655, %672 : vector<16x16xf32>
    %c62 = arith.constant 62 : index
    %674 = memref.load %arg2[%c62] : memref<98xf32, #tpu.memory_space<smem>>
    %c1_449 = arith.constant 1 : index
    %c0_450 = arith.constant 0 : index
    %675 = vector.load %arg6[%c1_449, %c0_450] : memref<22x16xf32, #tpu.memory_space<vmem>>, vector<16x16xf32>
    %676 = vector.broadcast %674 : f32 to vector<16x16xf32>
    %677 = arith.mulf %676, %675 : vector<16x16xf32>
    %678 = arith.addf %660, %677 : vector<16x16xf32>
    %c69 = arith.constant 69 : index
    %679 = memref.load %arg2[%c69] : memref<98xf32, #tpu.memory_space<smem>>
    %c2_451 = arith.constant 2 : index
    %c0_452 = arith.constant 0 : index
    %680 = vector.load %arg6[%c2_451, %c0_452] : memref<22x16xf32, #tpu.memory_space<vmem>>, vector<16x16xf32>
    %681 = vector.broadcast %679 : f32 to vector<16x16xf32>
    %682 = arith.mulf %681, %680 : vector<16x16xf32>
    %683 = arith.addf %665, %682 : vector<16x16xf32>
    %c76 = arith.constant 76 : index
    %684 = memref.load %arg2[%c76] : memref<98xf32, #tpu.memory_space<smem>>
    %c3_453 = arith.constant 3 : index
    %c0_454 = arith.constant 0 : index
    %685 = vector.load %arg6[%c3_453, %c0_454] : memref<22x16xf32, #tpu.memory_space<vmem>>, vector<16x16xf32>
    %686 = vector.broadcast %684 : f32 to vector<16x16xf32>
    %687 = arith.mulf %686, %685 : vector<16x16xf32>
    %688 = arith.addf %650, %687 : vector<16x16xf32>
    %c83 = arith.constant 83 : index
    %689 = memref.load %arg2[%c83] : memref<98xf32, #tpu.memory_space<smem>>
    %c4_455 = arith.constant 4 : index
    %c0_456 = arith.constant 0 : index
    %690 = vector.load %arg6[%c4_455, %c0_456] : memref<22x16xf32, #tpu.memory_space<vmem>>, vector<16x16xf32>
    %691 = vector.broadcast %689 : f32 to vector<16x16xf32>
    %692 = arith.mulf %691, %690 : vector<16x16xf32>
    %693 = arith.addf %673, %692 : vector<16x16xf32>
    %c90 = arith.constant 90 : index
    %694 = memref.load %arg2[%c90] : memref<98xf32, #tpu.memory_space<smem>>
    %c5_457 = arith.constant 5 : index
    %c0_458 = arith.constant 0 : index
    %695 = vector.load %arg6[%c5_457, %c0_458] : memref<22x16xf32, #tpu.memory_space<vmem>>, vector<16x16xf32>
    %696 = vector.broadcast %694 : f32 to vector<16x16xf32>
    %697 = arith.mulf %696, %695 : vector<16x16xf32>
    %698 = arith.addf %678, %697 : vector<16x16xf32>
    %c97 = arith.constant 97 : index
    %699 = memref.load %arg2[%c97] : memref<98xf32, #tpu.memory_space<smem>>
    %c6_459 = arith.constant 6 : index
    %c0_460 = arith.constant 0 : index
    %700 = vector.load %arg6[%c6_459, %c0_460] : memref<22x16xf32, #tpu.memory_space<vmem>>, vector<16x16xf32>
    %701 = vector.broadcast %699 : f32 to vector<16x16xf32>
    %702 = arith.mulf %701, %700 : vector<16x16xf32>
    %703 = arith.addf %683, %702 : vector<16x16xf32>
    %704 = arith.addf %693, %698 : vector<16x16xf32>
    %705 = arith.addf %703, %688 : vector<16x16xf32>
    %706 = arith.addf %704, %705 : vector<16x16xf32>
    %707 = arith.negf %706 : vector<16x16xf32>
    %708 = math.exp %707 : vector<16x16xf32>
    %cst_461 = arith.constant 1.000000e+00 : f32
    %709 = vector.broadcast %cst_461 : f32 to vector<16x16xf32>
    %710 = arith.addf %709, %708 : vector<16x16xf32>
    %711 = arith.divf %709, %710 : vector<16x16xf32>
    %c0_462 = arith.constant 0 : index
    %c0_463 = arith.constant 0 : index
    %712 = vector.load %arg6[%c0_462, %c0_463] : memref<22x16xf32, #tpu.memory_space<vmem>>, vector<16x16xf32>
    tpu.vector_store %arg6[%c0_462, %c0_463], %711 {strides = array<i32>} : memref<22x16xf32, #tpu.memory_space<vmem>>, vector<16x16xf32>,
    %c0_464 = arith.constant 0 : index
    %c0_465 = arith.constant 0 : index
    %713 = vector.load %arg6[%c0_464, %c0_465] : memref<22x16xf32, #tpu.memory_space<vmem>>, vector<1x16xf32>
    %c0_466 = arith.constant 0 : index
    %c0_467 = arith.constant 0 : index
    %714 = vector.load %arg7[%c0_466, %c0_467] : memref<1x256xf32, #tpu.memory_space<vmem>>, vector<1x16xf32>
    tpu.vector_store %arg7[%c0_466, %c0_467], %713 {strides = array<i32>} : memref<1x256xf32, #tpu.memory_space<vmem>>, vector<1x16xf32>,
    %c1_468 = arith.constant 1 : index
    %c0_469 = arith.constant 0 : index
    %715 = vector.load %arg6[%c1_468, %c0_469] : memref<22x16xf32, #tpu.memory_space<vmem>>, vector<1x16xf32>
    %c0_470 = arith.constant 0 : index
    %c16_471 = arith.constant 16 : index
    %716 = vector.load %arg7[%c0_470, %c16_471] : memref<1x256xf32, #tpu.memory_space<vmem>>, vector<1x16xf32>
    tpu.vector_store %arg7[%c0_470, %c16_471], %715 {strides = array<i32>} : memref<1x256xf32, #tpu.memory_space<vmem>>, vector<1x16xf32>,
    %c2_472 = arith.constant 2 : index
    %c0_473 = arith.constant 0 : index
    %717 = vector.load %arg6[%c2_472, %c0_473] : memref<22x16xf32, #tpu.memory_space<vmem>>, vector<1x16xf32>
    %c0_474 = arith.constant 0 : index
    %c32_475 = arith.constant 32 : index
    %718 = vector.load %arg7[%c0_474, %c32_475] : memref<1x256xf32, #tpu.memory_space<vmem>>, vector<1x16xf32>
    tpu.vector_store %arg7[%c0_474, %c32_475], %717 {strides = array<i32>} : memref<1x256xf32, #tpu.memory_space<vmem>>, vector<1x16xf32>,
    %c3_476 = arith.constant 3 : index
    %c0_477 = arith.constant 0 : index
    %719 = vector.load %arg6[%c3_476, %c0_477] : memref<22x16xf32, #tpu.memory_space<vmem>>, vector<1x16xf32>
    %c0_478 = arith.constant 0 : index
    %c48_479 = arith.constant 48 : index
    %720 = vector.load %arg7[%c0_478, %c48_479] : memref<1x256xf32, #tpu.memory_space<vmem>>, vector<1x16xf32>
    tpu.vector_store %arg7[%c0_478, %c48_479], %719 {strides = array<i32>} : memref<1x256xf32, #tpu.memory_space<vmem>>, vector<1x16xf32>,
    %c4_480 = arith.constant 4 : index
    %c0_481 = arith.constant 0 : index
    %721 = vector.load %arg6[%c4_480, %c0_481] : memref<22x16xf32, #tpu.memory_space<vmem>>, vector<1x16xf32>
    %c0_482 = arith.constant 0 : index
    %c64_483 = arith.constant 64 : index
    %722 = vector.load %arg7[%c0_482, %c64_483] : memref<1x256xf32, #tpu.memory_space<vmem>>, vector<1x16xf32>
    tpu.vector_store %arg7[%c0_482, %c64_483], %721 {strides = array<i32>} : memref<1x256xf32, #tpu.memory_space<vmem>>, vector<1x16xf32>,
    %c5_484 = arith.constant 5 : index
    %c0_485 = arith.constant 0 : index
    %723 = vector.load %arg6[%c5_484, %c0_485] : memref<22x16xf32, #tpu.memory_space<vmem>>, vector<1x16xf32>
    %c0_486 = arith.constant 0 : index
    %c80_487 = arith.constant 80 : index
    %724 = vector.load %arg7[%c0_486, %c80_487] : memref<1x256xf32, #tpu.memory_space<vmem>>, vector<1x16xf32>
    tpu.vector_store %arg7[%c0_486, %c80_487], %723 {strides = array<i32>} : memref<1x256xf32, #tpu.memory_space<vmem>>, vector<1x16xf32>,
    %c6_488 = arith.constant 6 : index
    %c0_489 = arith.constant 0 : index
    %725 = vector.load %arg6[%c6_488, %c0_489] : memref<22x16xf32, #tpu.memory_space<vmem>>, vector<1x16xf32>
    %c0_490 = arith.constant 0 : index
    %c96_491 = arith.constant 96 : index
    %726 = vector.load %arg7[%c0_490, %c96_491] : memref<1x256xf32, #tpu.memory_space<vmem>>, vector<1x16xf32>
    tpu.vector_store %arg7[%c0_490, %c96_491], %725 {strides = array<i32>} : memref<1x256xf32, #tpu.memory_space<vmem>>, vector<1x16xf32>,
    %c7_492 = arith.constant 7 : index
    %c0_493 = arith.constant 0 : index
    %727 = vector.load %arg6[%c7_492, %c0_493] : memref<22x16xf32, #tpu.memory_space<vmem>>, vector<1x16xf32>
    %c0_494 = arith.constant 0 : index
    %c112_495 = arith.constant 112 : index
    %728 = vector.load %arg7[%c0_494, %c112_495] : memref<1x256xf32, #tpu.memory_space<vmem>>, vector<1x16xf32>
    tpu.vector_store %arg7[%c0_494, %c112_495], %727 {strides = array<i32>} : memref<1x256xf32, #tpu.memory_space<vmem>>, vector<1x16xf32>,
    %c8_496 = arith.constant 8 : index
    %c0_497 = arith.constant 0 : index
    %729 = vector.load %arg6[%c8_496, %c0_497] : memref<22x16xf32, #tpu.memory_space<vmem>>, vector<1x16xf32>
    %c0_498 = arith.constant 0 : index
    %c128_499 = arith.constant 128 : index
    %730 = vector.load %arg7[%c0_498, %c128_499] : memref<1x256xf32, #tpu.memory_space<vmem>>, vector<1x16xf32>
    tpu.vector_store %arg7[%c0_498, %c128_499], %729 {strides = array<i32>} : memref<1x256xf32, #tpu.memory_space<vmem>>, vector<1x16xf32>,
    %c9_500 = arith.constant 9 : index
    %c0_501 = arith.constant 0 : index
    %731 = vector.load %arg6[%c9_500, %c0_501] : memref<22x16xf32, #tpu.memory_space<vmem>>, vector<1x16xf32>
    %c0_502 = arith.constant 0 : index
    %c144_503 = arith.constant 144 : index
    %732 = vector.load %arg7[%c0_502, %c144_503] : memref<1x256xf32, #tpu.memory_space<vmem>>, vector<1x16xf32>
    tpu.vector_store %arg7[%c0_502, %c144_503], %731 {strides = array<i32>} : memref<1x256xf32, #tpu.memory_space<vmem>>, vector<1x16xf32>,
    %c10_504 = arith.constant 10 : index
    %c0_505 = arith.constant 0 : index
    %733 = vector.load %arg6[%c10_504, %c0_505] : memref<22x16xf32, #tpu.memory_space<vmem>>, vector<1x16xf32>
    %c0_506 = arith.constant 0 : index
    %c160_507 = arith.constant 160 : index
    %734 = vector.load %arg7[%c0_506, %c160_507] : memref<1x256xf32, #tpu.memory_space<vmem>>, vector<1x16xf32>
    tpu.vector_store %arg7[%c0_506, %c160_507], %733 {strides = array<i32>} : memref<1x256xf32, #tpu.memory_space<vmem>>, vector<1x16xf32>,
    %c11_508 = arith.constant 11 : index
    %c0_509 = arith.constant 0 : index
    %735 = vector.load %arg6[%c11_508, %c0_509] : memref<22x16xf32, #tpu.memory_space<vmem>>, vector<1x16xf32>
    %c0_510 = arith.constant 0 : index
    %c176_511 = arith.constant 176 : index
    %736 = vector.load %arg7[%c0_510, %c176_511] : memref<1x256xf32, #tpu.memory_space<vmem>>, vector<1x16xf32>
    tpu.vector_store %arg7[%c0_510, %c176_511], %735 {strides = array<i32>} : memref<1x256xf32, #tpu.memory_space<vmem>>, vector<1x16xf32>,
    %c12_512 = arith.constant 12 : index
    %c0_513 = arith.constant 0 : index
    %737 = vector.load %arg6[%c12_512, %c0_513] : memref<22x16xf32, #tpu.memory_space<vmem>>, vector<1x16xf32>
    %c0_514 = arith.constant 0 : index
    %c192_515 = arith.constant 192 : index
    %738 = vector.load %arg7[%c0_514, %c192_515] : memref<1x256xf32, #tpu.memory_space<vmem>>, vector<1x16xf32>
    tpu.vector_store %arg7[%c0_514, %c192_515], %737 {strides = array<i32>} : memref<1x256xf32, #tpu.memory_space<vmem>>, vector<1x16xf32>,
    %c13_516 = arith.constant 13 : index
    %c0_517 = arith.constant 0 : index
    %739 = vector.load %arg6[%c13_516, %c0_517] : memref<22x16xf32, #tpu.memory_space<vmem>>, vector<1x16xf32>
    %c0_518 = arith.constant 0 : index
    %c208_519 = arith.constant 208 : index
    %740 = vector.load %arg7[%c0_518, %c208_519] : memref<1x256xf32, #tpu.memory_space<vmem>>, vector<1x16xf32>
    tpu.vector_store %arg7[%c0_518, %c208_519], %739 {strides = array<i32>} : memref<1x256xf32, #tpu.memory_space<vmem>>, vector<1x16xf32>,
    %c14_520 = arith.constant 14 : index
    %c0_521 = arith.constant 0 : index
    %741 = vector.load %arg6[%c14_520, %c0_521] : memref<22x16xf32, #tpu.memory_space<vmem>>, vector<1x16xf32>
    %c0_522 = arith.constant 0 : index
    %c224_523 = arith.constant 224 : index
    %742 = vector.load %arg7[%c0_522, %c224_523] : memref<1x256xf32, #tpu.memory_space<vmem>>, vector<1x16xf32>
    tpu.vector_store %arg7[%c0_522, %c224_523], %741 {strides = array<i32>} : memref<1x256xf32, #tpu.memory_space<vmem>>, vector<1x16xf32>,
    %c15_524 = arith.constant 15 : index
    %c0_525 = arith.constant 0 : index
    %743 = vector.load %arg6[%c15_524, %c0_525] : memref<22x16xf32, #tpu.memory_space<vmem>>, vector<1x16xf32>
    %c0_526 = arith.constant 0 : index
    %c240_527 = arith.constant 240 : index
    %744 = vector.load %arg7[%c0_526, %c240_527] : memref<1x256xf32, #tpu.memory_space<vmem>>, vector<1x16xf32>
    tpu.vector_store %arg7[%c0_526, %c240_527], %743 {strides = array<i32>} : memref<1x256xf32, #tpu.memory_space<vmem>>, vector<1x16xf32>,
    %c0_528 = arith.constant 0 : index
    %c0_529 = arith.constant 0 : index
    %745 = vector.load %arg7[%c0_528, %c0_529] : memref<1x256xf32, #tpu.memory_space<vmem>>, vector<1x256xf32>
    %c0_530 = arith.constant 0 : index
    %c0_531 = arith.constant 0 : index
    %c0_532 = arith.constant 0 : index
    %746 = vector.load %arg1[%c0_530, %c0_531, %c0_532] : memref<1x4x256xf32, #tpu.memory_space<vmem>>, vector<1x4x256xf32>
    %747 = vector.shape_cast %746 : vector<1x4x256xf32> to vector<4x256xf32>
    %748 = vector.broadcast %745 : vector<1x256xf32> to vector<4x256xf32>
    %749 = arith.mulf %747, %748 : vector<4x256xf32>
    %c0_533 = arith.constant 0 : index
    %c0_534 = arith.constant 0 : index
    %c0_535 = arith.constant 0 : index
    %750 = vector.load %arg3[%c0_533, %c0_534, %c0_535] : memref<1x4x256xf32, #tpu.memory_space<vmem>>, vector<1x4x256xf32>
    %751 = vector.shape_cast %750 : vector<1x4x256xf32> to vector<4x256xf32>
    %752 = vector.shape_cast %749 : vector<4x256xf32> to vector<1x4x256xf32>
    tpu.vector_store %arg3[%c0_533, %c0_534, %c0_535], %752 {strides = array<i32>} : memref<1x4x256xf32, #tpu.memory_space<vmem>>, vector<1x4x256xf32>,
    return
  }
  func.func @transform_0(%arg0: i32) -> (i32, i32, i32) {
    %c0_i32 = arith.constant 0 : i32
    %c0_i32_0 = arith.constant 0 : i32
    %c0_i32_1 = arith.constant 0 : i32
    return %arg0, %c0_i32, %c0_i32_0 : i32, i32, i32
  }
  func.func @transform_1(%arg0: i32) -> i32 {
    %c0_i32 = arith.constant 0 : i32
    %c0_i32_0 = arith.constant 0 : i32
    return %c0_i32 : i32
  }
  func.func @transform_2(%arg0: i32) -> (i32, i32, i32) {
    %c0_i32 = arith.constant 0 : i32
    %c0_i32_0 = arith.constant 0 : i32
    %c0_i32_1 = arith.constant 0 : i32
    return %arg0, %c0_i32, %c0_i32_0 : i32, i32, i32
  }
}

</mosaic_0001>

<bundles_post_ra>
// kernel: tpu_custom_call.1
= control target key start
LH: loop header
LB: loop body
LE: loop exit
PB: predicated region body
PF: predicated region fallthrough
CT: control target
= control target key end

     0   :  { %s3518_s0 = inlined_call_operand.hbm [shape: f32[2,4,256], index: 0, kind: input, shape index: {}]   ;;  %s3519_s1 = inlined_call_operand.hbm [shape: f32[98], index: 1, kind: input, shape index: {}]   ;;  %s3520_s2 = inlined_call_operand.hbm [shape: f32[2,4,256], index: 2, kind: output, shape index: {}]  }
   0x1   :  { %3531 = sst [smem:[#allocation38_spill]] %s3518_s0 }
   0x2   :  { %3532 = sst [smem:[#allocation39_spill]] %s3519_s1 }
   0x3   :  { %7 = vsyncpa [#allocation7], 0 }
   0x4   :  { %9 = vsyncpa [#allocation7 + $0x1], 0 }
   0x5   :  { %10 = vsyncpa [#allocation9], 0 }
   0x6   :  { %11 = vsyncpa [#allocation8], 0 }
   0x7   :  { %13 = vsyncpa [#allocation8 + $0x1], 0  ;;  %s2147_s9 = smov 0   ;;  %s2149_s10 = smov 0  }
   0x8   :  { %s2151_s11 = smov 0   ;;  %s2153_s12 = smov 0  }
   0x9 LB: > { %3533 = sst [smem:[#allocation15_spill]] %s2095_s9  ;;  %s2168_s13 = sadd.s32 4294967295, %s2107_s12   ;;  %s2107_s12 = sphi %s2153_s12, %s3641_s12   ;;  %s2103_s11 = sphi %s2151_s11, %s3644_s11   ;;  %s2099_s10 = sphi %s2149_s10, %s3643_s10   ;;  %s2095_s9 = sphi %s2147_s9, %s3642_s9  }
   0xa   : > { %3534 = sst [smem:[#allocation16_spill]] %s2099_s10  ;;  %s1756_s14 = sadd.s32 4294967294, %s2107_s12  }
   0xb   : > { %3535 = sst [smem:[#allocation17_spill]] %s2103_s11  ;;  %p39_p0 = scmp.ne.s32.totalorder %s2099_s10, %s2095_s9 }
   0xc   : > { %3536 = sst [smem:[#allocation18_spill]] %s2107_s12  ;;  %p40_p1 = scmp.eq.s32.totalorder %s2168_s13, 0 }
   0xd   : > { %p84_p2 = scmp.eq.s32.totalorder %s2168_s13, 1  ;;  %p90_p3 = scmp.eq.s32.totalorder %s1756_s14, 1 }
   0xe   : > { %p2177_p4 = por %p40_p1, %p39_p0  ;;  %p1757_p5 = scmp.ge.s32.totalorder %s2107_s12, 1 }
   0xf   : > { %p2182_p6 = por %p90_p3, %p39_p0  ;;  %p97_p7 = scmp.lt.s32.totalorder %s2107_s12, 3 }
  0x10   : > { %s3540_s1 = sld [smem:[#allocation39_spill]]  ;;  %s2198_s21 = sadd.s32 1, %s2107_s12  }
  0x11   : > { %s3538_s16 = scalar_select %p2182_p6, 1, 0 }
  0x12   : > { %p2190_p8 = pnand %p1757_p5, %p97_p7  ;;  %3542 = sst [smem:[#allocation20_spill]] %s2198_s21 }
  0x13   : > { %3539 = sst [smem:[#allocation19_spill]] %s3538_s16  ;;  %s23_s22 = ssub.s32 %s2107_s12, %s2198_s21 }
  0x14   : > { %p1881_p10 = pneg %p2190_p8  ;;  %p24_p12 = scmp.eq.s32.totalorder %s23_s22, 0 }
  0x15   : > { %s26_s23 = sadd.s32 1, %s2103_s11  ;;  %p33_p13 = scmp.ne.s32.totalorder %s2103_s11, %s2099_s10 }
  0x16   : > { %s109_s19 = sshll.u32 %s3540_s1, 4  ;;  %p1882_p11 = pnand %p1881_p10, %p40_p1  ;;  %s110_s19 = int_to_ptr.hbm [resolvable:$true] %s109_s19 }
  0x17   : > { %s2109_s24 = smov [#allocation10]   ;;  %p34_p0 = scmp.eq.s32.totalorder %s2107_s12, 0 }
  0x18   : > { %1884 = dma.hbm_to_smem (!%p1882_p11), %s110_s19, 16, %s2109_s24, [#allocation9]  }
  0x19   : > { %s2208_s25 = scalar_select %p24_p12, %s2103_s11, %s26_s23  }
  0x1a   : > { %p2213_p3 = por %p84_p2, %p33_p13  ;;  %s120_s27 = sand.u32 1, %s2103_s11  }
  0x1b   : > { %3543 = sst [smem:[#allocation21_spill]] %s2208_s25  ;;  %p35_p5 = por %p34_p0, %p33_p13 }
  0x1c   : > { %p1894_p7 = scmp.lt.s32.totalorder %s2107_s12, 2  ;;  %s1760_s28 = sshll.u32 %s120_s27, 3 }
  0x1d   : > { %s1871_s29 = sshll.u32 %s2107_s12, 3  ;;  %s3545_s0 = sld [smem:[#allocation38_spill]] }
  0x1e   : > { %s124_s6 = scalar_lea.vmem [#allocation6], %s1760_s28  ;;  %p2223_p10 = pnand %p1894_p7, %p35_p5 }
  0x1f   : > { %s133_s7 = sshll.u32 %s124_s6, 4  ;;  %s121_s14 = scalar_lea.sflag [#allocation7], %s120_s27  ;;  %s134_s7 = int_to_ptr.vmem [resolvable:$true] %s133_s7 }
  0x20   : > { %p2011_p11 = pneg %p2223_p10 }
  0x23   : > { %s129_s4 = scalar_lea.hbm %s3545_s0, %s1871_s29  ;;  %s2014_s23 = scalar_lea.hbm %s3545_s0, 16 }
  0x24   : > { %s131_s5 = sshll.u32 %s129_s4, 4  ;;  %s132_s5 = int_to_ptr.hbm [resolvable:$true] %s131_s5 }
  0x25   : > { %s2007_s17 = sshra.s32 %s132_s5, 4  ;;  %s2008_s17 = int_to_ptr.hbm [resolvable:$true] %s2007_s17 }
  0x26   : > { %s2009_s18 = scalar_lea.hbm %s2008_s17, 8  ;;  %p2015_p0 = scmp.lt.s32.totalorder %s2008_s17, %s3545_s0 }
  0x27   : > { %p2010_p2 = scmp.ne.s32.totalorder %s2008_s17, %s2009_s18  ;;  %p2016_p5 = scmp.lt.s32.totalorder %s2014_s23, %s2009_s18 }
  0x29   : > { %p2012_p12 = pnand %p2011_p11, %p2010_p2  ;;  %p2017_p7 = por %p2016_p5, %p2015_p0 }
  0x2b   : > { %p2013_p13 = pneg %p2012_p12 }
  0x2d   : > { %p2018_p9 = pnand %p2017_p7, %p2013_p13 }
  0x2f   : > { %2021 = shalt.err (!%p2018_p9)
}
  0x30   : > { %1888 = dma.hbm_to_vmem [thread:$0]  (!%p2223_p10), %s132_s5, 128, %s134_s7, %s121_s14  }
  0x31   : > { %142 = sbr.rel (%p2190_p8) target bundleno = 795 (0x31b), region = 28 }
  0x36   : > { %s2240_s27 = sand.u32 1, %s2099_s10  }
  0x37   : > { %s3521_s29 = sshll.u32 %s2240_s27, 3  ;;  %s145_s30 = scalar_lea.sflag [#allocation7], %s2240_s27 }
  0x38   : > { %s2246_s3 = scalar_lea.vmem [#allocation6], %s3521_s29 }
  0x39   : > { %2082 = dma.done.wait (%p2177_p4), %s145_s30, 128  }
  0x3a   : > { %2084 = vsyncadd (%p2177_p4), %s145_s30, 4294967168 }
  0x3b   : > { %2086 = dma.done.wait (%p40_p1), [#allocation9], 16  }
  0x3c   : > { %2088 = vsyncadd (%p40_p1), [#allocation9], 4294967280 }
  0x3d   : > { %159 = sfence }
  0x3e   : > { %v176_v0 = vld [vmem:[%s2246_s3] sm:$0xff]  ;;  %vm183_vm0 = vcmask 1043456   ;;  %v3522_v15 = vlaneseq  ;;  %vm201_vm1 = vcmask 1040384   ;;  %s2110_s15 = smov 99   ;;  %s2111_s20 = smov 3   ;;  %vm238_vm3 = vcmask 23552  }
  0x3f   : > { %178 = vst [vmem:[#allocation1] ss:$2 sm:$0xff] %v176_v0  ;;  %s2112_s4 = smov 67   ;;  %s2113_s5 = smov 83   ;;  %vm241_vm4 = vcmask 179352   ;;  %v2118_v59 = vmov 0.0  }
  0x40   : > { %vm206_vm2 = vcmp.lt.s32.totalorder %v3522_v15, 256  ;;  %s2114_s6 = smov 115   ;;  %s2115_s7 = smov 51   ;;  %239 = vst.msk [vmem:[#allocation3 + $0x3] sm:$0xff] %vm238_vm3, %v2118_v59  ;;  %vm235_vm5 = vcmask 174080   ;;  %vm257_vm6 = vcmask 147480  }
  0x41   : > { %s2116_s8 = smov 19   ;;  %s2117_s14 = smov 35   ;;  %242 = vst.msk [vmem:[#allocation3 + $0x3] sm:$0xff] %vm241_vm4, %v2118_v59  ;;  %vm479_vm7 = vcmask 130048   ;;  %vm482_vm8 = vcmask 128000  }
  0x42   : > { %240 = vst.msk [vmem:[#allocation3 + $0xb] sm:$0xff] %vm238_vm3, %v2118_v59  ;;  %s2119_s17 = smov 127   ;;  %s2120_s18 = smov 126  }
  0x43   : > { %247 = vst.msk [vmem:[#allocation3 + $0x1b] sm:$0xff] %vm238_vm3, %v2118_v59  ;;  %s2121_s19 = smov 125   ;;  %s2122_s22 = smov 124  }
  0x44   : > { %248 = vst.msk [vmem:[#allocation3 + $0x23] sm:$0xff] %vm238_vm3, %v2118_v59  ;;  %s2123_s23 = smov 123   ;;  %s2124_s24 = smov 122  }
  0x45   : > { %243 = vst.msk [vmem:[#allocation3 + $0xb] sm:$0xff] %vm241_vm4, %v2118_v59  ;;  %s2396_s28 = sld [smem:[#allocation10 + $0x1c]] }
  0x46   : > { %v179_v1 = vld.sshfl [vmem:[#allocation1] sm:$0xff pattern:$0x75316420]  ;;  %v180_v2 = vld.sshfl [vmem:[#allocation1 + $0x8] sm:$0xff pattern:$0x75316420] }
  0x47   : > { %v184_v3 = vsel %vm183_vm0, %v179_v1, 0.0  ;;  %v191_v4 = vsel %vm183_vm0, %v180_v2, 0.0  ;;  %209 = vst [vmem:[#allocation1] ss:$2 sm:$0xff] %v176_v0  ;;  %s2406_s30 = sld [smem:[#allocation10]] }
  0x48   : > { %v185_v5 = vrot.slane %v184_v3, 4  ;;  %v192_v6 = vrot.slane %v191_v4, 4  ;;  %249 = vst.msk [vmem:[#allocation3 + $0x1b] sm:$0xff] %vm241_vm4, %v2118_v59  ;;  %s2564_s29 = sld [smem:[#allocation10 + $0x2c]] }
  0x49   : > { %250 = vst.msk [vmem:[#allocation3 + $0x23] sm:$0xff] %vm241_vm4, %v2118_v59  ;;  %s2567_s0 = sld [smem:[#allocation10 + $0xa]] }
  0x4a   : > { %v186_v7 = vadd.f32 %v185_v5, %v184_v3  ;;  %v193_v8 = vadd.f32 %v192_v6, %v191_v4  ;;  %236 = vst.msk [vmem:[#allocation3] sm:$0x7] %vm235_vm5, %v2118_v59  ;;  %s2570_s1 = sld [smem:[#allocation10 + $0x11]] }
  0x4b   : > { %237 = vst.msk [vmem:[#allocation3 + $0x13] sm:$0x7] %vm235_vm5, %v2118_v59  ;;  %s2576_s25 = sld [smem:[#allocation10 + $0x18]] }
  0x4c   : > { %v187_v9 = vrot.slane %v186_v7, 2  ;;  %v194_v10 = vrot.slane %v193_v8, 2  ;;  %245 = vst.msk [vmem:[#allocation3 + $0x18] sm:$0x7] %vm235_vm5, %v2118_v59  ;;  %s2579_s11 = sld [smem:[#allocation10 + $0x26]] }
  0x4d   : > { %246 = vst.msk [vmem:[#allocation3 + $0x2b] sm:$0x7] %vm235_vm5, %v2118_v59  ;;  %s2582_s10 = sld [smem:[#allocation10 + $0x2d]] }
  0x4e   : > { %v188_v11 = vadd.f32 %v187_v9, %v186_v7  ;;  %v195_v12 = vadd.f32 %v194_v10, %v193_v8  ;;  %v210_v13 = vld.sshfl [vmem:[#allocation1] sm:$0xff pattern:$0x75316420]  ;;  %v211_v14 = vld.sshfl [vmem:[#allocation1 + $0x8] sm:$0xff pattern:$0x75316420] }
  0x4f   : > { %v214_v16 = vsel %vm183_vm0, %v210_v13, -inf  ;;  %v221_v17 = vsel %vm183_vm0, %v211_v14, -inf  ;;  %s2734_s21 = sld [smem:[#allocation10 + $0x31]] }
  0x50   : > { %v189_v18 = vrot.slane %v188_v11, 1  ;;  %v196_v19 = vrot.slane %v195_v12, 1  ;;  %v215_v20 = vrot.slane %v214_v16, 4  ;;  %v222_v21 = vrot.slane %v221_v17, 4  ;;  %s2742_s12 = sld [smem:[#allocation10 + $0x38]] }
  0x51   : > { %s2754_s16 = sld [smem:[#allocation10 + $0x46]] }
  0x52   : > { %v190_v22 = vadd.f32 %v189_v18, %v188_v11  ;;  %v197_v23 = vadd.f32 %v196_v19, %v195_v12  ;;  %v216_v24 = vmax.f32 %v214_v16, %v215_v20  ;;  %v223_v25 = vmax.f32 %v221_v17, %v222_v21  ;;  %s2759_s9 = sld [smem:[#allocation10 + $0x4d]] }
  0x54   : > { %v200_v26 = vrot.slane %v197_v23, 7  ;;  %v217_v27 = vrot.slane %v216_v24, 2  ;;  %v224_v28 = vrot.slane %v223_v25, 2 }
  0x56   : > { %v202_v29 = vsel %vm201_vm1, %v190_v22, %v200_v26  ;;  %v218_v30 = vmax.f32 %v216_v24, %v217_v27  ;;  %v225_v31 = vmax.f32 %v223_v25, %v224_v28 }
  0x57   : > { %208 = vst.msk [vmem:[#allocation2] ss:$2 sm:$0x3] %vm206_vm2, %v202_v29 }
  0x58   : > { %v219_v32 = vrot.slane %v218_v30, 1  ;;  %v226_v33 = vrot.slane %v225_v31, 1 }
  0x5a   : > { %v220_v34 = vmax.f32 %v218_v30, %v219_v32  ;;  %v227_v35 = vmax.f32 %v225_v31, %v226_v33 }
  0x5c   : > { %v230_v36 = vrot.slane %v227_v35, 7 }
  0x5e   : > { %v231_v37 = vsel %vm201_vm1, %v220_v34, %v230_v36  ;;  %v1952_v38 = vld [vmem:[#allocation2] ss:$0 sm:$0xff]  ;;  %v1966_v46 = vld [vmem:[#allocation2 + $0x2] ss:$0 sm:$0xff] }
  0x5f   : > { %234 = vst.msk [vmem:[#allocation2 + $0x1] ss:$2 sm:$0x3] %vm206_vm2, %v231_v37  ;;  %v1953_v39 = vld [vmem:[#allocation2] ss:$0 sm:$0xff]  ;;  %269 = vrot.lane.b32.xlu1 %v1952_v38, %s2110_s15 }
  0x60   : > { %254 = vrot.lane.b32.xlu0 %v1953_v39, %s2111_s20  ;;  %v1954_v40 = vld [vmem:[#allocation2] ss:$0 sm:$0xff]  ;;  %v1958_v47 = vld [vmem:[#allocation2 + $0x2] ss:$0 sm:$0xff] }
  0x61   : > { %v1960_v41 = vld [vmem:[#allocation2] ss:$0 sm:$0xff]  ;;  %v1959_v48 = vld [vmem:[#allocation2 + $0x2] ss:$0 sm:$0xff] }
  0x62   : > { %v1955_v42 = vld [vmem:[#allocation2] ss:$0 sm:$0xff]  ;;  %283 = vrot.lane.b32.xlu2 %v1960_v41, %s2112_s4  ;;  %v1969_v49 = vld [vmem:[#allocation2 + $0x2] ss:$0 sm:$0xff] }
  0x63   : > { %v1963_v43 = vld [vmem:[#allocation2] ss:$0 sm:$0xff]  ;;  %v1961_v50 = vld [vmem:[#allocation2 + $0x2] ss:$0 sm:$0xff] }
  0x64   : > { %v1956_v44 = vld [vmem:[#allocation2] ss:$0 sm:$0xff]  ;;  %v1962_v51 = vld [vmem:[#allocation2 + $0x2] ss:$0 sm:$0xff] }
  0x65   : > { %v1957_v45 = vld [vmem:[#allocation2] ss:$0 sm:$0xff]  ;;  %v1972_v52 = vld [vmem:[#allocation2 + $0x2] ss:$0 sm:$0xff] }
  0x66   : > { %v1964_v53 = vld [vmem:[#allocation2 + $0x1] ss:$0 sm:$0xff]  ;;  %v1965_v54 = vld [vmem:[#allocation2 + $0x2] ss:$0 sm:$0xff]  ;;  %v1973_v63 = vld [vmem:[#allocation2 + $0x3] ss:$0 sm:$0xff] }
  0x67   : > { %276 = vrot.lane.b32.xlu1 %v1954_v40, %s2113_s5  ;;  %v1975_v55 = vld [vmem:[#allocation2 + $0x1] ss:$0 sm:$0xff]  ;;  %v1974_v0 = vld [vmem:[#allocation2 + $0x3] ss:$0 sm:$0xff] }
  0x68   : > { %262 = vrot.lane.b32.xlu0 %v1955_v42, %s2114_s6  ;;  %v1967_v56 = vld [vmem:[#allocation2 + $0x1] ss:$0 sm:$0xff]  ;;  %v1982_v1 = vld [vmem:[#allocation2 + $0x3] ss:$0 sm:$0xff] }
  0x69   : > { %v1968_v57 = vld [vmem:[#allocation2 + $0x1] ss:$0 sm:$0xff]  ;;  %v1976_v2 = vld [vmem:[#allocation2 + $0x3] ss:$0 sm:$0xff] }
  0x6a   : > { %290 = vrot.lane.b32.xlu2 %v1963_v43, %s2115_s7  ;;  %v1978_v58 = vld [vmem:[#allocation2 + $0x1] ss:$0 sm:$0xff]  ;;  %v1977_v3 = vld [vmem:[#allocation2 + $0x3] ss:$0 sm:$0xff] }
  0x6b   : > { %v1970_v60 = vld [vmem:[#allocation2 + $0x1] ss:$0 sm:$0xff]  ;;  %v1983_v4 = vld [vmem:[#allocation2 + $0x3] ss:$0 sm:$0xff] }
  0x6c   : > { %v1971_v61 = vld [vmem:[#allocation2 + $0x1] ss:$0 sm:$0xff]  ;;  %v1979_v5 = vld [vmem:[#allocation2 + $0x3] ss:$0 sm:$0xff] }
  0x6d   : > { %v1981_v62 = vld [vmem:[#allocation2 + $0x1] ss:$0 sm:$0xff]  ;;  %v1980_v6 = vld [vmem:[#allocation2 + $0x3] ss:$0 sm:$0xff] }
  0x6f   : > { %304 = vrot.lane.b32.xlu1 %v1956_v44, %s2116_s8 }
  0x70   : > { %297 = vrot.lane.b32.xlu0 %v1957_v45, %s2117_s14 }
  0x72   : > { %311 = vrot.lane.b32.xlu2 %v1966_v46, %s2111_s20 }
  0x77   : > { %325 = vrot.lane.b32.xlu1 %v1958_v47, %s2110_s15 }
  0x78   : > { %318 = vrot.lane.b32.xlu0 %v1959_v48, %s2114_s6 }
  0x7a   : > { %332 = vrot.lane.b32.xlu2 %v1969_v49, %s2113_s5 }
  0x7f   : > { %346 = vrot.lane.b32.xlu1 %v1961_v50, %s2115_s7 }
  0x80   : > { %339 = vrot.lane.b32.xlu0 %v1962_v51, %s2112_s4 }
  0x82   : > { %353 = vrot.lane.b32.xlu2 %v1972_v52, %s2117_s14 }
  0x87   : > { %367 = vrot.lane.b32.xlu1 %v1964_v53, %s2111_s20 }
  0x88   : > { %360 = vrot.lane.b32.xlu0 %v1965_v54, %s2116_s8 }
  0x8a   : > { %374 = vrot.lane.b32.xlu2 %v1975_v55, %s2114_s6 }
  0x8f   : > { %388 = vrot.lane.b32.xlu1 %v1967_v56, %s2113_s5 }
  0x90   : > { %381 = vrot.lane.b32.xlu0 %v1968_v57, %s2110_s15 }
  0x92   : > { %395 = vrot.lane.b32.xlu2 %v1978_v58, %s2112_s4 }
  0x97   : > { %409 = vrot.lane.b32.xlu1 %v1970_v60, %s2117_s14 }
  0x98   : > { %402 = vrot.lane.b32.xlu0 %v1971_v61, %s2115_s7 }
  0x9a   : > { %416 = vrot.lane.b32.xlu2 %v1981_v62, %s2116_s8 }
  0x9f   : > { %430 = vrot.lane.b32.xlu1 %v1973_v63, %s2114_s6  ;;  %s2457_s6 = sld [smem:[#allocation10 + $0x3]] }
  0xa0   : > { %423 = vrot.lane.b32.xlu0 %v1974_v0, %s2111_s20  ;;  %s2417_s20 = sld [smem:[#allocation10 + $0x1d]] }
  0xa2   : > { %437 = vrot.lane.b32.xlu2 %v1982_v1, %s2110_s15  ;;  %s2412_s15 = sld [smem:[#allocation10 + $0x1]] }
  0xa7   : > { %451 = vrot.lane.b32.xlu1 %v1976_v2, %s2112_s4  ;;  %s2427_s4 = sld [smem:[#allocation10 + $0x2]] }
  0xa8   : > { %444 = vrot.lane.b32.xlu0 %v1977_v3, %s2113_s5  ;;  %s2451_s5 = sld [smem:[#allocation10 + $0x1e]] }
  0xaa   : > { %458 = vrot.lane.b32.xlu2 %v1983_v4, %s2115_s7  ;;  %s2480_s7 = sld [smem:[#allocation10 + $0x1f]] }
  0xaf   : > { %472 = vrot.lane.b32.xlu1 %v1979_v5, %s2116_s8  ;;  %s2486_s8 = sld [smem:[#allocation10 + $0x4]] }
  0xb0   : > { %465 = vrot.lane.b32.xlu0 %v1980_v6, %s2117_s14  ;;  %s2502_s14 = sld [smem:[#allocation10 + $0x7]] }
  0xbc   : > { %v284_v7 = vpop.permute.xlu2 %283 }
  0xbd   : > { %286 = vst.msk [vmem:[#allocation3 + $0x7] sm:$0x1] %vm257_vm6, %v284_v7 }
  0xc4   : > { %v291_v8 = vpop.permute.xlu2 %290 }
  0xc5   : > { %293 = vst.msk [vmem:[#allocation3 + $0x8] sm:$0x1] %vm257_vm6, %v291_v8 }
  0xcc   : > { %v312_v9 = vpop.permute.xlu2 %311 }
  0xcd   : > { %314 = vst.msk [vmem:[#allocation3 + $0xb] sm:$0x1] %vm257_vm6, %v312_v9  ;;  %v519_v9 = vstv %s2396_s28  ;;  %s2523_s28 = sld [smem:[#allocation10 + $0x16]] }
  0xd1   : > { %v270_v10 = vpop.permute.xlu1 %269 }
  0xd2   : > { %272 = vst.msk [vmem:[#allocation3 + $0x5] sm:$0x1] %vm257_vm6, %v270_v10  ;;  %v255_v11 = vpop.permute.xlu0 %254  ;;  %v487_v10 = vstv %s2406_s30  ;;  %s2525_s30 = sld [smem:[#allocation10 + $0x20]] }
  0xd3   : > { %258 = vst.msk [vmem:[#allocation3 + $0x3] sm:$0x1] %vm257_vm6, %v255_v11  ;;  %v561_v11 = vstv %s2412_s15  ;;  %s2527_s15 = sld [smem:[#allocation10 + $0x24]] }
  0xd4   : > { %v333_v12 = vpop.permute.xlu2 %332 }
  0xd5   : > { %335 = vst.msk [vmem:[#allocation3 + $0xe] sm:$0x1] %vm257_vm6, %v333_v12 }
  0xd9   : > { %v277_v13 = vpop.permute.xlu1 %276 }
  0xda   : > { %279 = vst.msk [vmem:[#allocation3 + $0x6] sm:$0x1] %vm257_vm6, %v277_v13  ;;  %v263_v14 = vpop.permute.xlu0 %262 }
  0xdb   : > { %265 = vst.msk [vmem:[#allocation3 + $0x4] sm:$0x1] %vm257_vm6, %v263_v14 }
  0xdc   : > { %v354_v16 = vpop.permute.xlu2 %353 }
  0xdd   : > { %356 = vst.msk [vmem:[#allocation3 + $0x11] sm:$0x1] %vm257_vm6, %v354_v16 }
  0xe1   : > { %v305_v17 = vpop.permute.xlu1 %304 }
  0xe2   : > { %v2303_v18 = vld [vmem:[#allocation3] sm:$0xff]  ;;  %307 = vst.msk [vmem:[#allocation3 + $0xa] sm:$0x1] %vm257_vm6, %v305_v17  ;;  %v298_v19 = vpop.permute.xlu0 %297 }
  0xe3   : > { %480 = vst.msk [vmem:[#allocation4] sm:$0xff] %vm479_vm7, %v2303_v18  ;;  %546 = vrot.lane.b32.xlu1 %v2303_v18, %s2119_s17 }
  0xe4   : > { %300 = vst.msk [vmem:[#allocation3 + $0x9] sm:$0x1] %vm257_vm6, %v298_v19  ;;  %v375_v20 = vpop.permute.xlu2 %374 }
  0xe5   : > { %377 = vst.msk [vmem:[#allocation3 + $0x1c] sm:$0x1] %vm257_vm6, %v375_v20 }
  0xe9   : > { %v326_v21 = vpop.permute.xlu1 %325 }
  0xea   : > { %328 = vst.msk [vmem:[#allocation3 + $0xd] sm:$0x1] %vm257_vm6, %v326_v21  ;;  %v319_v22 = vpop.permute.xlu0 %318  ;;  %v485_v61 = vld [vmem:[#allocation4] sm:$0xff] }
  0xeb   : > { %321 = vst.msk [vmem:[#allocation3 + $0xc] sm:$0x1] %vm257_vm6, %v319_v22  ;;  %620 = vrot.lane.b32.xlu1 %v2303_v18, %s2120_s18  ;;  %v488_v22 = vmul.f32 %v487_v10, %v485_v61 }
  0xec   : > { %v396_v23 = vpop.permute.xlu2 %395 }
  0xed   : > { %398 = vst.msk [vmem:[#allocation3 + $0x1f] sm:$0x1] %vm257_vm6, %v396_v23 }
  0xf1   : > { %v347_v24 = vpop.permute.xlu1 %346 }
  0xf2   : > { %349 = vst.msk [vmem:[#allocation3 + $0x10] sm:$0x1] %vm257_vm6, %v347_v24  ;;  %v340_v25 = vpop.permute.xlu0 %339 }
  0xf3   : > { %342 = vst.msk [vmem:[#allocation3 + $0xf] sm:$0x1] %vm257_vm6, %v340_v25  ;;  %v593_v25 = vstv %s2417_s20  ;;  %s2533_s20 = sld [smem:[#allocation10 + $0x5]] }
  0xf4   : > { %v417_v26 = vpop.permute.xlu2 %416 }
  0xf5   : > { %419 = vst.msk [vmem:[#allocation3 + $0x22] sm:$0x1] %vm257_vm6, %v417_v26 }
  0xf9   : > { %v368_v27 = vpop.permute.xlu1 %367 }
  0xfa   : > { %v477_v28 = vld [vmem:[#allocation3 + $0x8] sm:$0xff]  ;;  %370 = vst.msk [vmem:[#allocation3 + $0x1b] sm:$0x1] %vm257_vm6, %v368_v27  ;;  %v361_v29 = vpop.permute.xlu0 %360  ;;  %v635_v27 = vstv %s2427_s4  ;;  %s2541_s4 = sld [smem:[#allocation10 + $0x2b]] }
  0xfb   : > { %481 = vst.msk [vmem:[#allocation4 + $0x8] sm:$0xff] %vm479_vm7, %v477_v28  ;;  %548 = vrot.lane.b32.xlu2 %v477_v28, %s2119_s17 }
  0xfc   : > { %363 = vst.msk [vmem:[#allocation3 + $0x12] sm:$0x1] %vm257_vm6, %v361_v29  ;;  %v438_v30 = vpop.permute.xlu2 %437 }
  0xfd   : > { %440 = vst.msk [vmem:[#allocation3 + $0x25] sm:$0x1] %vm257_vm6, %v438_v30 }
 0x101   : > { %v389_v31 = vpop.permute.xlu1 %388 }
 0x102   : > { %391 = vst.msk [vmem:[#allocation3 + $0x1e] sm:$0x1] %vm257_vm6, %v389_v31  ;;  %v382_v32 = vpop.permute.xlu0 %381  ;;  %v2383_v57 = vld [vmem:[#allocation4 + $0x1] sm:$0xff] }
 0x103   : > { %384 = vst.msk [vmem:[#allocation3 + $0x1d] sm:$0x1] %vm257_vm6, %v382_v32  ;;  %622 = vrot.lane.b32.xlu2 %v477_v28, %s2120_s18  ;;  %v478_v33 = vld [vmem:[#allocation3 + $0x10] sm:$0x3f]  ;;  %v2394_v63 = vld [vmem:[#allocation4 + $0x6] sm:$0xff] }
 0x104   : > { %v690_v34 = vld [vmem:[#allocation3 + $0x10] sm:$0x3f]  ;;  %483 = vst.msk [vmem:[#allocation4 + $0x10] sm:$0x3f] %vm482_vm8, %v478_v33  ;;  %v459_v36 = vpop.permute.xlu2 %458  ;;  %v486_v0 = vld [vmem:[#allocation4 + $0x8] sm:$0xff] }
 0x105   : > { %v542_v35 = vld [vmem:[#allocation3 + $0x10] sm:$0x3f]  ;;  %698 = vrot.lane.b32.xlu1 %v690_v34, %s2121_s19  ;;  %461 = vst.msk [vmem:[#allocation3 + $0x28] sm:$0x1] %vm257_vm6, %v459_v36 }
 0x106   : > { %550 = vrot.lane.b32.xlu0 %v542_v35, %s2119_s17  ;;  %v764_v39 = vld [vmem:[#allocation3 + $0x10] sm:$0x3f] }
 0x107   : > { %v616_v40 = vld [vmem:[#allocation3 + $0x10] sm:$0x3f] }
 0x108   : > { %v838_v43 = vld [vmem:[#allocation3 + $0x10] sm:$0x3f] }
 0x109   : > { %v410_v37 = vpop.permute.xlu1 %409  ;;  %v912_v46 = vld [vmem:[#allocation3 + $0x10] sm:$0x3f] }
 0x10a   : > { %412 = vst.msk [vmem:[#allocation3 + $0x21] sm:$0x1] %vm257_vm6, %v410_v37  ;;  %v403_v38 = vpop.permute.xlu0 %402  ;;  %v2355_v49 = vld [vmem:[#allocation3 + $0x18] sm:$0xff] }
 0x10b   : > { %405 = vst.msk [vmem:[#allocation3 + $0x20] sm:$0x1] %vm257_vm6, %v403_v38  ;;  %694 = vrot.lane.b32.xlu2 %v2303_v18, %s2121_s19  ;;  %v2385_v58 = vld [vmem:[#allocation4 + $0x2] sm:$0xff]  ;;  %v2400_v2 = vld [vmem:[#allocation4 + $0xa] sm:$0xff] }
 0x10c   : > { %v2387_v59 = vld [vmem:[#allocation4 + $0x3] sm:$0xff]  ;;  %v2402_v3 = vld [vmem:[#allocation4 + $0xb] sm:$0xff] }
 0x10d   : > { %772 = vrot.lane.b32.xlu1 %v764_v39, %s2122_s22  ;;  %v517_v60 = vld [vmem:[#allocation4 + $0x4] sm:$0xff]  ;;  %v518_v6 = vld [vmem:[#allocation4 + $0xc] sm:$0xff] }
 0x10e   : > { %624 = vrot.lane.b32.xlu0 %v616_v40, %s2120_s18  ;;  %v2392_v62 = vld [vmem:[#allocation4 + $0x5] sm:$0xff]  ;;  %v2408_v7 = vld [vmem:[#allocation4 + $0xd] sm:$0xff]  ;;  %v520_v17 = vmul.f32 %v519_v9, %v517_v60 }
 0x10f   : > { %v2398_v1 = vld [vmem:[#allocation4 + $0x9] sm:$0xff] }
 0x110   : > { %v2410_v8 = vld [vmem:[#allocation4 + $0xe] sm:$0xff]  ;;  %v522_v24 = vadd.f32 %v520_v17, %v488_v22 }
 0x111   : > { %v431_v41 = vpop.permute.xlu1 %430 }
 0x112   : > { %433 = vst.msk [vmem:[#allocation3 + $0x24] sm:$0x1] %vm257_vm6, %v431_v41  ;;  %v424_v42 = vpop.permute.xlu0 %423 }
 0x113   : > { %426 = vst.msk [vmem:[#allocation3 + $0x23] sm:$0x1] %vm257_vm6, %v424_v42  ;;  %768 = vrot.lane.b32.xlu2 %v2303_v18, %s2122_s22 }
 0x115   : > { %846 = vrot.lane.b32.xlu1 %v838_v43, %s2123_s23  ;;  %v521_v43 = vmul.f32 %v519_v9, %v518_v6 }
 0x116   : > { %696 = vrot.lane.b32.xlu0 %v477_v28, %s2121_s19 }
 0x119   : > { %v452_v44 = vpop.permute.xlu1 %451 }
 0x11a   : > { %454 = vst.msk [vmem:[#allocation3 + $0x27] sm:$0x1] %vm257_vm6, %v452_v44  ;;  %v445_v45 = vpop.permute.xlu0 %444  ;;  %v489_v44 = vmul.f32 %v487_v10, %v486_v0 }
 0x11b   : > { %447 = vst.msk [vmem:[#allocation3 + $0x26] sm:$0x1] %vm257_vm6, %v445_v45  ;;  %842 = vrot.lane.b32.xlu2 %v2303_v18, %s2123_s23 }
 0x11d   : > { %920 = vrot.lane.b32.xlu1 %v912_v46, %s2124_s24  ;;  %v523_v46 = vadd.f32 %v521_v43, %v489_v44 }
 0x11e   : > { %770 = vrot.lane.b32.xlu0 %v477_v28, %s2122_s22 }
 0x121   : > { %v473_v47 = vpop.permute.xlu1 %472 }
 0x122   : > { %475 = vst.msk [vmem:[#allocation3 + $0x2a] sm:$0x1] %vm257_vm6, %v473_v47  ;;  %v466_v48 = vpop.permute.xlu0 %465  ;;  %v2364_v52 = vld [vmem:[#allocation3 + $0x20] sm:$0xff] }
 0x123   : > { %468 = vst.msk [vmem:[#allocation3 + $0x29] sm:$0x1] %vm257_vm6, %v466_v48  ;;  %916 = vrot.lane.b32.xlu2 %v2303_v18, %s2124_s24 }
 0x126   : > { %844 = vrot.lane.b32.xlu0 %v477_v28, %s2123_s23 }
 0x12a   : > { %v1048_v50 = vld [vmem:[#allocation3 + $0x28] sm:$0x3f] }
 0x12b   : > { %1052 = vrot.lane.b32.xlu2 %v2355_v49, %s2119_s17  ;;  %1056 = vrot.lane.b32.xlu1 %v1048_v50, %s2119_s17  ;;  %v1122_v51 = vld [vmem:[#allocation3 + $0x28] sm:$0x3f] }
 0x12c   : > { %v1196_v53 = vld [vmem:[#allocation3 + $0x28] sm:$0x3f] }
 0x12d   : > { %v1270_v54 = vld [vmem:[#allocation3 + $0x28] sm:$0x3f] }
 0x12e   : > { %918 = vrot.lane.b32.xlu0 %v477_v28, %s2124_s24  ;;  %v1344_v55 = vld [vmem:[#allocation3 + $0x28] sm:$0x3f] }
 0x12f   : > { %v1418_v56 = vld [vmem:[#allocation3 + $0x28] sm:$0x3f] }
 0x133   : > { %1126 = vrot.lane.b32.xlu2 %v2355_v49, %s2120_s18  ;;  %1130 = vrot.lane.b32.xlu1 %v1122_v51, %s2120_s18 }
 0x136   : > { %1054 = vrot.lane.b32.xlu0 %v2364_v52, %s2119_s17  ;;  %s2507_s17 = sld [smem:[#allocation10 + $0xe]] }
 0x13b   : > { %1200 = vrot.lane.b32.xlu2 %v2355_v49, %s2121_s19  ;;  %1204 = vrot.lane.b32.xlu1 %v1196_v53, %s2121_s19 }
 0x13e   : > { %1128 = vrot.lane.b32.xlu0 %v2364_v52, %s2120_s18  ;;  %s2510_s18 = sld [smem:[#allocation10 + $0x15]] }
 0x143   : > { %1274 = vrot.lane.b32.xlu2 %v2355_v49, %s2122_s22  ;;  %1278 = vrot.lane.b32.xlu1 %v1270_v54, %s2122_s22 }
 0x146   : > { %1202 = vrot.lane.b32.xlu0 %v2364_v52, %s2121_s19  ;;  %s2513_s19 = sld [smem:[#allocation10 + $0x23]] }
 0x14b   : > { %1348 = vrot.lane.b32.xlu2 %v2355_v49, %s2123_s23  ;;  %1352 = vrot.lane.b32.xlu1 %v1344_v55, %s2123_s23 }
 0x14e   : > { %1276 = vrot.lane.b32.xlu0 %v2364_v52, %s2122_s22  ;;  %s2516_s22 = sld [smem:[#allocation10 + $0x2a]] }
 0x153   : > { %1422 = vrot.lane.b32.xlu2 %v2355_v49, %s2124_s24  ;;  %1426 = vrot.lane.b32.xlu1 %v1418_v56, %s2124_s24 }
 0x154   : > { %v535_v15 = vstv %s2516_s22  ;;  %s2630_s22 = sld [smem:[#allocation10 + $0x2e]] }
 0x155   : > { %v547_v4 = vpop.permute.xlu1 %546  ;;  %v549_v5 = vpop.permute.xlu2 %548 }
 0x156   : > { %1350 = vrot.lane.b32.xlu0 %v2364_v52, %s2123_s23  ;;  %555 = vst.msk [vmem:[#allocation4] sm:$0xff] %vm479_vm7, %v547_v4  ;;  %s2518_s23 = sld [smem:[#allocation10 + $0x8]] }
 0x157   : > { %556 = vst.msk [vmem:[#allocation4 + $0x8] sm:$0xff] %vm479_vm7, %v549_v5 }
 0x15d   : > { %v559_v12 = vld [vmem:[#allocation4] sm:$0xff]  ;;  %v621_v16 = vpop.permute.xlu1 %620  ;;  %v623_v39 = vpop.permute.xlu2 %622 }
 0x15e   : > { %1424 = vrot.lane.b32.xlu0 %v2364_v52, %s2124_s24  ;;  %v2423_v13 = vld [vmem:[#allocation4 + $0x1] sm:$0xff]  ;;  %v562_v23 = vmul.f32 %v561_v11, %v559_v12  ;;  %s2521_s24 = sld [smem:[#allocation10 + $0xf]] }
 0x15f   : > { %v2425_v14 = vld [vmem:[#allocation4 + $0x2] sm:$0xff] }
 0x160   : > { %v2429_v18 = vld [vmem:[#allocation4 + $0x3] sm:$0xff]  ;;  %v564_v26 = vadd.f32 %v562_v23, %v522_v24  ;;  %v709_v24 = vstv %s2457_s6  ;;  %s2553_s6 = sld [smem:[#allocation10 + $0x10]] }
 0x161   : > { %v591_v19 = vld [vmem:[#allocation4 + $0x4] sm:$0xff] }
 0x162   : > { %v2431_v20 = vld [vmem:[#allocation4 + $0x5] sm:$0xff]  ;;  %v594_v28 = vmul.f32 %v593_v25, %v591_v19  ;;  %v667_v19 = vstv %s2451_s5  ;;  %s2545_s5 = sld [smem:[#allocation10 + $0x9]] }
 0x163   : > { %v2433_v21 = vld [vmem:[#allocation4 + $0x6] sm:$0xff] }
 0x164   : > { %629 = vst.msk [vmem:[#allocation4] sm:$0xff] %vm479_vm7, %v621_v16  ;;  %v596_v30 = vadd.f32 %v594_v28, %v564_v26  ;;  %v560_v34 = vld [vmem:[#allocation4 + $0x8] sm:$0xff] }
 0x165   : > { %v563_v45 = vmul.f32 %v561_v11, %v560_v34  ;;  %v695_v0 = vpop.permute.xlu2 %694 }
 0x167   : > { %v565_v48 = vadd.f32 %v563_v45, %v523_v46 }
 0x16b   : > { %v633_v29 = vld [vmem:[#allocation4] sm:$0xff] }
 0x16c   : > { %v636_v31 = vmul.f32 %v635_v27, %v633_v29 }
 0x16d   : > { %v769_v46 = vpop.permute.xlu2 %768 }
 0x16e   : > { %v638_v32 = vadd.f32 %v636_v31, %v596_v30 }
 0x177   : > { %v699_v17 = vpop.permute.xlu1 %698 }
 0x178   : > { %v551_v33 = vpop.permute.xlu0 %550 }
 0x179   : > { %557 = vst.msk [vmem:[#allocation4 + $0x10] sm:$0x3f] %vm482_vm8, %v551_v33 }
 0x180   : > { %v2439_v35 = vld [vmem:[#allocation4 + $0x9] sm:$0xff]  ;;  %v625_v38 = vpop.permute.xlu0 %624 }
 0x181   : > { %v2441_v36 = vld [vmem:[#allocation4 + $0xa] sm:$0xff] }
 0x182   : > { %v2443_v37 = vld [vmem:[#allocation4 + $0xb] sm:$0xff] }
 0x183   : > { %v592_v40 = vld [vmem:[#allocation4 + $0xc] sm:$0xff] }
 0x184   : > { %v2445_v41 = vld [vmem:[#allocation4 + $0xd] sm:$0xff]  ;;  %v595_v47 = vmul.f32 %v593_v25, %v592_v40 }
 0x185   : > { %v2447_v42 = vld [vmem:[#allocation4 + $0xe] sm:$0xff] }
 0x186   : > { %630 = vst.msk [vmem:[#allocation4 + $0x8] sm:$0xff] %vm479_vm7, %v623_v39  ;;  %v597_v54 = vadd.f32 %v595_v47, %v565_v48 }
 0x187   : > { %631 = vst.msk [vmem:[#allocation4 + $0x10] sm:$0x3f] %vm482_vm8, %v625_v38 }
 0x188   : > { %v697_v16 = vpop.permute.xlu0 %696 }
 0x18d   : > { %v634_v50 = vld [vmem:[#allocation4 + $0x8] sm:$0xff] }
 0x18e   : > { %v2453_v51 = vld [vmem:[#allocation4 + $0x1] sm:$0xff]  ;;  %v637_v55 = vmul.f32 %v635_v27, %v634_v50  ;;  %v2465_v5 = vld [vmem:[#allocation4 + $0x9] sm:$0xff] }
 0x18f   : > { %v2455_v53 = vld [vmem:[#allocation4 + $0x2] sm:$0xff]  ;;  %v2467_v6 = vld [vmem:[#allocation4 + $0xa] sm:$0xff] }
 0x190   : > { %v2459_v56 = vld [vmem:[#allocation4 + $0x3] sm:$0xff]  ;;  %v639_v9 = vadd.f32 %v637_v55, %v597_v54  ;;  %v2470_v10 = vld [vmem:[#allocation4 + $0xb] sm:$0xff]  ;;  %v771_v55 = vpop.permute.xlu0 %770 }
 0x191   : > { %v665_v60 = vld [vmem:[#allocation4 + $0x4] sm:$0xff]  ;;  %v666_v11 = vld [vmem:[#allocation4 + $0xc] sm:$0xff] }
 0x192   : > { %v2461_v61 = vld [vmem:[#allocation4 + $0x5] sm:$0xff]  ;;  %v2472_v12 = vld [vmem:[#allocation4 + $0xd] sm:$0xff]  ;;  %v668_v23 = vmul.f32 %v667_v19, %v665_v60  ;;  %v669_v28 = vmul.f32 %v667_v19, %v666_v11  ;;  %v773_v60 = vpop.permute.xlu1 %772  ;;  %v783_v11 = vstv %s2486_s8  ;;  %s2561_s8 = sld [smem:[#allocation10 + $0x25]] }
 0x193   : > { %v2463_v4 = vld [vmem:[#allocation4 + $0x6] sm:$0xff]  ;;  %v2475_v22 = vld [vmem:[#allocation4 + $0xe] sm:$0xff] }
 0x194   : > { %703 = vst.msk [vmem:[#allocation4] sm:$0xff] %vm479_vm7, %v695_v0  ;;  %v670_v26 = vadd.f32 %v668_v23, %v638_v32  ;;  %v671_v34 = vadd.f32 %v669_v28, %v639_v9  ;;  %v741_v9 = vstv %s2480_s7  ;;  %s2558_s7 = sld [smem:[#allocation10 + $0x17]] }
 0x195   : > { %705 = vst.msk [vmem:[#allocation4 + $0x10] sm:$0x3f] %vm482_vm8, %v699_v17 }
 0x196   : > { %704 = vst.msk [vmem:[#allocation4 + $0x8] sm:$0xff] %vm479_vm7, %v697_v16 }
 0x19b   : > { %v707_v25 = vld [vmem:[#allocation4] sm:$0xff] }
 0x19c   : > { %v710_v27 = vmul.f32 %v709_v24, %v707_v25 }
 0x19d   : > { %v708_v30 = vld [vmem:[#allocation4 + $0x8] sm:$0xff] }
 0x19e   : > { %v712_v29 = vadd.f32 %v710_v27, %v670_v26  ;;  %v2482_v31 = vld [vmem:[#allocation4 + $0x1] sm:$0xff]  ;;  %v2484_v33 = vld [vmem:[#allocation4 + $0x9] sm:$0xff]  ;;  %v711_v38 = vmul.f32 %v709_v24, %v708_v30 }
 0x19f   : > { %v2488_v39 = vld [vmem:[#allocation4 + $0x2] sm:$0xff]  ;;  %v2490_v40 = vld [vmem:[#allocation4 + $0xa] sm:$0xff] }
 0x1a0   : > { %v2492_v43 = vld [vmem:[#allocation4 + $0x3] sm:$0xff]  ;;  %v2494_v32 = vld [vmem:[#allocation4 + $0xb] sm:$0xff]  ;;  %v713_v47 = vadd.f32 %v711_v38, %v671_v34 }
 0x1a1   : > { %v739_v44 = vld [vmem:[#allocation4 + $0x4] sm:$0xff]  ;;  %v740_v45 = vld [vmem:[#allocation4 + $0xc] sm:$0xff] }
 0x1a2   : > { %v2496_v48 = vld [vmem:[#allocation4 + $0x5] sm:$0xff]  ;;  %v2498_v50 = vld [vmem:[#allocation4 + $0xd] sm:$0xff]  ;;  %v742_v16 = vmul.f32 %v741_v9, %v739_v44  ;;  %v743_v19 = vmul.f32 %v741_v9, %v740_v45 }
 0x1a3   : > { %v2500_v54 = vld [vmem:[#allocation4 + $0x6] sm:$0xff]  ;;  %v2504_v0 = vld [vmem:[#allocation4 + $0xe] sm:$0xff] }
 0x1a4   : > { %3547 = vst [vmem:[#allocation22_spill] sm:$0xff] %v2500_v54  ;;  %v744_v23 = vadd.f32 %v742_v16, %v712_v29  ;;  %v745_v28 = vadd.f32 %v743_v19, %v713_v47  ;;  %v847_v19 = vpop.permute.xlu1 %846  ;;  %v511_v54 = vstv %s2510_s18  ;;  %s2609_s18 = sld [smem:[#allocation10 + $0x19]] }
 0x1a5   : > { %3548 = vst [vmem:[#allocation23_spill] sm:$0xff] %v2504_v0 }
 0x1a6   : > { %777 = vst.msk [vmem:[#allocation4] sm:$0xff] %vm479_vm7, %v769_v46 }
 0x1a7   : > { %779 = vst.msk [vmem:[#allocation4 + $0x10] sm:$0x3f] %vm482_vm8, %v773_v60  ;;  %v843_v60 = vpop.permute.xlu2 %842 }
 0x1a8   : > { %778 = vst.msk [vmem:[#allocation4 + $0x8] sm:$0xff] %vm479_vm7, %v771_v55 }
 0x1ad   : > { %v781_v17 = vld [vmem:[#allocation4] sm:$0xff] }
 0x1ae   : > { %v784_v24 = vmul.f32 %v783_v11, %v781_v17  ;;  %v845_v17 = vpop.permute.xlu0 %844 }
 0x1af   : > { %v782_v25 = vld [vmem:[#allocation4 + $0x8] sm:$0xff] }
 0x1b0   : > { %v2529_v26 = vld [vmem:[#allocation4 + $0x1] sm:$0xff]  ;;  %v2531_v27 = vld [vmem:[#allocation4 + $0x9] sm:$0xff]  ;;  %v786_v30 = vadd.f32 %v784_v24, %v744_v23  ;;  %v785_v34 = vmul.f32 %v783_v11, %v782_v25  ;;  %v815_v24 = vstv %s2525_s30  ;;  %v495_v25 = vstv %s2502_s14  ;;  %s2588_s14 = sld [smem:[#allocation10 + $0xb]] }
 0x1b1   : > { %3549 = vst [vmem:[#allocation24_spill] sm:$0xff] %v2529_v26  ;;  %v2535_v38 = vld [vmem:[#allocation4 + $0x2] sm:$0xff]  ;;  %v2537_v44 = vld [vmem:[#allocation4 + $0xa] sm:$0xff]  ;;  %s2655_s30 = sld [smem:[#allocation10 + $0x21]] }
 0x1b2   : > { %3550 = vst [vmem:[#allocation25_spill] sm:$0xff] %v2531_v27  ;;  %v2539_v29 = vld [vmem:[#allocation4 + $0x3] sm:$0xff]  ;;  %v2543_v45 = vld [vmem:[#allocation4 + $0xb] sm:$0xff]  ;;  %v787_v47 = vadd.f32 %v785_v34, %v745_v28  ;;  %v857_v28 = vstv %s2533_s20  ;;  %v503_v34 = vstv %s2507_s17  ;;  %v536_v27 = vmul.f32 %v535_v15, %v2394_v63  ;;  %s2595_s17 = sld [smem:[#allocation10 + $0x12]] }
 0x1b3   : > { %3551 = vst [vmem:[#allocation26_spill] sm:$0xff] %v2535_v38  ;;  %v813_v46 = vld [vmem:[#allocation4 + $0x4] sm:$0xff]  ;;  %v814_v55 = vld [vmem:[#allocation4 + $0xc] sm:$0xff]  ;;  %s2663_s20 = sld [smem:[#allocation10 + $0x2f]] }
 0x1b4   : > { %3552 = vst [vmem:[#allocation27_spill] sm:$0xff] %v2537_v44  ;;  %v2547_v9 = vld [vmem:[#allocation4 + $0x5] sm:$0xff]  ;;  %v2549_v11 = vld [vmem:[#allocation4 + $0xd] sm:$0xff]  ;;  %v504_v44 = vmul.f32 %v503_v34, %v2385_v58 }
 0x1b5   : > { %3553 = vst [vmem:[#allocation28_spill] sm:$0xff] %v2539_v29  ;;  %v2551_v16 = vld [vmem:[#allocation4 + $0x6] sm:$0xff]  ;;  %v2555_v23 = vld [vmem:[#allocation4 + $0xe] sm:$0xff]  ;;  %v496_v29 = vmul.f32 %v495_v25, %v2383_v57 }
 0x1b6   : > { %3554 = vst [vmem:[#allocation29_spill] sm:$0xff] %v2543_v45 }
 0x1b7   : > { %3555 = vst [vmem:[#allocation30_spill] sm:$0xff] %v2547_v9 }
 0x1b8   : > { %3556 = vst [vmem:[#allocation31_spill] sm:$0xff] %v2549_v11  ;;  %v817_v11 = vmul.f32 %v815_v24, %v814_v55 }
 0x1b9   : > { %3557 = vst [vmem:[#allocation32_spill] sm:$0xff] %v2551_v16  ;;  %v577_v16 = vstv %s2521_s24  ;;  %s2644_s24 = sld [smem:[#allocation10 + $0x13]] }
 0x1ba   : > { %3558 = vst [vmem:[#allocation33_spill] sm:$0xff] %v2555_v23  ;;  %v569_v23 = vstv %s2518_s23  ;;  %s2639_s23 = sld [smem:[#allocation10 + $0xc]] }
 0x1bb   : > { %851 = vst.msk [vmem:[#allocation4] sm:$0xff] %vm479_vm7, %v843_v60  ;;  %v527_v60 = vstv %s2513_s19  ;;  %s2620_s19 = sld [smem:[#allocation10 + $0x27]] }
 0x1bc   : > { %853 = vst.msk [vmem:[#allocation4 + $0x10] sm:$0x3f] %vm482_vm8, %v847_v19  ;;  %v816_v19 = vmul.f32 %v815_v24, %v813_v46  ;;  %v528_v38 = vmul.f32 %v527_v60, %v2392_v62  ;;  %v497_v24 = vmul.f32 %v495_v25, %v2398_v1  ;;  %v537_v1 = vmul.f32 %v535_v15, %v2410_v8 }
 0x1bd   : > { %852 = vst.msk [vmem:[#allocation4 + $0x8] sm:$0xff] %vm479_vm7, %v845_v17  ;;  %v601_v8 = vstv %s2527_s15  ;;  %s2659_s15 = sld [smem:[#allocation10 + $0x28]] }
 0x1be   : > { %v818_v9 = vadd.f32 %v816_v19, %v786_v30  ;;  %v819_v30 = vadd.f32 %v817_v11, %v787_v47  ;;  %v570_v19 = vmul.f32 %v569_v23, %v2423_v13  ;;  %v529_v11 = vmul.f32 %v527_v60, %v2408_v7  ;;  %v917_v13 = vpop.permute.xlu2 %916 }
 0x1bf   : > { %v609_v60 = vstv %s2541_s4  ;;  %s2668_s4 = sld [smem:[#allocation10 + $0x6]] }
 0x1c2   : > { %v855_v17 = vld [vmem:[#allocation4] sm:$0xff] }
 0x1c3   : > { %v858_v45 = vmul.f32 %v857_v28, %v855_v17  ;;  %v578_v17 = vmul.f32 %v577_v16, %v2425_v14 }
 0x1c4   : > { %v856_v46 = vld [vmem:[#allocation4 + $0x8] sm:$0xff] }
 0x1c5   : > { %v2590_v26 = vld [vmem:[#allocation4 + $0x1] sm:$0xff]  ;;  %v2592_v0 = vld [vmem:[#allocation4 + $0x9] sm:$0xff]  ;;  %v2597_v55 = vadd.f32 %v858_v45, %v818_v9  ;;  %v859_v57 = vmul.f32 %v857_v28, %v856_v46  ;;  %v505_v9 = vmul.f32 %v503_v34, %v2400_v2  ;;  %v538_v2 = vadd.f32 %v536_v27, %v504_v44  ;;  %v921_v34 = vpop.permute.xlu1 %920 }
 0x1c6   : > { %3559 = vst [vmem:[#allocation34_spill] sm:$0xff] %v2590_v26  ;;  %v2599_v58 = vld [vmem:[#allocation4 + $0x2] sm:$0xff]  ;;  %v2601_v62 = vld [vmem:[#allocation4 + $0xa] sm:$0xff]  ;;  %v512_v27 = vmul.f32 %v511_v54, %v2387_v59  ;;  %v602_v59 = vmul.f32 %v601_v8, %v2431_v20  ;;  %v717_v20 = vstv %s2567_s0  ;;  %s2676_s0 = sld [smem:[#allocation10 + $0xd]] }
 0x1c7   : > { %3560 = vst [vmem:[#allocation35_spill] sm:$0xff] %v2592_v0  ;;  %v2603_v63 = vld [vmem:[#allocation4 + $0x3] sm:$0xff]  ;;  %v585_v0 = vstv %s2523_s28  ;;  %v2611_v26 = vld [vmem:[#allocation4 + $0xb] sm:$0xff]  ;;  %v2622_v14 = vadd.f32 %v859_v57, %v819_v30  ;;  %v571_v30 = vmul.f32 %v569_v23, %v2439_v35  ;;  %v539_v35 = vadd.f32 %v537_v1, %v505_v9  ;;  %s2649_s28 = sld [smem:[#allocation10 + $0x1a]] }
 0x1c8   : > { %3561 = vst [vmem:[#allocation36_spill] sm:$0xff] %v2597_v55  ;;  %v2613_v45 = vld [vmem:[#allocation4 + $0x4] sm:$0xff]  ;;  %v2615_v47 = vld [vmem:[#allocation4 + $0xc] sm:$0xff]  ;;  %v919_v55 = vpop.permute.xlu0 %918  ;;  %v586_v15 = vmul.f32 %v585_v0, %v2429_v18  ;;  %v531_v18 = vadd.f32 %v529_v11, %v497_v24  ;;  %v643_v23 = vstv %s2545_s5  ;;  %v579_v57 = vmul.f32 %v577_v16, %v2441_v36  ;;  %s2681_s5 = sld [smem:[#allocation10 + $0x14]] }
 0x1c9   : > { %3562 = vst [vmem:[#allocation37_spill] sm:$0xff] %v2615_v47  ;;  %v2624_v25 = vld [vmem:[#allocation4 + $0x5] sm:$0xff]  ;;  %v2626_v28 = vld [vmem:[#allocation4 + $0xd] sm:$0xff]  ;;  %v530_v47 = vadd.f32 %v528_v38, %v496_v29  ;;  %v513_v38 = vmul.f32 %v511_v54, %v2402_v3  ;;  %v580_v29 = vadd.f32 %v578_v17, %v538_v2  ;;  %v610_v3 = vmul.f32 %v609_v60, %v2433_v21 }
 0x1ca   : > { %v2628_v46 = vld [vmem:[#allocation4 + $0x6] sm:$0xff]  ;;  %v2632_v7 = vld [vmem:[#allocation4 + $0xe] sm:$0xff]  ;;  %v651_v54 = vstv %s2553_s6  ;;  %v588_v17 = vadd.f32 %v586_v15, %v512_v27  ;;  %v573_v24 = vadd.f32 %v571_v30, %v531_v18  ;;  %v587_v9 = vmul.f32 %v585_v0, %v2443_v37  ;;  %s2701_s6 = sld [smem:[#allocation10 + $0x22]] }
 0x1cb   : > { %925 = vst.msk [vmem:[#allocation4] sm:$0xff] %vm479_vm7, %v917_v13  ;;  %v572_v44 = vadd.f32 %v570_v19, %v530_v47  ;;  %v659_v19 = vstv %s2558_s7  ;;  %v675_v47 = vstv %s2561_s8  ;;  %v612_v16 = vadd.f32 %v610_v3, %v580_v29  ;;  %s2712_s7 = sld [smem:[#allocation10 + $0x29]] }
 0x1cc   : > { %927 = vst.msk [vmem:[#allocation4 + $0x10] sm:$0x3f] %vm482_vm8, %v921_v34  ;;  %v581_v21 = vadd.f32 %v579_v57, %v539_v35  ;;  %v603_v11 = vmul.f32 %v601_v8, %v2445_v41  ;;  %v644_v1 = vmul.f32 %v643_v23, %v2453_v51  ;;  %v645_v13 = vmul.f32 %v643_v23, %v2465_v5  ;;  %s2723_s8 = sld [smem:[#allocation10 + $0x30]] }
 0x1cd   : > { %926 = vst.msk [vmem:[#allocation4 + $0x8] sm:$0xff] %vm479_vm7, %v919_v55  ;;  %v683_v55 = vstv %s2564_s29  ;;  %v604_v36 = vadd.f32 %v602_v59, %v572_v44  ;;  %v652_v2 = vmul.f32 %v651_v54, %v2455_v53  ;;  %v725_v34 = vstv %s2570_s1  ;;  %s2692_s1 = sld [smem:[#allocation10 + $0x1b]] }
 0x1ce   : > { %v733_v15 = vstv %s2576_s25  ;;  %v749_v37 = vstv %s2579_s11  ;;  %v605_v30 = vadd.f32 %v603_v11, %v573_v24  ;;  %v611_v41 = vmul.f32 %v609_v60, %v2447_v42  ;;  %s2749_s29 = sld [smem:[#allocation10 + $0x3f]] }
 0x1cf   : > { %v653_v51 = vmul.f32 %v651_v54, %v2467_v6  ;;  %v757_v8 = vstv %s2582_s10  ;;  %v589_v44 = vadd.f32 %v587_v9, %v513_v38  ;;  %v660_v29 = vmul.f32 %v659_v19, %v2459_v56  ;;  %s2793_s10 = sld [smem:[#allocation10 + $0x54]] }
 0x1d0   : > { %v791_v18 = vstv %s2588_s14  ;;  %v613_v23 = vadd.f32 %v611_v41, %v581_v21  ;;  %v646_v57 = vadd.f32 %v644_v1, %v604_v36  ;;  %v647_v59 = vadd.f32 %v645_v13, %v605_v30  ;;  %s2810_s11 = sld [smem:[#allocation10 + $0x5b]] }
 0x1d1   : > { %v807_v3 = vstv %s2609_s18  ;;  %v654_v24 = vadd.f32 %v652_v2, %v612_v16  ;;  %v676_v9 = vmul.f32 %v675_v47, %v2461_v61  ;;  %v661_v11 = vmul.f32 %v659_v19, %v2470_v10  ;;  %v986_v19 = vld [vmem:[#allocation3 + $0x28] sm:$0x3f]  ;;  %s2822_s25 = sld [smem:[#allocation10 + $0x32]] }
 0x1d2   : > { %v2674_v0 = vld [vmem:[#allocation4] sm:$0xff]  ;;  %v823_v35 = vstv %s2620_s19  ;;  %v655_v13 = vadd.f32 %v653_v51, %v613_v23  ;;  %v677_v30 = vmul.f32 %v675_v47, %v2472_v12  ;;  %v718_v16 = vmul.f32 %v717_v20, %v2482_v31  ;;  %s2849_s14 = sld [smem:[#allocation10 + $0x39]] }
 0x1d3   : > { %v719_v61 = vmul.f32 %v717_v20, %v2484_v33  ;;  %v662_v2 = vadd.f32 %v660_v29, %v588_v17  ;;  %v684_v41 = vmul.f32 %v683_v55, %v2463_v4  ;;  %v726_v12 = vmul.f32 %v725_v34, %v2488_v39  ;;  %s2877_s18 = sld [smem:[#allocation10 + $0x47]] }
 0x1d4   : > { %v2683_v5 = vld [vmem:[#allocation4 + $0x8] sm:$0xff]  ;;  %v831_v47 = vstv %s2630_s22  ;;  %v678_v31 = vadd.f32 %v676_v9, %v646_v57  ;;  %v679_v33 = vadd.f32 %v677_v30, %v647_v59  ;;  %v727_v17 = vmul.f32 %v725_v34, %v2490_v40  ;;  %s2883_s19 = sld [smem:[#allocation10 + $0x4e]] }
 0x1d5   : > { %v2685_v53 = vld [vmem:[#allocation4 + $0x1] sm:$0xff]  ;;  %v2687_v27 = vld [vmem:[#allocation4 + $0x9] sm:$0xff]  ;;  %v686_v4 = vadd.f32 %v684_v41, %v654_v24  ;;  %v663_v39 = vadd.f32 %v661_v11, %v589_v44  ;;  %v865_v20 = vstv %s2639_s23  ;;  %v735_v34 = vmul.f32 %v733_v15, %v2494_v32  ;;  %s2887_s22 = sld [smem:[#allocation10 + $0x55]] }
 0x1d6   : > { %v2694_v42 = vld [vmem:[#allocation4 + $0x2] sm:$0xff]  ;;  %v2696_v6 = vld [vmem:[#allocation4 + $0xa] sm:$0xff]  ;;  %v720_v40 = vadd.f32 %v718_v16, %v678_v31  ;;  %v750_v57 = vmul.f32 %v749_v37, %v2496_v48  ;;  %v751_v59 = vmul.f32 %v749_v37, %v2498_v50  ;;  %v3563_v24 = vld [vmem:[#allocation22_spill] sm:$0xff]  ;;  %s2891_s23 = sld [smem:[#allocation10 + $0x5c]] }
 0x1d7   : > { %v2698_v60 = vld [vmem:[#allocation4 + $0x3] sm:$0xff]  ;;  %v2703_v38 = vld [vmem:[#allocation4 + $0xb] sm:$0xff]  ;;  %v728_v51 = vadd.f32 %v726_v12, %v686_v4  ;;  %v758_v9 = vmul.f32 %v757_v8, %v3563_v24  ;;  %v2775_v30 = vadd.f32 %v735_v34, %v663_v39 }
 0x1d8   : > { %v2705_v56 = vld [vmem:[#allocation4 + $0x4] sm:$0xff]  ;;  %v2707_v54 = vld [vmem:[#allocation4 + $0xc] sm:$0xff]  ;;  %v752_v16 = vadd.f32 %v750_v57, %v720_v40  ;;  %v3567_v40 = vld [vmem:[#allocation26_spill] sm:$0xff] }
 0x1d9   : > { %v2714_v36 = vld [vmem:[#allocation4 + $0x5] sm:$0xff]  ;;  %v2716_v21 = vld [vmem:[#allocation4 + $0xd] sm:$0xff]  ;;  %v760_v41 = vadd.f32 %v758_v9, %v728_v51 }
 0x1da   : > { %v2718_v1 = vld [vmem:[#allocation4 + $0x6] sm:$0xff]  ;;  %v2725_v10 = vld [vmem:[#allocation4 + $0xe] sm:$0xff] }
 0x1db   : > { %987 = vst.msk [vmem:[#allocation4] sm:$0xff] %vm479_vm7, %v2355_v49  ;;  %v685_v49 = vmul.f32 %v683_v55, %v2475_v22  ;;  %v721_v55 = vadd.f32 %v719_v61, %v679_v33  ;;  %v3565_v12 = vld [vmem:[#allocation24_spill] sm:$0xff]  ;;  %v3566_v33 = vld [vmem:[#allocation25_spill] sm:$0xff] }
 0x1dc   : > { %988 = vst.msk [vmem:[#allocation4 + $0x8] sm:$0xff] %vm479_vm7, %v2364_v52  ;;  %v734_v52 = vmul.f32 %v733_v15, %v2492_v43  ;;  %v792_v31 = vmul.f32 %v791_v18, %v3565_v12  ;;  %v3572_v32 = vld [vmem:[#allocation28_spill] sm:$0xff]  ;;  %v1055_v12 = vpop.permute.xlu0 %1054 }
 0x1dd   : > { %989 = vst.msk [vmem:[#allocation4 + $0x10] sm:$0x3f] %vm482_vm8, %v986_v19  ;;  %v687_v22 = vadd.f32 %v685_v49, %v655_v13  ;;  %v753_v61 = vadd.f32 %v751_v59, %v721_v55  ;;  %v3564_v19 = vld [vmem:[#allocation23_spill] sm:$0xff]  ;;  %v793_v49 = vmul.f32 %v791_v18, %v3566_v33  ;;  %v3568_v55 = vstv %s2595_s17  ;;  %v1057_v59 = vpop.permute.xlu1 %1056  ;;  %s2863_s17 = sld [smem:[#allocation10 + $0x40]] }
 0x1de   : > { %v2768_v15 = vadd.f32 %v734_v52, %v662_v2  ;;  %v759_v48 = vmul.f32 %v757_v8, %v3564_v19  ;;  %v800_v34 = vmul.f32 %v3568_v55, %v3567_v40  ;;  %v3569_v18 = vld [vmem:[#allocation27_spill] sm:$0xff]  ;;  %v3570_v51 = vmov %v3568_v55 }
 0x1df   : > { %v729_v23 = vadd.f32 %v727_v17, %v687_v22  ;;  %v801_v57 = vmul.f32 %v3570_v51, %v3569_v18  ;;  %v794_v40 = vadd.f32 %v792_v31, %v752_v16  ;;  %v808_v43 = vmul.f32 %v807_v3, %v3572_v32  ;;  %v3573_v17 = vld [vmem:[#allocation29_spill] sm:$0xff]  ;;  %v3575_v32 = vld [vmem:[#allocation31_spill] sm:$0xff]  ;;  %v3576_v31 = vld [vmem:[#allocation32_spill] sm:$0xff] }
 0x1e0   : > { %v802_v11 = vadd.f32 %v800_v34, %v760_v41  ;;  %v809_v44 = vmul.f32 %v807_v3, %v3573_v17  ;;  %v3577_v41 = vld [vmem:[#allocation34_spill] sm:$0xff]  ;;  %v3578_v34 = vld [vmem:[#allocation35_spill] sm:$0xff]  ;;  %v3579_v17 = vld [vmem:[#allocation33_spill] sm:$0xff] }
 0x1e1   : > { %v761_v22 = vadd.f32 %v759_v48, %v729_v23  ;;  %v1053_v23 = vpop.permute.xlu2 %1052  ;;  %v795_v48 = vadd.f32 %v793_v49, %v753_v61  ;;  %v825_v61 = vmul.f32 %v823_v35, %v3575_v32  ;;  %v832_v49 = vmul.f32 %v831_v47, %v3576_v31 }
 0x1e2   : > { %v2780_v50 = vld [vmem:[#allocation4] sm:$0xff]  ;;  %v867_v3 = vmul.f32 %v865_v20, %v3578_v34  ;;  %v3582_v32 = vstv %s2649_s28  ;;  %s2942_s28 = sld [smem:[#allocation10 + $0x3a]] }
 0x1e3   : > { %v2782_v37 = vld [vmem:[#allocation4 + $0x1] sm:$0xff]  ;;  %v803_v13 = vadd.f32 %v801_v57, %v761_v22  ;;  %v866_v22 = vmul.f32 %v865_v20, %v3577_v41  ;;  %v833_v57 = vmul.f32 %v831_v47, %v3579_v17  ;;  %v882_v31 = vmul.f32 %v3582_v32, %v2603_v63 }
 0x1e4   : > { %v2784_v2 = vld [vmem:[#allocation4 + $0x2] sm:$0xff]  ;;  %v2799_v39 = vld [vmem:[#allocation4 + $0xa] sm:$0xff]  ;;  %v827_v29 = vadd.f32 %v825_v61, %v795_v48  ;;  %v3583_v20 = vmov %v3582_v32  ;;  %v834_v47 = vadd.f32 %v832_v49, %v802_v11  ;;  %v811_v63 = vadd.f32 %v809_v44, %v2775_v30 }
 0x1e5   : > { %v2795_v8 = vld [vmem:[#allocation4 + $0x8] sm:$0xff]  ;;  %v883_v34 = vmul.f32 %v3583_v20, %v2611_v26  ;;  %v3584_v11 = vstv %s2655_s30  ;;  %s2959_s30 = sld [smem:[#allocation10 + $0x41]]  ;;  %v1131_v26 = vpop.permute.xlu1 %1130  ;;  %v1091_v17 = vstv %s2877_s18 }
 0x1e6   : > { %v2797_v4 = vld [vmem:[#allocation4 + $0x9] sm:$0xff]  ;;  %s3198_s18 = sld [smem:[#allocation10 + $0x3d]] }
 0x1e7   : > { %v2801_v52 = vld [vmem:[#allocation4 + $0x3] sm:$0xff]  ;;  %v2812_v24 = vld [vmem:[#allocation4 + $0xb] sm:$0xff]  ;;  %v885_v49 = vadd.f32 %v883_v34, %v811_v63 }
 0x1e8   : > { %v2814_v9 = vld [vmem:[#allocation4 + $0x4] sm:$0xff]  ;;  %v2816_v19 = vld [vmem:[#allocation4 + $0xc] sm:$0xff] }
 0x1e9   : > { %v2824_v55 = vld [vmem:[#allocation4 + $0x5] sm:$0xff]  ;;  %v2826_v18 = vld [vmem:[#allocation4 + $0xd] sm:$0xff] }
 0x1ea   : > { %v2828_v51 = vld [vmem:[#allocation4 + $0x6] sm:$0xff]  ;;  %v2834_v33 = vld [vmem:[#allocation4 + $0xe] sm:$0xff] }
 0x1eb   : > { %3571 = vst [vmem:[#allocation22_spill] sm:$0xff] %v2834_v33  ;;  %v1033_v33 = vstv %s2793_s10  ;;  %s3129_s10 = sld [smem:[#allocation10 + $0x4a]] }
 0x1ec   : > { %1061 = vst.msk [vmem:[#allocation4] sm:$0xff] %vm479_vm7, %v1053_v23  ;;  %v3574_v23 = vld [vmem:[#allocation30_spill] sm:$0xff] }
 0x1ed   : > { %1063 = vst.msk [vmem:[#allocation4 + $0x10] sm:$0x3f] %vm482_vm8, %v1057_v59  ;;  %v824_v16 = vmul.f32 %v823_v35, %v3574_v23  ;;  %v3580_v59 = vstv %s2644_s24  ;;  %s2929_s24 = sld [smem:[#allocation10 + $0x33]] }
 0x1ee   : > { %1062 = vst.msk [vmem:[#allocation4 + $0x8] sm:$0xff] %vm479_vm7, %v1055_v12  ;;  %v874_v12 = vmul.f32 %v3580_v59, %v2599_v58  ;;  %v3581_v35 = vmov %v3580_v59  ;;  %v810_v58 = vadd.f32 %v808_v43, %v2768_v15  ;;  %v3586_v59 = vmov %v3584_v11 }
 0x1ef   : > { %v875_v23 = vmul.f32 %v3581_v35, %v2601_v62  ;;  %v826_v41 = vadd.f32 %v824_v16, %v794_v40  ;;  %v835_v62 = vadd.f32 %v833_v57, %v803_v13  ;;  %v869_v40 = vadd.f32 %v867_v3, %v827_v29  ;;  %v3585_v57 = vld [vmem:[#allocation37_spill] sm:$0xff] }
 0x1f0   : > { %v876_v16 = vadd.f32 %v874_v12, %v834_v47  ;;  %v884_v15 = vadd.f32 %v882_v31, %v810_v58  ;;  %v890_v13 = vmul.f32 %v3584_v11, %v2613_v45  ;;  %v891_v44 = vmul.f32 %v3586_v59, %v3585_v57  ;;  %v3589_v45 = vld [vmem:[#allocation36_spill] sm:$0xff] }
 0x1f1   : > { %v868_v48 = vadd.f32 %v866_v22, %v826_v41  ;;  %v877_v43 = vadd.f32 %v875_v23, %v835_v62  ;;  %v3587_v29 = vstv %s2659_s15  ;;  %v3590_v31 = vstv %s2663_s20  ;;  %s2974_s15 = sld [smem:[#allocation10 + $0x48]] }
 0x1f2   : > { %v898_v30 = vmul.f32 %v3587_v29, %v2624_v25  ;;  %v3588_v22 = vmov %v3587_v29  ;;  %v892_v32 = vadd.f32 %v890_v13, %v3589_v45  ;;  %v906_v41 = vmul.f32 %v3590_v31, %v2628_v46  ;;  %v1127_v29 = vpop.permute.xlu2 %1126  ;;  %s2978_s20 = sld [smem:[#allocation10 + $0x4f]] }
 0x1f3   : > { %v2896_v61 = vld [vmem:[#allocation4] sm:$0xff]  ;;  %v899_v3 = vmul.f32 %v3588_v22, %v2626_v28  ;;  %v3591_v20 = vmov %v3590_v31  ;;  %v3592_v25 = vstv %s2668_s4  ;;  %v893_v63 = vadd.f32 %v891_v44, %v2622_v14  ;;  %s2984_s4 = sld [smem:[#allocation10 + $0x56]] }
 0x1f4   : > { %v907_v34 = vmul.f32 %v3591_v20, %v2632_v7  ;;  %v932_v58 = vmul.f32 %v3592_v25, %v2674_v0  ;;  %v900_v46 = vadd.f32 %v898_v30, %v868_v48  ;;  %v3593_v11 = vmov %v3592_v25 }
 0x1f5   : > { %v2907_v12 = vld [vmem:[#allocation4 + $0x8] sm:$0xff]  ;;  %v933_v7 = vmul.f32 %v3593_v11, %v2683_v5  ;;  %v901_v22 = vadd.f32 %v899_v3, %v869_v40  ;;  %v3594_v14 = vstv %s2676_s0  ;;  %v3596_v30 = vstv %s2681_s5  ;;  %s2989_s0 = sld [smem:[#allocation10 + $0x5d]] }
 0x1f6   : > { %v2909_v35 = vld [vmem:[#allocation4 + $0x1] sm:$0xff]  ;;  %v2911_v23 = vld [vmem:[#allocation4 + $0x9] sm:$0xff]  ;;  %v940_v48 = vmul.f32 %v3594_v14, %v2685_v53  ;;  %v3595_v44 = vmov %v3594_v14  ;;  %v948_v45 = vmul.f32 %v3596_v30, %v2694_v42  ;;  %v3597_v40 = vmov %v3596_v30  ;;  %v1129_v14 = vpop.permute.xlu0 %1128  ;;  %s3010_s5 = sld [smem:[#allocation10 + $0x34]] }
 0x1f7   : > { %v2923_v28 = vld [vmem:[#allocation4 + $0x2] sm:$0xff]  ;;  %v2925_v47 = vld [vmem:[#allocation4 + $0xa] sm:$0xff]  ;;  %v941_v5 = vmul.f32 %v3595_v44, %v2687_v27  ;;  %v949_v3 = vmul.f32 %v3597_v40, %v2696_v6  ;;  %v3598_v53 = vstv %s2692_s1  ;;  %v1083_v44 = vstv %s2863_s17  ;;  %s3020_s1 = sld [smem:[#allocation10 + $0x3b]] }
 0x1f8   : > { %v2927_v62 = vld [vmem:[#allocation4 + $0x3] sm:$0xff]  ;;  %v2936_v0 = vld [vmem:[#allocation4 + $0xb] sm:$0xff]  ;;  %v956_v11 = vmul.f32 %v3598_v53, %v2698_v60  ;;  %v3599_v27 = vmov %v3598_v53  ;;  %v908_v13 = vadd.f32 %v906_v41, %v876_v16  ;;  %v909_v6 = vadd.f32 %v907_v34, %v877_v43  ;;  %s3192_s17 = sld [smem:[#allocation10 + $0x36]] }
 0x1f9   : > { %v2938_v57 = vld [vmem:[#allocation4 + $0x4] sm:$0xff]  ;;  %v2940_v59 = vld [vmem:[#allocation4 + $0xc] sm:$0xff]  ;;  %v957_v42 = vmul.f32 %v3599_v27, %v2703_v38  ;;  %v934_v40 = vadd.f32 %v932_v58, %v892_v32  ;;  %v935_v60 = vadd.f32 %v933_v7, %v893_v63  ;;  %v1099_v38 = vstv %s2883_s19  ;;  %s3211_s19 = sld [smem:[#allocation10 + $0x44]] }
 0x1fa   : > { %v2953_v31 = vld [vmem:[#allocation4 + $0x5] sm:$0xff]  ;;  %v2955_v20 = vld [vmem:[#allocation4 + $0xd] sm:$0xff]  ;;  %v1107_v53 = vstv %s2887_s22  ;;  %v942_v16 = vadd.f32 %v940_v48, %v900_v46  ;;  %v943_v43 = vadd.f32 %v941_v5, %v901_v22  ;;  %v950_v32 = vadd.f32 %v948_v45, %v908_v13  ;;  %s3226_s22 = sld [smem:[#allocation10 + $0x4b]] }
 0x1fb   : > { %v2957_v25 = vld [vmem:[#allocation4 + $0x6] sm:$0xff]  ;;  %v2971_v30 = vld [vmem:[#allocation4 + $0xe] sm:$0xff]  ;;  %v3600_v41 = vstv %s2701_s6  ;;  %v951_v58 = vadd.f32 %v949_v3, %v909_v6  ;;  %v958_v63 = vadd.f32 %v956_v11, %v884_v15  ;;  %v959_v7 = vadd.f32 %v957_v42, %v885_v49  ;;  %s3073_s6 = sld [smem:[#allocation10 + $0x57]] }
 0x1fc   : > { %1135 = vst.msk [vmem:[#allocation4] sm:$0xff] %vm479_vm7, %v1127_v29  ;;  %v1115_v29 = vstv %s2891_s23  ;;  %v964_v34 = vmul.f32 %v3600_v41, %v2705_v56  ;;  %v3602_v46 = vstv %s2712_s7  ;;  %v3604_v48 = vstv %s2723_s8  ;;  %s3081_s7 = sld [smem:[#allocation10 + $0x5e]] }
 0x1fd   : > { %1136 = vst.msk [vmem:[#allocation4 + $0x8] sm:$0xff] %vm479_vm7, %v1129_v14  ;;  %v972_v22 = vmul.f32 %v3602_v46, %v2714_v36  ;;  %v3603_v13 = vmov %v3602_v46  ;;  %v980_v5 = vmul.f32 %v3604_v48, %v2718_v1  ;;  %v3605_v15 = vmov %v3604_v48  ;;  %s3106_s8 = sld [smem:[#allocation10 + $0x3c]] }
 0x1fe   : > { %1137 = vst.msk [vmem:[#allocation4 + $0x10] sm:$0x3f] %vm482_vm8, %v1131_v26  ;;  %v3601_v26 = vmov %v3600_v41  ;;  %v966_v14 = vadd.f32 %v964_v34, %v934_v40  ;;  %v973_v56 = vmul.f32 %v3603_v13, %v2716_v21  ;;  %v981_v49 = vmul.f32 %v3605_v15, %v2725_v10  ;;  %s3229_s23 = sld [smem:[#allocation10 + $0x52]] }
 0x1ff   : > { %v965_v27 = vmul.f32 %v3601_v26, %v2707_v54  ;;  %v3606_v54 = vstv %s2734_s21  ;;  %v1141_v11 = vstv %s2929_s24  ;;  %v974_v42 = vadd.f32 %v972_v22, %v942_v16  ;;  %s3038_s21 = sld [smem:[#allocation10 + $0x42]] }
 0x200   : > { %v994_v3 = vmul.f32 %v3606_v54, %v2780_v50  ;;  %v975_v36 = vadd.f32 %v973_v56, %v943_v43  ;;  %v3607_v6 = vmov %v3606_v54  ;;  %v3608_v1 = vstv %s2742_s12  ;;  %s3052_s12 = sld [smem:[#allocation10 + $0x49]] }
 0x201   : > { %v967_v45 = vadd.f32 %v965_v27, %v935_v60  ;;  %v995_v21 = vmul.f32 %v3607_v6, %v2795_v8  ;;  %v1002_v40 = vmul.f32 %v3608_v1, %v2782_v37  ;;  %v3609_v10 = vmov %v3608_v1  ;;  %s3235_s24 = sld [smem:[#allocation10 + $0x59]] }
 0x202   : > { %v1003_v50 = vmul.f32 %v3609_v10, %v2797_v4  ;;  %v3610_v41 = vstv %s2749_s29  ;;  %v1149_v37 = vstv %s2942_s28  ;;  %v982_v46 = vadd.f32 %v980_v5, %v950_v32  ;;  %s3117_s29 = sld [smem:[#allocation10 + $0x43]] }
 0x203   : > { %v3018_v60 = vld [vmem:[#allocation4] sm:$0xff]  ;;  %v1010_v34 = vmul.f32 %v3610_v41, %v2784_v2  ;;  %v3611_v16 = vmov %v3610_v41  ;;  %v983_v4 = vadd.f32 %v981_v49, %v951_v58  ;;  %v3612_v22 = vstv %s2754_s16  ;;  %s3063_s16 = sld [smem:[#allocation10 + $0x50]]  ;;  %v1201_v49 = vpop.permute.xlu2 %1200 }
 0x204   : > { %v1011_v43 = vmul.f32 %v3611_v16, %v2799_v39  ;;  %v3031_v26 = vld [vmem:[#allocation4 + $0x8] sm:$0xff]  ;;  %v1018_v2 = vmul.f32 %v3612_v22, %v2801_v52  ;;  %v3613_v13 = vmov %v3612_v22  ;;  %v996_v54 = vadd.f32 %v994_v3, %v966_v14  ;;  %s3240_s28 = sld [smem:[#allocation10 + $0x60]] }
 0x205   : > { %v3033_v8 = vld [vmem:[#allocation4 + $0x1] sm:$0xff]  ;;  %v1019_v56 = vmul.f32 %v3613_v13, %v2812_v24  ;;  %v3046_v39 = vld [vmem:[#allocation4 + $0x9] sm:$0xff]  ;;  %v1157_v6 = vstv %s2959_s30  ;;  %v997_v1 = vadd.f32 %v995_v21, %v967_v45  ;;  %v1004_v10 = vadd.f32 %v1002_v40, %v974_v42  ;;  %v1203_v21 = vpop.permute.xlu0 %1202  ;;  %s3265_s30 = sld [smem:[#allocation10 + $0x37]] }
 0x206   : > { %v3036_v27 = vld [vmem:[#allocation4 + $0x2] sm:$0xff]  ;;  %v3048_v48 = vld [vmem:[#allocation4 + $0xa] sm:$0xff]  ;;  %v1005_v13 = vadd.f32 %v1003_v50, %v975_v36  ;;  %v1012_v24 = vadd.f32 %v1010_v34, %v982_v46  ;;  %v1013_v58 = vadd.f32 %v1011_v43, %v983_v4  ;;  %v3614_v45 = vstv %s2759_s9  ;;  %v3617_v4 = vld [vmem:[#allocation22_spill] sm:$0xff]  ;;  %s3100_s9 = sld [smem:[#allocation10 + $0x35]] }
 0x207   : > { %v3050_v15 = vld [vmem:[#allocation4 + $0x3] sm:$0xff]  ;;  %v3055_v32 = vld [vmem:[#allocation4 + $0xb] sm:$0xff]  ;;  %v1026_v42 = vmul.f32 %v3614_v45, %v2814_v9  ;;  %v1020_v22 = vadd.f32 %v1018_v2, %v958_v63  ;;  %v1021_v14 = vadd.f32 %v1019_v56, %v959_v7  ;;  %v3615_v36 = vmov %v3614_v45  ;;  %v1205_v9 = vpop.permute.xlu1 %1204 }
 0x208   : > { %v3058_v5 = vld [vmem:[#allocation4 + $0x4] sm:$0xff]  ;;  %v3060_v52 = vld [vmem:[#allocation4 + $0xc] sm:$0xff]  ;;  %v1027_v50 = vmul.f32 %v3615_v36, %v2816_v19  ;;  %v1034_v34 = vmul.f32 %v1033_v33, %v2824_v55  ;;  %v1035_v46 = vmul.f32 %v1033_v33, %v2826_v18  ;;  %v3616_v63 = vstv %s2810_s11  ;;  %s3135_s11 = sld [smem:[#allocation10 + $0x51]] }
 0x209   : > { %v3065_v41 = vld [vmem:[#allocation4 + $0x5] sm:$0xff]  ;;  %v3067_v16 = vld [vmem:[#allocation4 + $0xd] sm:$0xff]  ;;  %v1028_v43 = vadd.f32 %v1026_v42, %v996_v54  ;;  %v1042_v7 = vmul.f32 %v3616_v63, %v2828_v51  ;;  %v3618_v19 = vmov %v3616_v63  ;;  %v3619_v54 = vstv %s2822_s25  ;;  %s3142_s25 = sld [smem:[#allocation10 + $0x58]] }
 0x20a   : > { %v3070_v3 = vld [vmem:[#allocation4 + $0x6] sm:$0xff]  ;;  %v3078_v40 = vld [vmem:[#allocation4 + $0xe] sm:$0xff]  ;;  %v1043_v2 = vmul.f32 %v3618_v19, %v3617_v4  ;;  %v1029_v55 = vadd.f32 %v1027_v50, %v997_v1  ;;  %v1036_v56 = vadd.f32 %v1034_v34, %v1004_v10  ;;  %v1215_v33 = vstv %s3010_s5  ;;  %s3320_s5 = sld [smem:[#allocation10 + $0x5a]] }
 0x20b   : > { %1209 = vst.msk [vmem:[#allocation4] sm:$0xff] %vm479_vm7, %v1201_v49  ;;  %v1068_v49 = vmul.f32 %v3619_v54, %v2896_v61  ;;  %v1037_v18 = vadd.f32 %v1035_v46, %v1005_v13  ;;  %v3620_v51 = vmov %v3619_v54  ;;  %v3621_v42 = vstv %s2849_s14  ;;  %s3151_s14 = sld [smem:[#allocation10 + $0x5f]] }
 0x20c   : > { %1210 = vst.msk [vmem:[#allocation4 + $0x8] sm:$0xff] %vm479_vm7, %v1203_v21  ;;  %v1069_v45 = vmul.f32 %v3620_v51, %v2907_v12  ;;  %v1076_v21 = vmul.f32 %v3621_v42, %v2909_v35  ;;  %v3622_v36 = vmov %v3621_v42  ;;  %v1084_v61 = vmul.f32 %v1083_v44, %v2923_v28 }
 0x20d   : > { %1211 = vst.msk [vmem:[#allocation4 + $0x10] sm:$0x3f] %vm482_vm8, %v1205_v9  ;;  %v1077_v1 = vmul.f32 %v3622_v36, %v2911_v23  ;;  %v1085_v10 = vmul.f32 %v1083_v44, %v2925_v47  ;;  %v1092_v12 = vmul.f32 %v1091_v17, %v2927_v62  ;;  %v1223_v13 = vstv %s3020_s1  ;;  %s3358_s1 = sld [smem:[#allocation10 + $0x61]] }
 0x20e   : > { %v1044_v35 = vadd.f32 %v1042_v7, %v1012_v24  ;;  %v1045_v50 = vadd.f32 %v1043_v2, %v1013_v58  ;;  %v1093_v23 = vmul.f32 %v1091_v17, %v2936_v0  ;;  %v1231_v34 = vstv %s3038_s21  ;;  %s2125_s21 = smov 32  }
 0x20f   : > { %v1070_v9 = vadd.f32 %v1068_v49, %v1028_v43  ;;  %v1239_v47 = vstv %s3052_s12  ;;  %v1247_v44 = vstv %s3063_s16  ;;  %v1255_v46 = vstv %s3073_s6  ;;  %s2126_s12 = smov 16   ;;  %s2127_s16 = smov 48  }
 0x210   : > { %v1071_v62 = vadd.f32 %v1069_v45, %v1029_v55  ;;  %v1078_v24 = vadd.f32 %v1076_v21, %v1036_v56  ;;  %v1079_v58 = vadd.f32 %v1077_v1, %v1037_v18  ;;  %v1263_v43 = vstv %s3081_s7  ;;  %v1275_v21 = vpop.permute.xlu2 %1274  ;;  %s2128_s6 = smov 80   ;;  %s2129_s7 = smov 64  }
 0x211   : > { %v1086_v7 = vadd.f32 %v1084_v61, %v1044_v35  ;;  %v1087_v4 = vadd.f32 %v1085_v10, %v1045_v50  ;;  %v1094_v19 = vadd.f32 %v1092_v12, %v1020_v22  ;;  %v1100_v2 = vmul.f32 %v1099_v38, %v2938_v57  ;;  %v1279_v10 = vpop.permute.xlu1 %1278 }
 0x212   : > { %v3137_v28 = vld [vmem:[#allocation4] sm:$0xff]  ;;  %v1095_v49 = vadd.f32 %v1093_v23, %v1021_v14  ;;  %v1101_v18 = vmul.f32 %v1099_v38, %v2940_v59  ;;  %v1108_v51 = vmul.f32 %v1107_v53, %v2953_v31  ;;  %v1109_v22 = vmul.f32 %v1107_v53, %v2955_v20 }
 0x213   : > { %v3144_v63 = vld [vmem:[#allocation4 + $0x8] sm:$0xff]  ;;  %v1102_v36 = vadd.f32 %v1100_v2, %v1070_v9  ;;  %v1116_v14 = vmul.f32 %v1115_v29, %v2957_v25  ;;  %v1117_v59 = vmul.f32 %v1115_v29, %v2971_v30  ;;  %v1142_v31 = vmul.f32 %v1141_v11, %v3018_v60  ;;  %v1277_v25 = vpop.permute.xlu0 %1276 }
 0x214   : > { %v3146_v17 = vld [vmem:[#allocation4 + $0x1] sm:$0xff]  ;;  %v3156_v55 = vld [vmem:[#allocation4 + $0x9] sm:$0xff]  ;;  %v1103_v1 = vadd.f32 %v1101_v18, %v1071_v62  ;;  %v1110_v30 = vadd.f32 %v1108_v51, %v1078_v24  ;;  %v1111_v29 = vadd.f32 %v1109_v22, %v1079_v58  ;;  %v1289_v60 = vstv %s3100_s9  ;;  %s2130_s9 = smov 96  }
 0x215   : > { %v3148_v0 = vld [vmem:[#allocation4 + $0x2] sm:$0xff]  ;;  %v3158_v56 = vld [vmem:[#allocation4 + $0xa] sm:$0xff]  ;;  %v1143_v12 = vmul.f32 %v1141_v11, %v3031_v26  ;;  %v1150_v35 = vmul.f32 %v1149_v37, %v3033_v8  ;;  %v1151_v50 = vmul.f32 %v1149_v37, %v3046_v39  ;;  %v1297_v23 = vstv %s3106_s8  ;;  %s2131_s8 = smov 112  }
 0x216   : > { %v3160_v54 = vld [vmem:[#allocation4 + $0x3] sm:$0xff]  ;;  %v3171_v45 = vld [vmem:[#allocation4 + $0xb] sm:$0xff]  ;;  %v1158_v9 = vmul.f32 %v1157_v6, %v3036_v27  ;;  %v1159_v11 = vmul.f32 %v1157_v6, %v3048_v48  ;;  %v3623_v26 = vstv %s2974_s15  ;;  %v1118_v39 = vadd.f32 %v1116_v14, %v1086_v7  ;;  %s3272_s15 = sld [smem:[#allocation10 + $0x3e]] }
 0x217   : > { %v3173_v42 = vld [vmem:[#allocation4 + $0x4] sm:$0xff]  ;;  %v3175_v57 = vld [vmem:[#allocation4 + $0xc] sm:$0xff]  ;;  %v1166_v8 = vmul.f32 %v3623_v26, %v3050_v15  ;;  %v3624_v62 = vmov %v3623_v26  ;;  %v1119_v24 = vadd.f32 %v1117_v59, %v1087_v4  ;;  %v1144_v58 = vadd.f32 %v1142_v31, %v1102_v36 }
 0x218   : > { %v3186_v20 = vld [vmem:[#allocation4 + $0x5] sm:$0xff]  ;;  %v3188_v38 = vld [vmem:[#allocation4 + $0xd] sm:$0xff]  ;;  %v1167_v37 = vmul.f32 %v3624_v62, %v3055_v32  ;;  %v1305_v2 = vstv %s3117_s29  ;;  %v1313_v27 = vstv %s3129_s10  ;;  %v1321_v48 = vstv %s3135_s11  ;;  %s1872_s29 = sshll.u32 %s2168_s13, 3  ;;  %s1658_s13 = scalar_lea.sflag [#allocation8], %s2240_s27 }
 0x219   : > { %v3190_v53 = vld [vmem:[#allocation4 + $0x6] sm:$0xff]  ;;  %v3194_v61 = vld [vmem:[#allocation4 + $0xe] sm:$0xff]  ;;  %v1329_v15 = vstv %s3142_s25  ;;  %v1337_v6 = vstv %s3151_s14  ;;  %v1145_v32 = vadd.f32 %v1143_v12, %v1103_v1  ;;  %v1152_v18 = vadd.f32 %v1150_v35, %v1110_v30  ;;  %s1669_s25 = scalar_lea.hbm %s3520_s2, %s1872_s29  ;;  %s3636_s14 = sshll.u32 %s2240_s27, 3 }
 0x21a   : > { %1283 = vst.msk [vmem:[#allocation4] sm:$0xff] %vm479_vm7, %v1275_v21  ;;  %v1153_v7 = vadd.f32 %v1151_v50, %v1111_v29  ;;  %v3625_v4 = vstv %s2978_s20  ;;  %v1160_v22 = vadd.f32 %v1158_v9, %v1118_v39  ;;  %v1161_v21 = vadd.f32 %v1159_v11, %v1119_v24  ;;  %s3290_s20 = sld [smem:[#allocation10 + $0x45]] }
 0x21b   : > { %1284 = vst.msk [vmem:[#allocation4 + $0x8] sm:$0xff] %vm479_vm7, %v1277_v25  ;;  %v1174_v51 = vmul.f32 %v3625_v4, %v3058_v5  ;;  %v1168_v36 = vadd.f32 %v1166_v8, %v1094_v19  ;;  %v1169_v14 = vadd.f32 %v1167_v37, %v1095_v49  ;;  %v3626_v59 = vmov %v3625_v4 }
 0x21c   : > { %1285 = vst.msk [vmem:[#allocation4 + $0x10] sm:$0x3f] %vm482_vm8, %v1279_v10  ;;  %v1175_v31 = vmul.f32 %v3626_v59, %v3060_v52  ;;  %v3627_v1 = vstv %s2984_s4  ;;  %v3629_v5 = vstv %s2989_s0  ;;  %v1216_v52 = vmul.f32 %v1215_v33, %v3137_v28  ;;  %s3307_s4 = sld [smem:[#allocation10 + $0x4c]] }
 0x21d   : > { %v1176_v25 = vadd.f32 %v1174_v51, %v1144_v58  ;;  %v1182_v10 = vmul.f32 %v3627_v1, %v3065_v41  ;;  %v3628_v30 = vmov %v3627_v1  ;;  %v1190_v35 = vmul.f32 %v3629_v5, %v3070_v3  ;;  %s3314_s0 = sld [smem:[#allocation10 + $0x53]] }
 0x21e   : > { %v1183_v29 = vmul.f32 %v3628_v30, %v3067_v16  ;;  %v3630_v50 = vmov %v3629_v5  ;;  %v1363_v11 = vstv %s3192_s17  ;;  %v1177_v16 = vadd.f32 %v1175_v31, %v1145_v32  ;;  %s175_s17 = scalar_lea.vmem [#allocation11], %s3636_s14 }
 0x21f   : > { %v1191_v19 = vmul.f32 %v3630_v50, %v3078_v40  ;;  %v1184_v26 = vadd.f32 %v1182_v10, %v1152_v18  ;;  %v1217_v40 = vmul.f32 %v1215_v33, %v3144_v63  ;;  %v1224_v37 = vmul.f32 %v1223_v13, %v3146_v17  ;;  %v1349_v18 = vpop.permute.xlu2 %1348 }
 0x220   : > { %v1185_v3 = vadd.f32 %v1183_v29, %v1153_v7  ;;  %v1225_v39 = vmul.f32 %v1223_v13, %v3156_v55  ;;  %v1232_v24 = vmul.f32 %v1231_v34, %v3148_v0  ;;  %v1371_v32 = vstv %s3198_s18  ;;  %s1671_s18 = sshll.u32 %s175_s17, 4  ;;  %s1672_s18 = int_to_ptr.vmem [resolvable:$true] %s1671_s18 }
 0x221   : > { %v3251_v12 = vld [vmem:[#allocation4] sm:$0xff]  ;;  %v1192_v7 = vadd.f32 %v1190_v35, %v1160_v22  ;;  %v1233_v17 = vmul.f32 %v1231_v34, %v3158_v56  ;;  %v1240_v13 = vmul.f32 %v1239_v47, %v3160_v54  ;;  %v1241_v0 = vmul.f32 %v1239_v47, %v3171_v45  ;;  %v1351_v22 = vpop.permute.xlu0 %1350  ;;  %v1353_v45 = vpop.permute.xlu1 %1352 }
 0x222   : > { %v1288_v49 = vld [vmem:[#allocation4 + $0x8] sm:$0xff]  ;;  %v1193_v59 = vadd.f32 %v1191_v19, %v1161_v21  ;;  %v1218_v34 = vadd.f32 %v1216_v52, %v1176_v25  ;;  %v1379_v47 = vstv %s3211_s19  ;;  %v1387_v54 = vstv %s3226_s22  ;;  %s1673_s19 = sshll.u32 %s1669_s25, 4  ;;  %s1674_s19 = int_to_ptr.hbm [resolvable:$true] %s1673_s19 }
 0x223   : > { %v1295_v9 = vld [vmem:[#allocation4 + $0x1] sm:$0xff]  ;;  %v1296_v8 = vld [vmem:[#allocation4 + $0x9] sm:$0xff]  ;;  %v1219_v31 = vadd.f32 %v1217_v40, %v1177_v16  ;;  %v1395_v1 = vstv %s3229_s23  ;;  %v1403_v21 = vstv %s3235_s24  ;;  %v1411_v25 = vstv %s3240_s28  ;;  %s2051_s22 = sshra.s32 %s1674_s19, 4  ;;  %s2057_s28 = scalar_lea.hbm %s3520_s2, 16  ;;  %s2052_s22 = int_to_ptr.hbm [resolvable:$true] %s2051_s22 }
 0x224   : > { %v3262_v41 = vld [vmem:[#allocation4 + $0x2] sm:$0xff]  ;;  %v1304_v28 = vld [vmem:[#allocation4 + $0xa] sm:$0xff]  ;;  %v1226_v10 = vadd.f32 %v1224_v37, %v1184_v26  ;;  %v1227_v30 = vadd.f32 %v1225_v39, %v1185_v3  ;;  %v1234_v29 = vadd.f32 %v1232_v24, %v1192_v7  ;;  %v1248_v5 = vmul.f32 %v1247_v44, %v3173_v42  ;;  %s2053_s23 = scalar_lea.hbm %s2052_s22, 8  ;;  %p2058_p9 = scmp.lt.s32.totalorder %s2052_s22, %s3520_s2 }
 0x225   : > { %v3270_v62 = vld [vmem:[#allocation4 + $0x3] sm:$0xff]  ;;  %v3283_v58 = vld [vmem:[#allocation4 + $0xb] sm:$0xff]  ;;  %v1235_v35 = vadd.f32 %v1233_v17, %v1193_v59  ;;  %v3326_v50 = vadd.f32 %v1240_v13, %v1168_v36  ;;  %v3328_v19 = vadd.f32 %v1241_v0, %v1169_v14  ;;  %v1249_v52 = vmul.f32 %v1247_v44, %v3175_v57  ;;  %p2054_p1 = scmp.ne.s32.totalorder %s2052_s22, %s2053_s23  ;;  %p2059_p10 = scmp.lt.s32.totalorder %s2057_s28, %s2053_s23 }
 0x226   : > { %v3285_v33 = vld [vmem:[#allocation4 + $0x4] sm:$0xff]  ;;  %v3287_v63 = vld [vmem:[#allocation4 + $0xc] sm:$0xff]  ;;  %v1250_v16 = vadd.f32 %v1248_v5, %v1218_v34  ;;  %v1256_v26 = vmul.f32 %v1255_v46, %v3186_v20  ;;  %v1257_v42 = vmul.f32 %v1255_v46, %v3188_v38  ;;  %v1264_v3 = vmul.f32 %v1263_v43, %v3190_v53 }
 0x227   : > { %v3301_v55 = vld [vmem:[#allocation4 + $0x5] sm:$0xff]  ;;  %v3303_v4 = vld [vmem:[#allocation4 + $0xd] sm:$0xff]  ;;  %v1251_v40 = vadd.f32 %v1249_v52, %v1219_v31  ;;  %v1265_v36 = vmul.f32 %v1263_v43, %v3194_v61  ;;  %v1290_v14 = vmul.f32 %v1289_v60, %v3251_v12  ;;  %v1437_v44 = vstv %s3265_s30  ;;  %p2055_p4 = pnand %p2054_p1, %p2213_p3  ;;  %p2060_p2 = por %p2059_p10, %p2058_p9 }
 0x228   : > { %v3305_v51 = vld [vmem:[#allocation4 + $0x6] sm:$0xff]  ;;  %v3309_v56 = vld [vmem:[#allocation4 + $0xe] sm:$0xff]  ;;  %v1291_v57 = vmul.f32 %v1289_v60, %v1288_v49  ;;  %v1298_v20 = vmul.f32 %v1297_v23, %v1295_v9  ;;  %v1299_v37 = vmul.f32 %v1297_v23, %v1296_v8  ;;  %v1306_v46 = vmul.f32 %v1305_v2, %v3262_v41 }
 0x229   : > { %1357 = vst.msk [vmem:[#allocation4] sm:$0xff] %vm479_vm7, %v1349_v18  ;;  %v1258_v38 = vadd.f32 %v1256_v26, %v1226_v10  ;;  %v1259_v43 = vadd.f32 %v1257_v42, %v1227_v30  ;;  %v1307_v53 = vmul.f32 %v1305_v2, %v1304_v28  ;;  %v1445_v12 = vstv %s3272_s15  ;;  %v1425_v42 = vpop.permute.xlu0 %1424  ;;  %p2056_p8 = pneg %p2055_p4 }
 0x22a   : > { %1358 = vst.msk [vmem:[#allocation4 + $0x8] sm:$0xff] %vm479_vm7, %v1351_v22  ;;  %v1266_v60 = vadd.f32 %v1264_v3, %v1234_v29  ;;  %v1267_v49 = vadd.f32 %v1265_v36, %v1235_v35  ;;  %v1453_v23 = vstv %s3290_s20  ;;  %v1461_v8 = vstv %s3307_s4 }
 0x22b   : > { %1359 = vst.msk [vmem:[#allocation4 + $0x10] sm:$0x3f] %vm482_vm8, %v1353_v45  ;;  %v1292_v18 = vadd.f32 %v1290_v14, %v1250_v16  ;;  %v1314_v41 = vmul.f32 %v1313_v27, %v3270_v62  ;;  %v1469_v28 = vstv %s3314_s0  ;;  %v1477_v13 = vstv %s3320_s5  ;;  %v1423_v62 = vpop.permute.xlu2 %1422  ;;  %p2061_p11 = pnand %p2060_p2, %p2056_p8 }
 0x22c   : > { %v1293_v0 = vadd.f32 %v1291_v57, %v1251_v40  ;;  %v1300_v22 = vadd.f32 %v1298_v20, %v1258_v38  ;;  %v1301_v59 = vadd.f32 %v1299_v37, %v1259_v43  ;;  %v1308_v34 = vadd.f32 %v1306_v46, %v1266_v60 }
 0x22d   : > { %v1309_v30 = vadd.f32 %v1307_v53, %v1267_v49  ;;  %v1315_v29 = vmul.f32 %v1313_v27, %v3283_v58  ;;  %v1322_v5 = vmul.f32 %v1321_v48, %v3285_v33  ;;  %v1330_v35 = vmul.f32 %v1329_v15, %v3301_v55  ;;  %v1427_v55 = vpop.permute.xlu1 %1426 }
 0x22e   : > { %v1331_v3 = vmul.f32 %v1329_v15, %v3303_v4  ;;  %v1338_v36 = vmul.f32 %v1337_v6, %v3305_v51  ;;  %v1339_v14 = vmul.f32 %v1337_v6, %v3309_v56  ;;  %v1485_v37 = vstv %s3358_s1 }
 0x22f   : > { %v1324_v57 = vadd.f32 %v1322_v5, %v1292_v18  ;;  %v1332_v20 = vadd.f32 %v1330_v35, %v1300_v22  ;;  %v1323_v51 = vmul.f32 %v1321_v48, %v3287_v63  ;;  %v1316_v46 = vadd.f32 %v1314_v41, %v3326_v50 }
 0x230   : > { %v1361_v61 = vld [vmem:[#allocation4] sm:$0xff]  ;;  %v1340_v6 = vadd.f32 %v1338_v36, %v1308_v34  ;;  %v1341_v56 = vadd.f32 %v1339_v14, %v1309_v30 }
 0x231   : > { %v1362_v39 = vld [vmem:[#allocation4 + $0x8] sm:$0xff]  ;;  %v1364_v40 = vmul.f32 %v1363_v11, %v1361_v61  ;;  %v1317_v61 = vadd.f32 %v1315_v29, %v3328_v19  ;;  %v1325_v60 = vadd.f32 %v1323_v51, %v1293_v0 }
 0x232   : > { %v1369_v9 = vld [vmem:[#allocation4 + $0x1] sm:$0xff]  ;;  %v1370_v7 = vld [vmem:[#allocation4 + $0x9] sm:$0xff] }
 0x233   : > { %v1377_v24 = vld [vmem:[#allocation4 + $0x2] sm:$0xff]  ;;  %v1378_v17 = vld [vmem:[#allocation4 + $0xa] sm:$0xff]  ;;  %v1372_v27 = vmul.f32 %v1371_v32, %v1369_v9  ;;  %v1373_v58 = vmul.f32 %v1371_v32, %v1370_v7  ;;  %v1333_v32 = vadd.f32 %v1331_v3, %v1301_v59  ;;  %v1366_v38 = vadd.f32 %v1364_v40, %v1324_v57 }
 0x234   : > { %v1385_v2 = vld [vmem:[#allocation4 + $0x3] sm:$0xff]  ;;  %v1386_v45 = vld [vmem:[#allocation4 + $0xb] sm:$0xff]  ;;  %v1380_v15 = vmul.f32 %v1379_v47, %v1377_v24  ;;  %v1381_v4 = vmul.f32 %v1379_v47, %v1378_v17  ;;  %v1365_v47 = vmul.f32 %v1363_v11, %v1362_v39 }
 0x235   : > { %v1393_v31 = vld [vmem:[#allocation4 + $0x4] sm:$0xff]  ;;  %v3370_v10 = vld [vmem:[#allocation4 + $0xc] sm:$0xff]  ;;  %v1374_v43 = vadd.f32 %v1372_v27, %v1332_v20  ;;  %v1375_v53 = vadd.f32 %v1373_v58, %v1333_v32  ;;  %v1388_v48 = vmul.f32 %v1387_v54, %v1385_v2  ;;  %v1389_v50 = vmul.f32 %v1387_v54, %v1386_v45 }
 0x236   : > { %v1401_v52 = vld [vmem:[#allocation4 + $0x5] sm:$0xff]  ;;  %v1402_v16 = vld [vmem:[#allocation4 + $0xd] sm:$0xff]  ;;  %v1382_v49 = vadd.f32 %v1380_v15, %v1340_v6  ;;  %v1383_v9 = vadd.f32 %v1381_v4, %v1341_v56  ;;  %v1396_v63 = vmul.f32 %v1395_v1, %v1393_v31  ;;  %v1367_v39 = vadd.f32 %v1365_v47, %v1325_v60 }
 0x237   : > { %v1409_v26 = vld [vmem:[#allocation4 + $0x6] sm:$0xff]  ;;  %v1410_v33 = vld [vmem:[#allocation4 + $0xe] sm:$0xff]  ;;  %v1404_v24 = vmul.f32 %v1403_v21, %v1401_v52  ;;  %v1405_v11 = vmul.f32 %v1403_v21, %v1402_v16  ;;  %v1390_v36 = vadd.f32 %v1388_v48, %v1316_v46  ;;  %v1391_v4 = vadd.f32 %v1389_v50, %v1317_v61 }
 0x238   : > { %1431 = vst.msk [vmem:[#allocation4] sm:$0xff] %vm479_vm7, %v1423_v62  ;;  %v1412_v18 = vmul.f32 %v1411_v25, %v1409_v26  ;;  %v1413_v19 = vmul.f32 %v1411_v25, %v1410_v33  ;;  %v1398_v7 = vadd.f32 %v1396_v63, %v1366_v38 }
 0x239   : > { %1432 = vst.msk [vmem:[#allocation4 + $0x8] sm:$0xff] %vm479_vm7, %v1425_v42  ;;  %v1406_v17 = vadd.f32 %v1404_v24, %v1374_v43  ;;  %v1407_v2 = vadd.f32 %v1405_v11, %v1375_v53 }
 0x23a   : > { %1433 = vst.msk [vmem:[#allocation4 + $0x10] sm:$0x3f] %vm482_vm8, %v1427_v55  ;;  %v1414_v34 = vadd.f32 %v1412_v18, %v1382_v49  ;;  %v1415_v54 = vadd.f32 %v1413_v19, %v1383_v9 }
 0x23f   : > { %v1435_v41 = vld [vmem:[#allocation4] sm:$0xff] }
 0x240   : > { %v1438_v0 = vmul.f32 %v1437_v44, %v1435_v41  ;;  %v1443_v22 = vld [vmem:[#allocation4 + $0x1] sm:$0xff] }
 0x241   : > { %v1451_v21 = vld [vmem:[#allocation4 + $0x2] sm:$0xff]  ;;  %v1446_v31 = vmul.f32 %v1445_v12, %v1443_v22  ;;  %v1452_v25 = vld [vmem:[#allocation4 + $0xa] sm:$0xff] }
 0x242   : > { %v1459_v59 = vld [vmem:[#allocation4 + $0x3] sm:$0xff]  ;;  %v1454_v62 = vmul.f32 %v1453_v23, %v1451_v21  ;;  %v1460_v30 = vld [vmem:[#allocation4 + $0xb] sm:$0xff]  ;;  %v1440_v29 = vadd.f32 %v1438_v0, %v1398_v7  ;;  %v1455_v35 = vmul.f32 %v1453_v23, %v1452_v25 }
 0x243   : > { %v1444_v45 = vld [vmem:[#allocation4 + $0x9] sm:$0xff]  ;;  %v1462_v52 = vmul.f32 %v1461_v8, %v1459_v59  ;;  %v1448_v42 = vadd.f32 %v1446_v31, %v1406_v17  ;;  %v1463_v40 = vmul.f32 %v1461_v8, %v1460_v30 }
 0x244   : > { %v1447_v5 = vmul.f32 %v1445_v12, %v1444_v45  ;;  %v1467_v16 = vld [vmem:[#allocation4 + $0x4] sm:$0xff]  ;;  %v1456_v3 = vadd.f32 %v1454_v62, %v1414_v34  ;;  %v1476_v58 = vld [vmem:[#allocation4 + $0xd] sm:$0xff]  ;;  %v1397_v12 = vmul.f32 %v1395_v1, %v3370_v10  ;;  %v1457_v14 = vadd.f32 %v1455_v35, %v1415_v54 }
 0x245   : > { %v1475_v26 = vld [vmem:[#allocation4 + $0x5] sm:$0xff]  ;;  %v1470_v27 = vmul.f32 %v1469_v28, %v1467_v16  ;;  %v1484_v55 = vld [vmem:[#allocation4 + $0xe] sm:$0xff]  ;;  %v1479_v6 = vmul.f32 %v1477_v13, %v1476_v58  ;;  %v1464_v46 = vadd.f32 %v1462_v52, %v1390_v36  ;;  %v1465_v38 = vadd.f32 %v1463_v40, %v1391_v4 }
 0x246   : > { %v1483_v33 = vld [vmem:[#allocation4 + $0x6] sm:$0xff]  ;;  %v1449_v23 = vadd.f32 %v1447_v5, %v1407_v2  ;;  %v1478_v8 = vmul.f32 %v1477_v13, %v1475_v26  ;;  %v1399_v51 = vadd.f32 %v1397_v12, %v1367_v39  ;;  %v1487_v56 = vmul.f32 %v1485_v37, %v1484_v55 }
 0x247   : > { %v1436_v15 = vld [vmem:[#allocation4 + $0x8] sm:$0xff]  ;;  %v1472_v20 = vadd.f32 %v1470_v27, %v1440_v29  ;;  %v1486_v32 = vmul.f32 %v1485_v37, %v1483_v33 }
 0x248   : > { %v1468_v57 = vld [vmem:[#allocation4 + $0xc] sm:$0xff]  ;;  %v1439_v47 = vmul.f32 %v1437_v44, %v1436_v15  ;;  %v1480_v43 = vadd.f32 %v1478_v8, %v1448_v42  ;;  %v1481_v53 = vadd.f32 %v1479_v6, %v1449_v23  ;;  %v1489_v60 = vadd.f32 %v1487_v56, %v1457_v14 }
 0x249   : > { %v1488_v1 = vadd.f32 %v1486_v32, %v1456_v3  ;;  %v1471_v10 = vmul.f32 %v1469_v28, %v1468_v57  ;;  %v3631_v42 = vlaneseq }
 0x24a   : > { %v1441_v61 = vadd.f32 %v1439_v47, %v1399_v51  ;;  %v1490_v49 = vadd.f32 %v1480_v43, %v1472_v20  ;;  %v1493_v48 = vadd.f32 %v1489_v60, %v1465_v38 }
 0x24b   : > { %v1492_v9 = vadd.f32 %v1488_v1, %v1464_v46  ;;  %vm1537_vm2 = vcmp.lt.s32.totalorder %v3631_v42, 16  ;;  %vm1545_vm3 = vcmp.ge.s32.totalorder %v3631_v42, 16  ;;  %vm1546_vm4 = vcmp.lt.s32.totalorder %v3631_v42, 32 }
 0x24c   : > { %v1473_v63 = vadd.f32 %v1471_v10, %v1441_v61  ;;  %vm1547_vm5 = vmand %vm1545_vm3, %vm1546_vm4  ;;  %vm1554_vm6 = vcmp.ge.s32.totalorder %v3631_v42, 32  ;;  %vm1590_vm3 = vcmp.ge.s32.totalorder %v3631_v42, 96  ;;  %vm1591_vm4 = vcmp.lt.s32.totalorder %v3631_v42, 112 }
 0x24d   : > { %v1494_v24 = vadd.f32 %v1492_v9, %v1490_v49 }
 0x24e   : > { %v1491_v11 = vadd.f32 %v1481_v53, %v1473_v63 }
 0x24f   : > { %v1864_v39 = vmul.f32 -1.442695, %v1494_v24  ;;  %v1648_v24 = vld [vmem:[%s2246_s3] sm:$0xff] }
 0x250   : > { %v1495_v13 = vadd.f32 %v1493_v48, %v1491_v11 }
 0x251   : > { %1984 = vpow2.f32 %v1864_v39 }
 0x252   : > { %v1865_v37 = vmul.f32 -1.442695, %v1495_v13 }
 0x254   : > { %1986 = vpow2.f32 %v1865_v37 }
 0x257   : > { %v1985_v44 = vpop.eup %1984 }
 0x258   : > { %v1502_v50 = vadd.f32 1.0, %v1985_v44 }
 0x25a   : > { %v1987_v18 = vpop.eup %1986  ;;  %1988 = vrcp.f32 %v1502_v50  ;;  %v1515_v2 = vand.u32 2147483648, %v1502_v50  ;;  %v1513_v21 = vand.u32 2147483647, %v1502_v50  ;;  %vm1509_vm10 = vweird.f32 %v1502_v50 }
 0x25b   : > { %v1503_v19 = vadd.f32 1.0, %v1987_v18 }
 0x25c   : > { %v1516_v45 = vor.u32 1.1754944e-38, %v1515_v2  ;;  %vm1514_vm13 = vcmp.eq.f32.partialorder %v1513_v21, 8.507059e+37 }
 0x25d   : > { %1990 = vrcp.f32 %v1503_v19  ;;  %v1530_v54 = vand.u32 2147483648, %v1503_v19  ;;  %v1528_v25 = vand.u32 2147483647, %v1503_v19  ;;  %vm1524_vm14 = vweird.f32 %v1503_v19 }
 0x25f   : > { %v1531_v5 = vor.u32 1.1754944e-38, %v1530_v54  ;;  %vm1529_vm1 = vcmp.eq.f32.partialorder %v1528_v25, 8.507059e+37 }
 0x260   : > { %v1989_v28 = vpop.eup %1988 }
 0x261   : > { %v1505_v41 = vmul.f32 %v1989_v28, %v1502_v50  ;;  %vm1510_vm9 = vweird.f32 %v1989_v28 }
 0x262   : > { %vm1511_vm11 = vmor %vm1509_vm10, %vm1510_vm9  ;;  %vm1563_vm9 = vcmp.ge.s32.totalorder %v3631_v42, 48  ;;  %vm1564_vm10 = vcmp.lt.s32.totalorder %v3631_v42, 64 }
 0x263   : > { %v1991_v7 = vpop.eup %1990  ;;  %v1506_v17 = vsub.f32 1.0, %v1505_v41 }
 0x264   : > { %v1520_v0 = vmul.f32 %v1991_v7, %v1503_v19  ;;  %vm1525_vm12 = vweird.f32 %v1991_v7 }
 0x265   : > { %v1507_v22 = vmul.f32 %v1989_v28, %v1506_v17  ;;  %vm1526_vm15 = vmor %vm1524_vm14, %vm1525_vm12  ;;  %vm3462_vm12 = vcmp.ge.s32.totalorder %v3631_v42, 64 }
 0x266   : > { %v1521_v59 = vsub.f32 1.0, %v1520_v0 }
 0x267   : > { %v1508_v34 = vadd.f32 %v1989_v28, %v1507_v22 }
 0x268   : > { %v1522_v31 = vmul.f32 %v1991_v7, %v1521_v59 }
 0x269   : > { %v1512_v62 = vsel %vm1511_vm11, %v1989_v28, %v1508_v34  ;;  %vm1565_vm11 = vmand %vm1563_vm9, %vm1564_vm10 }
 0x26a   : > { %v1517_v30 = vsel %vm1514_vm13, %v1516_v45, %v1512_v62  ;;  %v1523_v29 = vadd.f32 %v1991_v7, %v1522_v31  ;;  %vm3467_vm13 = vcmp.lt.s32.totalorder %v3631_v42, 80 }
 0x26b   : > { %1534 = vst.msk [vmem:[#allocation4] sm:$0xff] %vm479_vm7, %v1517_v30  ;;  %vm1574_vm14 = vmand %vm3462_vm12, %vm3467_vm13 }
 0x26c   : > { %v1527_v35 = vsel %vm1526_vm15, %v1991_v7, %v1523_v29  ;;  %vm1581_vm15 = vcmp.ge.s32.totalorder %v3631_v42, 80 }
 0x26d   : > { %v1532_v52 = vsel %vm1529_vm1, %v1531_v5, %v1527_v35  ;;  %vm1582_vm1 = vcmp.lt.s32.totalorder %v3631_v42, 96 }
 0x26e   : > { %1535 = vst.msk [vmem:[#allocation4 + $0x8] sm:$0xff] %vm479_vm7, %v1532_v52  ;;  %vm1555_vm7 = vcmp.lt.s32.totalorder %v3631_v42, 48 }
 0x26f   : > { %vm1556_vm8 = vmand %vm1554_vm6, %vm1555_vm7  ;;  %vm1599_vm6 = vcmp.ge.s32.totalorder %v3631_v42, 112  ;;  %vm1600_vm7 = vcmp.lt.s32.totalorder %v3631_v42, 128 }
 0x272   : > { %v1549_v16 = vld [vmem:[#allocation4 + $0x2] sm:$0x1]  ;;  %v1540_v26 = vld [vmem:[#allocation4 + $0x1] sm:$0x1]  ;;  %v1536_v3 = vld [vmem:[#allocation4] sm:$0x1] }
 0x273   : > { %1551 = vrot.lane.b32.xlu1 %v1549_v16, %s2125_s21  ;;  %1542 = vrot.lane.b32.xlu2 %v1540_v26, %s2126_s12  ;;  %1539 = vst.msk [vmem:[#allocation5] sm:$0x1] %vm1537_vm2, %v1536_v3  ;;  %v1558_v55 = vld [vmem:[#allocation4 + $0x3] sm:$0x1]  ;;  %v1576_v36 = vld [vmem:[#allocation4 + $0x5] sm:$0x1] }
 0x274   : > { %v1567_v12 = vld [vmem:[#allocation4 + $0x4] sm:$0x1]  ;;  %v1585_v4 = vld [vmem:[#allocation4 + $0x6] sm:$0x1]  ;;  %v1594_v57 = vld [vmem:[#allocation4 + $0x7] sm:$0x1] }
 0x275   : > { %v1605_v40 = vld [vmem:[#allocation4 + $0x9] sm:$0x1]  ;;  %v1603_v27 = vld [vmem:[#allocation4 + $0x8] sm:$0x1]  ;;  %v1617_v58 = vld [vmem:[#allocation4 + $0xb] sm:$0x1] }
 0x276   : > { %1607 = vrot.lane.b32.xlu0 %v1605_v40, %s2126_s12  ;;  %1604 = vst.msk [vmem:[#allocation5 + $0x1] sm:$0x1] %vm1537_vm2, %v1603_v27  ;;  %v1611_v33 = vld [vmem:[#allocation4 + $0xa] sm:$0x1]  ;;  %v1623_v23 = vld [vmem:[#allocation4 + $0xc] sm:$0x1]  ;;  %vm1583_vm2 = vmand %vm1581_vm15, %vm1582_vm1 }
 0x277   : > { %v1635_v14 = vld [vmem:[#allocation4 + $0xe] sm:$0x1]  ;;  %v1629_v15 = vld [vmem:[#allocation4 + $0xd] sm:$0x1]  ;;  %v1641_v20 = vld [vmem:[#allocation4 + $0xf] sm:$0x1] }
 0x27b   : > { %1619 = vrot.lane.b32.xlu1 %v1617_v58, %s2127_s16  ;;  %1613 = vrot.lane.b32.xlu2 %v1611_v33, %s2125_s21 }
 0x27e   : > { %1560 = vrot.lane.b32.xlu0 %v1558_v55, %s2127_s16 }
 0x283   : > { %1578 = vrot.lane.b32.xlu1 %v1576_v36, %s2128_s6  ;;  %1569 = vrot.lane.b32.xlu2 %v1567_v12, %s2129_s7 }
 0x286   : > { %1625 = vrot.lane.b32.xlu0 %v1623_v23, %s2129_s7 }
 0x28b   : > { %1637 = vrot.lane.b32.xlu1 %v1635_v14, %s2130_s9  ;;  %1631 = vrot.lane.b32.xlu2 %v1629_v15, %s2128_s6 }
 0x28e   : > { %1587 = vrot.lane.b32.xlu0 %v1585_v4, %s2130_s9 }
 0x293   : > { %1596 = vrot.lane.b32.xlu2 %v1594_v57, %s2131_s8 }
 0x296   : > { %1643 = vrot.lane.b32.xlu0 %v1641_v20, %s2131_s8 }
 0x2cd   : > { %v1543_v8 = vpop.permute.xlu2 %1542 }
 0x2ce   : > { %1548 = vst.msk [vmem:[#allocation5] sm:$0x1] %vm1547_vm5, %v1543_v8 }
 0x2d5   : > { %v1614_v32 = vpop.permute.xlu2 %1613 }
 0x2dd   : > { %v1570_v46 = vpop.permute.xlu2 %1569 }
 0x2e5   : > { %v1552_v51 = vpop.permute.xlu1 %1551  ;;  %v1632_v10 = vpop.permute.xlu2 %1631 }
 0x2e6   : > { %1557 = vst.msk [vmem:[#allocation5] sm:$0x1] %vm1556_vm8, %v1552_v51 }
 0x2e8   : > { %v1608_v6 = vpop.permute.xlu0 %1607 }
 0x2e9   : > { %1610 = vst.msk [vmem:[#allocation5 + $0x1] sm:$0x1] %vm1547_vm5, %v1608_v6  ;;  %vm1592_vm5 = vmand %vm1590_vm3, %vm1591_vm4 }
 0x2ea   : > { %1616 = vst.msk [vmem:[#allocation5 + $0x1] sm:$0x1] %vm1556_vm8, %v1614_v32  ;;  %vm1601_vm8 = vmand %vm1599_vm6, %vm1600_vm7 }
 0x2ed   : > { %v1620_v38 = vpop.permute.xlu1 %1619  ;;  %v1597_v49 = vpop.permute.xlu2 %1596 }
 0x2ee   : > { %1622 = vst.msk [vmem:[#allocation5 + $0x1] sm:$0x1] %vm1565_vm11, %v1620_v38 }
 0x2f0   : > { %v1561_v43 = vpop.permute.xlu0 %1560 }
 0x2f1   : > { %1566 = vst.msk [vmem:[#allocation5] sm:$0x1] %vm1565_vm11, %v1561_v43 }
 0x2f2   : > { %1575 = vst.msk [vmem:[#allocation5] sm:$0x1] %vm1574_vm14, %v1570_v46 }
 0x2f5   : > { %v1579_v1 = vpop.permute.xlu1 %1578 }
 0x2f6   : > { %1584 = vst.msk [vmem:[#allocation5] sm:$0x1] %vm1583_vm2, %v1579_v1 }
 0x2f8   : > { %v1626_v53 = vpop.permute.xlu0 %1625 }
 0x2f9   : > { %1628 = vst.msk [vmem:[#allocation5 + $0x1] sm:$0x1] %vm1574_vm14, %v1626_v53 }
 0x2fa   : > { %1634 = vst.msk [vmem:[#allocation5 + $0x1] sm:$0x1] %vm1583_vm2, %v1632_v10 }
 0x2fd   : > { %v1638_v60 = vpop.permute.xlu1 %1637 }
 0x2fe   : > { %1640 = vst.msk [vmem:[#allocation5 + $0x1] sm:$0x1] %vm1592_vm5, %v1638_v60 }
 0x300   : > { %v1588_v61 = vpop.permute.xlu0 %1587 }
 0x301   : > { %1593 = vst.msk [vmem:[#allocation5] sm:$0x1] %vm1592_vm5, %v1588_v61 }
 0x302   : > { %1602 = vst.msk [vmem:[#allocation5] sm:$0x1] %vm1601_vm8, %v1597_v49 }
 0x308   : > { %v1644_v9 = vpop.permute.xlu0 %1643 }
 0x309   : > { %1646 = vst.msk [vmem:[#allocation5 + $0x1] sm:$0x1] %vm1601_vm8, %v1644_v9 }
 0x310   : > { %v1647_v48 = vld [vmem:[#allocation5] sm:$0x3] }
 0x311   : > { %v1651_v63 = vperm.slane %v1647_v48, 1  ;;  %v1650_v11 = vperm.slane %v1647_v48, 0 }
 0x313   : > { %v1652_v39 = vrot.slane %v1651_v63, 4 }
 0x315   : > { %v1653_v13 = vsel %vm183_vm0, %v1650_v11, %v1652_v39 }
 0x316   : > { %v1655_v37 = vmul.f32 %v1653_v13, %v1648_v24 }
 0x318   : > { %1656 = vst [vmem:[%s175_s17] sm:$0xff] %v1655_v37 }
 0x319   : > { %2064 = shalt.err (!%p2061_p11)
}
 0x31a   : > { %1879 = dma.vmem_to_hbm [thread:$0]  (%p2213_p3), %s1672_s18, 128, %s1674_s19, %s1658_s13  }
 0x31b PF: > { %s3637_s27 = sld [smem:[#allocation15_spill]] }
 0x31c   : > { %s3639_s4 = sld [smem:[#allocation18_spill]] }
 0x321   : > { %s1685_s0 = sand.u32 1, %s3637_s27  }
 0x322   : > { %p3640_p12 = scmp.ge.s32.totalorder %s3639_s4, 2  ;;  %s1686_s5 = scalar_lea.sflag [#allocation8], %s1685_s0 }
 0x324   : > { %p1890_p13 = pnand %p3640_p12, %p2182_p6 }
 0x326   : > { %p1891_p0 = pneg %p1890_p13 }
 0x328   : > { %2090 = dma.done.wait (%p1891_p0), %s1686_s5, 128  }
 0x329   : > { %2092 = vsyncadd (%p1891_p0), %s1686_s5, 4294967168  ;;  %s3641_s12 = sld [smem:[#allocation20_spill]] }
 0x32a   : > { %s3642_s9 = sld [smem:[#allocation16_spill]] }
 0x32b   : > { %s3643_s10 = sld [smem:[#allocation17_spill]] }
 0x32c   : > { %s3644_s11 = sld [smem:[#allocation21_spill]] }
 0x32f   : > { %p16_p5 = scmp.ge.s32.totalorder %s3641_s12, 4  }
 0x331   :  { %18 = sbr.rel (!%p16_p5) target bundleno = 9 (0x9), region = 80 }
 0x336   :  { %1692 = vsyncpa [#allocation7], 1 }
 0x337   :  { %1694 = vsyncpa [#allocation7 + $0x1], 1 }
 0x338   :  { %1695 = vsyncpa [#allocation8], 1 }
 0x339   :  { %1697 = vsyncpa [#allocation8 + $0x1], 1 }
 0x33a   :  { %1698 = vsyncpa [#allocation9], 1 }
 0x33b   :  { %1700 = vsyncpa [#allocation9 + $0x1], 1 }

</bundles_post_ra>
